<compile_context>
chip_gen: v5e
topology: v5e:2x2
jax: 0.10.0
libtpu: 0.0.40
codegen_flags: <defaults>
</compile_context>

<pallas_src>
import math

import jax
import jax.numpy as jnp
from jax.experimental import pallas as pl
from jax.experimental.pallas import tpu as pltpu

D_MODEL = 128
N_HEAD = 4
HEAD_DIM = D_MODEL // N_HEAD
DIM_FF = 512
LN_EPS = 1e-5
LANE = 128


# ----------------------------------------------------------------------------
# Fused kernel: [x+PE] -> encoder layer x L -> mean pool -> classifier
# ----------------------------------------------------------------------------
def _layernorm_fused(y, w, b):
    # independent sum / sum-of-squares reductions (pipeline on the XLU),
    # var = E[y^2] - mu^2 instead of two dependent passes.
    mu = jnp.mean(y, axis=-1, keepdims=True)
    msq = jnp.mean(y * y, axis=-1, keepdims=True)
    var = msq - mu * mu
    return (y - mu) * jax.lax.rsqrt(var + LN_EPS) * w + b


def fused_transformer_kernel(x_ref, pe_ref,
                             wqkv_ref, bqkv_ref, wo_ref, bo_ref,
                             ln1w_ref, ln1b_ref, ln2w_ref, ln2b_ref,
                             w1_ref, b1_ref, w2_ref, b2_ref,
                             fcw_ref, fcb_ref, o_ref):
    B, S, D = x_ref.shape              # B == batch tile of this grid step
    L = wqkv_ref.shape[0]
    BS = B * S

    # positional encoding added in-kernel; fold batch into the row dimension
    x = (x_ref[...] + pe_ref[...]).reshape(BS, D)                  # f32 [B*S, D]

    for l in range(L):                 # static unrolled layer loop
        # ---- multi-head self-attention (scale pre-folded into W_q) --------
        qkv = jnp.dot(x.astype(jnp.bfloat16), wqkv_ref[l],
                      preferred_element_type=jnp.float32) + bqkv_ref[l]
        q2 = qkv[:, :D].reshape(B, S, D)
        k2 = qkv[:, D:2 * D].reshape(B, S, D)
        v2 = qkv[:, 2 * D:].reshape(B, S, D)

        # head-major batching [H*B, S, HEAD_DIM]: lane slices + leading concat
        qh = jnp.concatenate(
            [q2[:, :, h * HEAD_DIM:(h + 1) * HEAD_DIM] for h in range(N_HEAD)], axis=0)
        kh = jnp.concatenate(
            [k2[:, :, h * HEAD_DIM:(h + 1) * HEAD_DIM] for h in range(N_HEAD)], axis=0)
        vh = jnp.concatenate(
            [v2[:, :, h * HEAD_DIM:(h + 1) * HEAD_DIM] for h in range(N_HEAD)], axis=0)

        # one batched score matmul + one softmax block + one batched PV matmul
        s = jnp.einsum("bqd,bkd->bqk", qh, kh,
                       preferred_element_type=jnp.float32)          # [H*B, S, S]
        s = s - jnp.max(s, axis=-1, keepdims=True)
        p = jnp.exp(s)
        p = p * pl.reciprocal(jnp.sum(p, axis=-1, keepdims=True), approx=True)
        oh = jnp.einsum("bqk,bkd->bqd", p, vh,
                        preferred_element_type=jnp.float32)         # [H*B, S, hd]

        # recombine heads into their 32-lane slots (lane-offset writes), then
        # a single full-K=128 output projection.
        attn_rows = jnp.concatenate(
            [oh[h * B:(h + 1) * B] for h in range(N_HEAD)], axis=-1)  # [B, S, D]
        attn = jnp.dot(attn_rows.reshape(BS, D).astype(jnp.bfloat16), wo_ref[l],
                       preferred_element_type=jnp.float32) + bo_ref[l]

        # residual + LayerNorm 1 (dropout == identity in eval)
        y = _layernorm_fused(x + attn, ln1w_ref[l], ln1b_ref[l])

        # ---- feed-forward (relu) -------------------------------------------
        hdn = jnp.dot(y.astype(jnp.bfloat16), w1_ref[l],
                      preferred_element_type=jnp.float32) + b1_ref[l]
        hdn = jnp.maximum(hdn, 0.0)
        ff = jnp.dot(hdn.astype(jnp.bfloat16), w2_ref[l],
                     preferred_element_type=jnp.float32) + b2_ref[l]

        # residual + LayerNorm 2
        x = _layernorm_fused(y + ff, ln2w_ref[l], ln2b_ref[l])

    # ---- mean pool over sequence + classifier epilogue (padded lanes) ------
    xm = jnp.mean(x.reshape(B, S, D), axis=1)                      # [B, D]
    o_ref[...] = jnp.dot(xm.astype(jnp.bfloat16), fcw_ref[...],
                         preferred_element_type=jnp.float32) + fcb_ref[...]


# ----------------------------------------------------------------------------
# Parameter handling
# ----------------------------------------------------------------------------
def make_positional_encoding(d_model, max_len=10):
    position = jnp.arange(max_len, dtype=jnp.float32)[:, None]
    div_term = jnp.exp(jnp.arange(0, d_model, 2, dtype=jnp.float32)
                       * (-math.log(10000.0) / d_model))
    pe = jnp.zeros((max_len, d_model), dtype=jnp.float32)
    pe = pe.at[:, 0::2].set(jnp.sin(position * div_term))
    pe = pe.at[:, 1::2].set(jnp.cos(position * div_term))
    return pe[None]  # [1, max_len, d_model]


def init_params(key, vocab_size, num_classes, num_layers=2):
    """Raw parameters in PyTorch layout (out_features, in_features), f32."""
    ks = jax.random.split(key, 2 + 6 * num_layers)
    scale = 0.02
    params = {
        "embedding": scale * jax.random.normal(ks[0], (vocab_size, D_MODEL), jnp.float32),
        "pe": make_positional_encoding(D_MODEL),
        "layers": [],
    }
    idx = 1
    for _ in range(num_layers):
        params["layers"].append(dict(
            in_proj_w=scale * jax.random.normal(ks[idx], (3 * D_MODEL, D_MODEL), jnp.float32),
            in_proj_b=scale * jax.random.normal(ks[idx + 1], (3 * D_MODEL,), jnp.float32),
            out_w=scale * jax.random.normal(ks[idx + 2], (D_MODEL, D_MODEL), jnp.float32),
            out_b=scale * jax.random.normal(ks[idx + 3], (D_MODEL,), jnp.float32),
            ln1_w=jnp.ones((D_MODEL,), jnp.float32),
            ln1_b=jnp.zeros((D_MODEL,), jnp.float32),
            ln2_w=jnp.ones((D_MODEL,), jnp.float32),
            ln2_b=jnp.zeros((D_MODEL,), jnp.float32),
            lin1_w=scale * jax.random.normal(ks[idx + 4], (DIM_FF, D_MODEL), jnp.float32),
            lin1_b=jnp.zeros((DIM_FF,), jnp.float32),
            lin2_w=scale * jax.random.normal(ks[idx + 5], (D_MODEL, DIM_FF), jnp.float32),
            lin2_b=jnp.zeros((D_MODEL,), jnp.float32),
        ))
        idx += 6
    params["fc_w"] = scale * jax.random.normal(ks[idx], (num_classes, D_MODEL), jnp.float32)
    params["fc_b"] = jnp.zeros((num_classes,), jnp.float32)
    return params


def prepare_kernel_params(params):
    """Pre-transpose to [in,out], fold attention scale into W_q/b_q, stack all
    layers along a leading axis, store matmul weights in bf16 (biases / LN
    params stay f32), pad the classifier to a lane-dense width."""
    inv_scale = 1.0 / math.sqrt(HEAD_DIM)
    keys = ("wqkv", "bqkv", "wo", "bo", "ln1w", "ln1b",
            "ln2w", "ln2b", "w1", "b1", "w2", "b2")
    stacks = {k: [] for k in keys}
    for lyr in params["layers"]:
        wqkv = lyr["in_proj_w"].T                               # [D, 3D]
        bqkv = lyr["in_proj_b"]
        wqkv = wqkv.at[:, :D_MODEL].multiply(inv_scale)         # fold 1/sqrt(hd) into Q
        bqkv = bqkv.at[:D_MODEL].multiply(inv_scale)
        stacks["wqkv"].append(wqkv.astype(jnp.bfloat16))
        stacks["bqkv"].append(bqkv[None, :])
        stacks["wo"].append(lyr["out_w"].T.astype(jnp.bfloat16))
        stacks["bo"].append(lyr["out_b"][None, :])
        stacks["ln1w"].append(lyr["ln1_w"][None, :])
        stacks["ln1b"].append(lyr["ln1_b"][None, :])
        stacks["ln2w"].append(lyr["ln2_w"][None, :])
        stacks["ln2b"].append(lyr["ln2_b"][None, :])
        stacks["w1"].append(lyr["lin1_w"].T.astype(jnp.bfloat16))
        stacks["b1"].append(lyr["lin1_b"][None, :])
        stacks["w2"].append(lyr["lin2_w"].T.astype(jnp.bfloat16))
        stacks["b2"].append(lyr["lin2_b"][None, :])
    kp = {k: jnp.stack(v) for k, v in stacks.items()}

    num_classes = params["fc_w"].shape[0]
    c_pad = pl.cdiv(num_classes, LANE) * LANE
    kp["fc_wT"] = (jnp.zeros((D_MODEL, c_pad), jnp.float32)
                   .at[:, :num_classes].set(params["fc_w"].T)).astype(jnp.bfloat16)
    kp["fc_b"] = (jnp.zeros((1, c_pad), jnp.float32)
                  .at[0, :num_classes].set(params["fc_b"]))
    return kp, num_classes


# ----------------------------------------------------------------------------
# Forward wrapper (single fused pallas_call, 1-D batch grid)
# ----------------------------------------------------------------------------
def transformer_classifier_forward(src, params, kparams, num_classes, b_tile=None):
    B, S = src.shape
    assert S <= params["pe"].shape[1], "sequence length exceeds positional-encoding max_len"
    # TODO(synk): for large batches, move the embedding gather in-kernel via
    # PrefetchScalarGridSpec + pl.Element row gather; at this size jnp.take is fine.
    x = jnp.take(params["embedding"], src, axis=0)              # [B, S, D] f32
    pe = params["pe"][:, :S]                                    # [1, S, D] f32
    c_pad = kparams["fc_wT"].shape[1]

    # Batch tile: whole batch at small B; >=32 rows of S=8 per step once B
    # grows (fills the v6e/v7x 256-wide MXU; watch v7x's 64 MiB VMEM for huge tiles).
    if b_tile is None:
        b_tile = B if B <= 64 else 64
    assert B % b_tile == 0, "pick b_tile dividing B (or pad the batch)"
    grid = (B // b_tile,)

    def const_spec(arr):  # weight/bias: constant block -> DMA'd once, VMEM-resident
        nd = arr.ndim
        return pl.BlockSpec(arr.shape, lambda i, _nd=nd: (0,) * _nd)

    weight_args = (kparams["wqkv"], kparams["bqkv"], kparams["wo"], kparams["bo"],
                   kparams["ln1w"], kparams["ln1b"], kparams["ln2w"], kparams["ln2b"],
                   kparams["w1"], kparams["b1"], kparams["w2"], kparams["b2"],
                   kparams["fc_wT"], kparams["fc_b"])

    in_specs = ([pl.BlockSpec((b_tile, S, D_MODEL), lambda i: (i, 0, 0)),
                 const_spec(pe)]
                + [const_spec(w) for w in weight_args])
    out_spec = pl.BlockSpec((b_tile, c_pad), lambda i: (i, 0))

    logits_padded = pl.pallas_call(
        fused_transformer_kernel,
        out_shape=jax.ShapeDtypeStruct((B, c_pad), jnp.float32),
        grid=grid,
        in_specs=in_specs,
        out_specs=out_spec,
        compiler_params=pltpu.CompilerParams(dimension_semantics=("parallel",)),
    )(x, pe, *weight_args)
    return logits_padded[:, :num_classes]


# ----------------------------------------------------------------------------
# Pure-JAX f32 reference (mirrors PyTorch eval forward) for correctness check
# ----------------------------------------------------------------------------
def _layernorm_ref(x, w, b):
    mu = jnp.mean(x, axis=-1, keepdims=True)
    var = jnp.mean((x - mu) ** 2, axis=-1, keepdims=True)
    return (x - mu) * jax.lax.rsqrt(var + LN_EPS) * w + b


def reference_forward(src, params):
    x = jnp.take(params["embedding"], src, axis=0) + params["pe"][:, :src.shape[1]]
    B, S, _ = x.shape
    for lyr in params["layers"]:
        qkv = x @ lyr["in_proj_w"].T + lyr["in_proj_b"]
        q, k, v = jnp.split(qkv, 3, axis=-1)
        sh = lambda t: t.reshape(B, S, N_HEAD, HEAD_DIM).transpose(0, 2, 1, 3)
        qh, kh, vh = sh(q), sh(k), sh(v)
        s = jnp.einsum("bhqd,bhkd->bhqk", qh, kh) / math.sqrt(HEAD_DIM)
        p = jax.nn.softmax(s, axis=-1)
        a = jnp.einsum("bhqk,bhkd->bhqd", p, vh).transpose(0, 2, 1, 3).reshape(B, S, D_MODEL)
        a = a @ lyr["out_w"].T + lyr["out_b"]
        y = _layernorm_ref(x + a, lyr["ln1_w"], lyr["ln1_b"])
        ff = (jnp.maximum(y @ lyr["lin1_w"].T + lyr["lin1_b"], 0.0)
              @ lyr["lin2_w"].T + lyr["lin2_b"])
        x = _layernorm_ref(y + ff, lyr["ln2_w"], lyr["ln2_b"])
    return x.mean(axis=1) @ params["fc_w"].T + params["fc_b"]


# ----------------------------------------------------------------------------
if __name__ == "__main__":
    B, S = 2, 8
    VOCAB, NUM_CLASSES = 16, 8

    key = jax.random.PRNGKey(0)
    k_params, k_src = jax.random.split(key)
    params = init_params(k_params, VOCAB, NUM_CLASSES, num_layers=2)
    kparams, num_classes = prepare_kernel_params(params)
    src = jax.random.randint(k_src, (B, S), 0, VOCAB, dtype=jnp.int32)

    out = transformer_classifier_forward(src, params, kparams, num_classes)
    out = jax.block_until_ready(out)

    ref = reference_forward(src, params)
    assert out.shape == (B, NUM_CLASSES)
    # bf16 weights + approx reciprocal vs f32 reference -> loosened tolerance
    assert jnp.allclose(out, ref, atol=5e-2, rtol=5e-2), (out, ref)

    print("KERNEL_OK")
</pallas_src>

<mosaic_0001>
module attributes {stable_mosaic.version = 11 : i64} {
  func.func @fused_transformer_kernel(%arg0: i32, %arg1: memref<2x8x128xf32, #tpu.memory_space<vmem>>, %arg2: memref<1x8x128xf32, #tpu.memory_space<vmem>>, %arg3: memref<2x128x384xbf16, #tpu.memory_space<vmem>>, %arg4: memref<2x1x384xf32, #tpu.memory_space<vmem>>, %arg5: memref<2x128x128xbf16, #tpu.memory_space<vmem>>, %arg6: memref<2x1x128xf32, #tpu.memory_space<vmem>>, %arg7: memref<2x1x128xf32, #tpu.memory_space<vmem>>, %arg8: memref<2x1x128xf32, #tpu.memory_space<vmem>>, %arg9: memref<2x1x128xf32, #tpu.memory_space<vmem>>, %arg10: memref<2x1x128xf32, #tpu.memory_space<vmem>>, %arg11: memref<2x128x512xbf16, #tpu.memory_space<vmem>>, %arg12: memref<2x1x512xf32, #tpu.memory_space<vmem>>, %arg13: memref<2x512x128xbf16, #tpu.memory_space<vmem>>, %arg14: memref<2x1x128xf32, #tpu.memory_space<vmem>>, %arg15: memref<128x128xbf16, #tpu.memory_space<vmem>>, %arg16: memref<1x128xf32, #tpu.memory_space<vmem>>, %arg17: memref<2x128xf32, #tpu.memory_space<vmem>>) attributes {dimension_semantics = [#tpu.dimension_semantics<parallel>], iteration_bounds = array<i64: 1>, scalar_prefetch = 0 : i64, scratch_operands = 0 : i64, tpu.core_type = #tpu.core_type<tc>, window_params = [{transform_indices = @transform_0, window_bounds = array<i64: 2, 8, 128>}, {pipeline_mode = #tpu.pipeline_mode<synchronous>, transform_indices = @transform_1, window_bounds = array<i64: 1, 8, 128>}, {pipeline_mode = #tpu.pipeline_mode<synchronous>, transform_indices = @transform_2, window_bounds = array<i64: 2, 128, 384>}, {pipeline_mode = #tpu.pipeline_mode<synchronous>, transform_indices = @transform_3, window_bounds = array<i64: 2, 1, 384>}, {pipeline_mode = #tpu.pipeline_mode<synchronous>, transform_indices = @transform_4, window_bounds = array<i64: 2, 128, 128>}, {pipeline_mode = #tpu.pipeline_mode<synchronous>, transform_indices = @transform_5, window_bounds = array<i64: 2, 1, 128>}, {pipeline_mode = #tpu.pipeline_mode<synchronous>, transform_indices = @transform_6, window_bounds = array<i64: 2, 1, 128>}, {pipeline_mode = #tpu.pipeline_mode<synchronous>, transform_indices = @transform_7, window_bounds = array<i64: 2, 1, 128>}, {pipeline_mode = #tpu.pipeline_mode<synchronous>, transform_indices = @transform_8, window_bounds = array<i64: 2, 1, 128>}, {pipeline_mode = #tpu.pipeline_mode<synchronous>, transform_indices = @transform_9, window_bounds = array<i64: 2, 1, 128>}, {pipeline_mode = #tpu.pipeline_mode<synchronous>, transform_indices = @transform_10, window_bounds = array<i64: 2, 128, 512>}, {pipeline_mode = #tpu.pipeline_mode<synchronous>, transform_indices = @transform_11, window_bounds = array<i64: 2, 1, 512>}, {pipeline_mode = #tpu.pipeline_mode<synchronous>, transform_indices = @transform_12, window_bounds = array<i64: 2, 512, 128>}, {pipeline_mode = #tpu.pipeline_mode<synchronous>, transform_indices = @transform_13, window_bounds = array<i64: 2, 1, 128>}, {pipeline_mode = #tpu.pipeline_mode<synchronous>, transform_indices = @transform_14, window_bounds = array<i64: 128, 128>}, {pipeline_mode = #tpu.pipeline_mode<synchronous>, transform_indices = @transform_15, window_bounds = array<i64: 1, 128>}, {transform_indices = @transform_16, window_bounds = array<i64: 2, 128>}]} {
    %c0 = arith.constant 0 : index
    %c0_0 = arith.constant 0 : index
    %c0_1 = arith.constant 0 : index
    %0 = vector.load %arg1[%c0, %c0_0, %c0_1] : memref<2x8x128xf32, #tpu.memory_space<vmem>>, vector<2x8x128xf32>
    %c0_2 = arith.constant 0 : index
    %c0_3 = arith.constant 0 : index
    %c0_4 = arith.constant 0 : index
    %1 = vector.load %arg2[%c0_2, %c0_3, %c0_4] : memref<1x8x128xf32, #tpu.memory_space<vmem>>, vector<1x8x128xf32>
    %2 = vector.broadcast %1 : vector<1x8x128xf32> to vector<2x8x128xf32>
    %3 = arith.addf %0, %2 : vector<2x8x128xf32>
    %4 = vector.shape_cast %3 : vector<2x8x128xf32> to vector<16x128xf32>
    %5 = arith.truncf %4 : vector<16x128xf32> to vector<16x128xbf16>
    %c0_5 = arith.constant 0 : index
    %c0_6 = arith.constant 0 : index
    %c0_7 = arith.constant 0 : index
    %6 = vector.load %arg3[%c0_5, %c0_6, %c0_7] : memref<2x128x384xbf16, #tpu.memory_space<vmem>>, vector<1x128x384xbf16>
    %7 = vector.shape_cast %6 : vector<1x128x384xbf16> to vector<128x384xbf16>
    %cst = arith.constant dense<0.000000e+00> : vector<16x384xf32>
    %8 = tpu.matmul %5, %7, %cst {dimension_numbers = #tpu.dot_dimension_numbers<[1], [0], [0], [1], [0, 0, 1, 1], [], []>} : vector<16x128xbf16>, vector<128x384xbf16>, vector<16x384xf32> -> vector<16x384xf32>
    %c0_8 = arith.constant 0 : index
    %c0_9 = arith.constant 0 : index
    %c0_10 = arith.constant 0 : index
    %9 = vector.load %arg4[%c0_8, %c0_9, %c0_10] : memref<2x1x384xf32, #tpu.memory_space<vmem>>, vector<1x1x384xf32>
    %10 = vector.shape_cast %9 : vector<1x1x384xf32> to vector<1x384xf32>
    %11 = vector.broadcast %10 : vector<1x384xf32> to vector<16x384xf32>
    %12 = arith.addf %8, %11 : vector<16x384xf32>
    %13 = vector.extract_strided_slice %12 {offsets = [0, 0], sizes = [16, 128], strides = [1, 1]} : vector<16x384xf32> to vector<16x128xf32>
    %14 = vector.shape_cast %13 : vector<16x128xf32> to vector<2x8x128xf32>
    %15 = vector.extract_strided_slice %12 {offsets = [0, 128], sizes = [16, 128], strides = [1, 1]} : vector<16x384xf32> to vector<16x128xf32>
    %16 = vector.shape_cast %15 : vector<16x128xf32> to vector<2x8x128xf32>
    %17 = vector.extract_strided_slice %12 {offsets = [0, 256], sizes = [16, 128], strides = [1, 1]} : vector<16x384xf32> to vector<16x128xf32>
    %18 = vector.shape_cast %17 : vector<16x128xf32> to vector<2x8x128xf32>
    %19 = vector.extract_strided_slice %14 {offsets = [0, 0, 0], sizes = [2, 8, 32], strides = [1, 1, 1]} : vector<2x8x128xf32> to vector<2x8x32xf32>
    %20 = vector.extract_strided_slice %14 {offsets = [0, 0, 32], sizes = [2, 8, 32], strides = [1, 1, 1]} : vector<2x8x128xf32> to vector<2x8x32xf32>
    %21 = vector.extract_strided_slice %14 {offsets = [0, 0, 64], sizes = [2, 8, 32], strides = [1, 1, 1]} : vector<2x8x128xf32> to vector<2x8x32xf32>
    %22 = vector.extract_strided_slice %14 {offsets = [0, 0, 96], sizes = [2, 8, 32], strides = [1, 1, 1]} : vector<2x8x128xf32> to vector<2x8x32xf32>
    %23 = tpu.concatenate %19, %20, %21, %22 in 0 : vector<2x8x32xf32>, vector<2x8x32xf32>, vector<2x8x32xf32>, vector<2x8x32xf32> -> vector<8x8x32xf32>
    %24 = vector.extract_strided_slice %16 {offsets = [0, 0, 0], sizes = [2, 8, 32], strides = [1, 1, 1]} : vector<2x8x128xf32> to vector<2x8x32xf32>
    %25 = vector.extract_strided_slice %16 {offsets = [0, 0, 32], sizes = [2, 8, 32], strides = [1, 1, 1]} : vector<2x8x128xf32> to vector<2x8x32xf32>
    %26 = vector.extract_strided_slice %16 {offsets = [0, 0, 64], sizes = [2, 8, 32], strides = [1, 1, 1]} : vector<2x8x128xf32> to vector<2x8x32xf32>
    %27 = vector.extract_strided_slice %16 {offsets = [0, 0, 96], sizes = [2, 8, 32], strides = [1, 1, 1]} : vector<2x8x128xf32> to vector<2x8x32xf32>
    %28 = tpu.concatenate %24, %25, %26, %27 in 0 : vector<2x8x32xf32>, vector<2x8x32xf32>, vector<2x8x32xf32>, vector<2x8x32xf32> -> vector<8x8x32xf32>
    %29 = vector.extract_strided_slice %18 {offsets = [0, 0, 0], sizes = [2, 8, 32], strides = [1, 1, 1]} : vector<2x8x128xf32> to vector<2x8x32xf32>
    %30 = vector.extract_strided_slice %18 {offsets = [0, 0, 32], sizes = [2, 8, 32], strides = [1, 1, 1]} : vector<2x8x128xf32> to vector<2x8x32xf32>
    %31 = vector.extract_strided_slice %18 {offsets = [0, 0, 64], sizes = [2, 8, 32], strides = [1, 1, 1]} : vector<2x8x128xf32> to vector<2x8x32xf32>
    %32 = vector.extract_strided_slice %18 {offsets = [0, 0, 96], sizes = [2, 8, 32], strides = [1, 1, 1]} : vector<2x8x128xf32> to vector<2x8x32xf32>
    %33 = tpu.concatenate %29, %30, %31, %32 in 0 : vector<2x8x32xf32>, vector<2x8x32xf32>, vector<2x8x32xf32>, vector<2x8x32xf32> -> vector<8x8x32xf32>
    "tpu.trace_start"() <{level = 10 : i32, message = "bqd,bkd->bqk"}> : () -> ()
    %cst_11 = arith.constant dense<0.000000e+00> : vector<8x8x8xf32>
    %34 = tpu.matmul %23, %28, %cst_11 {dimension_numbers = #tpu.dot_dimension_numbers<[2], [2], [1], [1], [0, 0, 0, 1, 1, 1], [0], [0]>} : vector<8x8x32xf32>, vector<8x8x32xf32>, vector<8x8x8xf32> -> vector<8x8x8xf32>
    "tpu.trace_stop"() : () -> ()
    %cst_12 = arith.constant dense<0xFF800000> : vector<8x8xf32>
    %35 = vector.multi_reduction <maximumf>, %34, %cst_12 [2] : vector<8x8x8xf32> to vector<8x8xf32>
    %36 = vector.shape_cast %35 : vector<8x8xf32> to vector<8x8x1xf32>
    %37 = vector.broadcast %36 : vector<8x8x1xf32> to vector<8x8x8xf32>
    %38 = arith.subf %34, %37 : vector<8x8x8xf32>
    %39 = math.exp %38 : vector<8x8x8xf32>
    %cst_13 = arith.constant dense<0.000000e+00> : vector<8x8xf32>
    %40 = vector.multi_reduction <add>, %39, %cst_13 [2] : vector<8x8x8xf32> to vector<8x8xf32>
    %41 = vector.shape_cast %40 : vector<8x8xf32> to vector<8x8x1xf32>
    %42 = tpu.reciprocal %41 {approx = true} : vector<8x8x1xf32> -> vector<8x8x1xf32>
    %43 = vector.broadcast %42 : vector<8x8x1xf32> to vector<8x8x8xf32>
    %44 = arith.mulf %39, %43 : vector<8x8x8xf32>
    "tpu.trace_start"() <{level = 10 : i32, message = "bqk,bkd->bqd"}> : () -> ()
    %cst_14 = arith.constant dense<0.000000e+00> : vector<8x8x32xf32>
    %45 = tpu.matmul %44, %33, %cst_14 {dimension_numbers = #tpu.dot_dimension_numbers<[2], [1], [1], [2], [0, 0, 0, 1, 1, 2], [0], [0]>} : vector<8x8x8xf32>, vector<8x8x32xf32>, vector<8x8x32xf32> -> vector<8x8x32xf32>
    "tpu.trace_stop"() : () -> ()
    %46 = vector.extract_strided_slice %45 {offsets = [0, 0, 0], sizes = [2, 8, 32], strides = [1, 1, 1]} : vector<8x8x32xf32> to vector<2x8x32xf32>
    %47 = vector.extract_strided_slice %45 {offsets = [2, 0, 0], sizes = [2, 8, 32], strides = [1, 1, 1]} : vector<8x8x32xf32> to vector<2x8x32xf32>
    %48 = vector.extract_strided_slice %45 {offsets = [4, 0, 0], sizes = [2, 8, 32], strides = [1, 1, 1]} : vector<8x8x32xf32> to vector<2x8x32xf32>
    %49 = vector.extract_strided_slice %45 {offsets = [6, 0, 0], sizes = [2, 8, 32], strides = [1, 1, 1]} : vector<8x8x32xf32> to vector<2x8x32xf32>
    %50 = tpu.concatenate %46, %47, %48, %49 in 2 : vector<2x8x32xf32>, vector<2x8x32xf32>, vector<2x8x32xf32>, vector<2x8x32xf32> -> vector<2x8x128xf32>
    %51 = vector.shape_cast %50 : vector<2x8x128xf32> to vector<16x128xf32>
    %52 = arith.truncf %51 : vector<16x128xf32> to vector<16x128xbf16>
    %c0_15 = arith.constant 0 : index
    %c0_16 = arith.constant 0 : index
    %c0_17 = arith.constant 0 : index
    %53 = vector.load %arg5[%c0_15, %c0_16, %c0_17] : memref<2x128x128xbf16, #tpu.memory_space<vmem>>, vector<1x128x128xbf16>
    %54 = vector.shape_cast %53 : vector<1x128x128xbf16> to vector<128x128xbf16>
    %cst_18 = arith.constant dense<0.000000e+00> : vector<16x128xf32>
    %55 = tpu.matmul %52, %54, %cst_18 {dimension_numbers = #tpu.dot_dimension_numbers<[1], [0], [0], [1], [0, 0, 1, 1], [], []>} : vector<16x128xbf16>, vector<128x128xbf16>, vector<16x128xf32> -> vector<16x128xf32>
    %c0_19 = arith.constant 0 : index
    %c0_20 = arith.constant 0 : index
    %c0_21 = arith.constant 0 : index
    %56 = vector.load %arg6[%c0_19, %c0_20, %c0_21] : memref<2x1x128xf32, #tpu.memory_space<vmem>>, vector<1x1x128xf32>
    %57 = vector.shape_cast %56 : vector<1x1x128xf32> to vector<1x128xf32>
    %58 = vector.broadcast %57 : vector<1x128xf32> to vector<16x128xf32>
    %59 = arith.addf %55, %58 : vector<16x128xf32>
    %60 = arith.addf %4, %59 : vector<16x128xf32>
    %c0_22 = arith.constant 0 : index
    %c0_23 = arith.constant 0 : index
    %c0_24 = arith.constant 0 : index
    %61 = vector.load %arg7[%c0_22, %c0_23, %c0_24] : memref<2x1x128xf32, #tpu.memory_space<vmem>>, vector<1x1x128xf32>
    %62 = vector.shape_cast %61 : vector<1x1x128xf32> to vector<1x128xf32>
    %c0_25 = arith.constant 0 : index
    %c0_26 = arith.constant 0 : index
    %c0_27 = arith.constant 0 : index
    %63 = vector.load %arg8[%c0_25, %c0_26, %c0_27] : memref<2x1x128xf32, #tpu.memory_space<vmem>>, vector<1x1x128xf32>
    %64 = vector.shape_cast %63 : vector<1x1x128xf32> to vector<1x128xf32>
    %cst_28 = arith.constant dense<0.000000e+00> : vector<16xf32>
    %65 = vector.multi_reduction <add>, %60, %cst_28 [1] : vector<16x128xf32> to vector<16xf32>
    %66 = vector.shape_cast %65 : vector<16xf32> to vector<16x1xf32>
    %cst_29 = arith.constant 1.280000e+02 : f32
    %67 = vector.broadcast %cst_29 : f32 to vector<16x1xf32>
    %68 = arith.divf %66, %67 : vector<16x1xf32>
    %69 = arith.mulf %60, %60 : vector<16x128xf32>
    %cst_30 = arith.constant dense<0.000000e+00> : vector<16xf32>
    %70 = vector.multi_reduction <add>, %69, %cst_30 [1] : vector<16x128xf32> to vector<16xf32>
    %71 = vector.shape_cast %70 : vector<16xf32> to vector<16x1xf32>
    %cst_31 = arith.constant 1.280000e+02 : f32
    %72 = vector.broadcast %cst_31 : f32 to vector<16x1xf32>
    %73 = arith.divf %71, %72 : vector<16x1xf32>
    %74 = arith.mulf %68, %68 : vector<16x1xf32>
    %75 = arith.subf %73, %74 : vector<16x1xf32>
    %76 = vector.broadcast %68 : vector<16x1xf32> to vector<16x128xf32>
    %77 = arith.subf %60, %76 : vector<16x128xf32>
    %cst_32 = arith.constant 9.99999974E-6 : f32
    %78 = vector.broadcast %cst_32 : f32 to vector<16x1xf32>
    %79 = arith.addf %75, %78 : vector<16x1xf32>
    %80 = math.rsqrt %79 : vector<16x1xf32>
    %81 = vector.broadcast %80 : vector<16x1xf32> to vector<16x128xf32>
    %82 = arith.mulf %77, %81 : vector<16x128xf32>
    %83 = vector.broadcast %62 : vector<1x128xf32> to vector<16x128xf32>
    %84 = arith.mulf %82, %83 : vector<16x128xf32>
    %85 = vector.broadcast %64 : vector<1x128xf32> to vector<16x128xf32>
    %86 = arith.addf %84, %85 : vector<16x128xf32>
    %87 = arith.truncf %86 : vector<16x128xf32> to vector<16x128xbf16>
    %c0_33 = arith.constant 0 : index
    %c0_34 = arith.constant 0 : index
    %c0_35 = arith.constant 0 : index
    %88 = vector.load %arg11[%c0_33, %c0_34, %c0_35] : memref<2x128x512xbf16, #tpu.memory_space<vmem>>, vector<1x128x512xbf16>
    %89 = vector.shape_cast %88 : vector<1x128x512xbf16> to vector<128x512xbf16>
    %cst_36 = arith.constant dense<0.000000e+00> : vector<16x512xf32>
    %90 = tpu.matmul %87, %89, %cst_36 {dimension_numbers = #tpu.dot_dimension_numbers<[1], [0], [0], [1], [0, 0, 1, 1], [], []>} : vector<16x128xbf16>, vector<128x512xbf16>, vector<16x512xf32> -> vector<16x512xf32>
    %c0_37 = arith.constant 0 : index
    %c0_38 = arith.constant 0 : index
    %c0_39 = arith.constant 0 : index
    %91 = vector.load %arg12[%c0_37, %c0_38, %c0_39] : memref<2x1x512xf32, #tpu.memory_space<vmem>>, vector<1x1x512xf32>
    %92 = vector.shape_cast %91 : vector<1x1x512xf32> to vector<1x512xf32>
    %93 = vector.broadcast %92 : vector<1x512xf32> to vector<16x512xf32>
    %94 = arith.addf %90, %93 : vector<16x512xf32>
    %cst_40 = arith.constant 0.000000e+00 : f32
    %95 = vector.broadcast %cst_40 : f32 to vector<16x512xf32>
    %96 = arith.maximumf %94, %95 : vector<16x512xf32>
    %97 = arith.truncf %96 : vector<16x512xf32> to vector<16x512xbf16>
    %c0_41 = arith.constant 0 : index
    %c0_42 = arith.constant 0 : index
    %c0_43 = arith.constant 0 : index
    %98 = vector.load %arg13[%c0_41, %c0_42, %c0_43] : memref<2x512x128xbf16, #tpu.memory_space<vmem>>, vector<1x512x128xbf16>
    %99 = vector.shape_cast %98 : vector<1x512x128xbf16> to vector<512x128xbf16>
    %cst_44 = arith.constant dense<0.000000e+00> : vector<16x128xf32>
    %100 = tpu.matmul %97, %99, %cst_44 {dimension_numbers = #tpu.dot_dimension_numbers<[1], [0], [0], [1], [0, 0, 1, 1], [], []>} : vector<16x512xbf16>, vector<512x128xbf16>, vector<16x128xf32> -> vector<16x128xf32>
    %c0_45 = arith.constant 0 : index
    %c0_46 = arith.constant 0 : index
    %c0_47 = arith.constant 0 : index
    %101 = vector.load %arg14[%c0_45, %c0_46, %c0_47] : memref<2x1x128xf32, #tpu.memory_space<vmem>>, vector<1x1x128xf32>
    %102 = vector.shape_cast %101 : vector<1x1x128xf32> to vector<1x128xf32>
    %103 = vector.broadcast %102 : vector<1x128xf32> to vector<16x128xf32>
    %104 = arith.addf %100, %103 : vector<16x128xf32>
    %105 = arith.addf %86, %104 : vector<16x128xf32>
    %c0_48 = arith.constant 0 : index
    %c0_49 = arith.constant 0 : index
    %c0_50 = arith.constant 0 : index
    %106 = vector.load %arg9[%c0_48, %c0_49, %c0_50] : memref<2x1x128xf32, #tpu.memory_space<vmem>>, vector<1x1x128xf32>
    %107 = vector.shape_cast %106 : vector<1x1x128xf32> to vector<1x128xf32>
    %c0_51 = arith.constant 0 : index
    %c0_52 = arith.constant 0 : index
    %c0_53 = arith.constant 0 : index
    %108 = vector.load %arg10[%c0_51, %c0_52, %c0_53] : memref<2x1x128xf32, #tpu.memory_space<vmem>>, vector<1x1x128xf32>
    %109 = vector.shape_cast %108 : vector<1x1x128xf32> to vector<1x128xf32>
    %cst_54 = arith.constant dense<0.000000e+00> : vector<16xf32>
    %110 = vector.multi_reduction <add>, %105, %cst_54 [1] : vector<16x128xf32> to vector<16xf32>
    %111 = vector.shape_cast %110 : vector<16xf32> to vector<16x1xf32>
    %cst_55 = arith.constant 1.280000e+02 : f32
    %112 = vector.broadcast %cst_55 : f32 to vector<16x1xf32>
    %113 = arith.divf %111, %112 : vector<16x1xf32>
    %114 = arith.mulf %105, %105 : vector<16x128xf32>
    %cst_56 = arith.constant dense<0.000000e+00> : vector<16xf32>
    %115 = vector.multi_reduction <add>, %114, %cst_56 [1] : vector<16x128xf32> to vector<16xf32>
    %116 = vector.shape_cast %115 : vector<16xf32> to vector<16x1xf32>
    %cst_57 = arith.constant 1.280000e+02 : f32
    %117 = vector.broadcast %cst_57 : f32 to vector<16x1xf32>
    %118 = arith.divf %116, %117 : vector<16x1xf32>
    %119 = arith.mulf %113, %113 : vector<16x1xf32>
    %120 = arith.subf %118, %119 : vector<16x1xf32>
    %121 = vector.broadcast %113 : vector<16x1xf32> to vector<16x128xf32>
    %122 = arith.subf %105, %121 : vector<16x128xf32>
    %cst_58 = arith.constant 9.99999974E-6 : f32
    %123 = vector.broadcast %cst_58 : f32 to vector<16x1xf32>
    %124 = arith.addf %120, %123 : vector<16x1xf32>
    %125 = math.rsqrt %124 : vector<16x1xf32>
    %126 = vector.broadcast %125 : vector<16x1xf32> to vector<16x128xf32>
    %127 = arith.mulf %122, %126 : vector<16x128xf32>
    %128 = vector.broadcast %107 : vector<1x128xf32> to vector<16x128xf32>
    %129 = arith.mulf %127, %128 : vector<16x128xf32>
    %130 = vector.broadcast %109 : vector<1x128xf32> to vector<16x128xf32>
    %131 = arith.addf %129, %130 : vector<16x128xf32>
    %132 = arith.truncf %131 : vector<16x128xf32> to vector<16x128xbf16>
    %c1 = arith.constant 1 : index
    %c0_59 = arith.constant 0 : index
    %c0_60 = arith.constant 0 : index
    %133 = vector.load %arg3[%c1, %c0_59, %c0_60] : memref<2x128x384xbf16, #tpu.memory_space<vmem>>, vector<1x128x384xbf16>
    %134 = vector.shape_cast %133 : vector<1x128x384xbf16> to vector<128x384xbf16>
    %cst_61 = arith.constant dense<0.000000e+00> : vector<16x384xf32>
    %135 = tpu.matmul %132, %134, %cst_61 {dimension_numbers = #tpu.dot_dimension_numbers<[1], [0], [0], [1], [0, 0, 1, 1], [], []>} : vector<16x128xbf16>, vector<128x384xbf16>, vector<16x384xf32> -> vector<16x384xf32>
    %c1_62 = arith.constant 1 : index
    %c0_63 = arith.constant 0 : index
    %c0_64 = arith.constant 0 : index
    %136 = vector.load %arg4[%c1_62, %c0_63, %c0_64] : memref<2x1x384xf32, #tpu.memory_space<vmem>>, vector<1x1x384xf32>
    %137 = vector.shape_cast %136 : vector<1x1x384xf32> to vector<1x384xf32>
    %138 = vector.broadcast %137 : vector<1x384xf32> to vector<16x384xf32>
    %139 = arith.addf %135, %138 : vector<16x384xf32>
    %140 = vector.extract_strided_slice %139 {offsets = [0, 0], sizes = [16, 128], strides = [1, 1]} : vector<16x384xf32> to vector<16x128xf32>
    %141 = vector.shape_cast %140 : vector<16x128xf32> to vector<2x8x128xf32>
    %142 = vector.extract_strided_slice %139 {offsets = [0, 128], sizes = [16, 128], strides = [1, 1]} : vector<16x384xf32> to vector<16x128xf32>
    %143 = vector.shape_cast %142 : vector<16x128xf32> to vector<2x8x128xf32>
    %144 = vector.extract_strided_slice %139 {offsets = [0, 256], sizes = [16, 128], strides = [1, 1]} : vector<16x384xf32> to vector<16x128xf32>
    %145 = vector.shape_cast %144 : vector<16x128xf32> to vector<2x8x128xf32>
    %146 = vector.extract_strided_slice %141 {offsets = [0, 0, 0], sizes = [2, 8, 32], strides = [1, 1, 1]} : vector<2x8x128xf32> to vector<2x8x32xf32>
    %147 = vector.extract_strided_slice %141 {offsets = [0, 0, 32], sizes = [2, 8, 32], strides = [1, 1, 1]} : vector<2x8x128xf32> to vector<2x8x32xf32>
    %148 = vector.extract_strided_slice %141 {offsets = [0, 0, 64], sizes = [2, 8, 32], strides = [1, 1, 1]} : vector<2x8x128xf32> to vector<2x8x32xf32>
    %149 = vector.extract_strided_slice %141 {offsets = [0, 0, 96], sizes = [2, 8, 32], strides = [1, 1, 1]} : vector<2x8x128xf32> to vector<2x8x32xf32>
    %150 = tpu.concatenate %146, %147, %148, %149 in 0 : vector<2x8x32xf32>, vector<2x8x32xf32>, vector<2x8x32xf32>, vector<2x8x32xf32> -> vector<8x8x32xf32>
    %151 = vector.extract_strided_slice %143 {offsets = [0, 0, 0], sizes = [2, 8, 32], strides = [1, 1, 1]} : vector<2x8x128xf32> to vector<2x8x32xf32>
    %152 = vector.extract_strided_slice %143 {offsets = [0, 0, 32], sizes = [2, 8, 32], strides = [1, 1, 1]} : vector<2x8x128xf32> to vector<2x8x32xf32>
    %153 = vector.extract_strided_slice %143 {offsets = [0, 0, 64], sizes = [2, 8, 32], strides = [1, 1, 1]} : vector<2x8x128xf32> to vector<2x8x32xf32>
    %154 = vector.extract_strided_slice %143 {offsets = [0, 0, 96], sizes = [2, 8, 32], strides = [1, 1, 1]} : vector<2x8x128xf32> to vector<2x8x32xf32>
    %155 = tpu.concatenate %151, %152, %153, %154 in 0 : vector<2x8x32xf32>, vector<2x8x32xf32>, vector<2x8x32xf32>, vector<2x8x32xf32> -> vector<8x8x32xf32>
    %156 = vector.extract_strided_slice %145 {offsets = [0, 0, 0], sizes = [2, 8, 32], strides = [1, 1, 1]} : vector<2x8x128xf32> to vector<2x8x32xf32>
    %157 = vector.extract_strided_slice %145 {offsets = [0, 0, 32], sizes = [2, 8, 32], strides = [1, 1, 1]} : vector<2x8x128xf32> to vector<2x8x32xf32>
    %158 = vector.extract_strided_slice %145 {offsets = [0, 0, 64], sizes = [2, 8, 32], strides = [1, 1, 1]} : vector<2x8x128xf32> to vector<2x8x32xf32>
    %159 = vector.extract_strided_slice %145 {offsets = [0, 0, 96], sizes = [2, 8, 32], strides = [1, 1, 1]} : vector<2x8x128xf32> to vector<2x8x32xf32>
    %160 = tpu.concatenate %156, %157, %158, %159 in 0 : vector<2x8x32xf32>, vector<2x8x32xf32>, vector<2x8x32xf32>, vector<2x8x32xf32> -> vector<8x8x32xf32>
    "tpu.trace_start"() <{level = 10 : i32, message = "bqd,bkd->bqk"}> : () -> ()
    %cst_65 = arith.constant dense<0.000000e+00> : vector<8x8x8xf32>
    %161 = tpu.matmul %150, %155, %cst_65 {dimension_numbers = #tpu.dot_dimension_numbers<[2], [2], [1], [1], [0, 0, 0, 1, 1, 1], [0], [0]>} : vector<8x8x32xf32>, vector<8x8x32xf32>, vector<8x8x8xf32> -> vector<8x8x8xf32>
    "tpu.trace_stop"() : () -> ()
    %cst_66 = arith.constant dense<0xFF800000> : vector<8x8xf32>
    %162 = vector.multi_reduction <maximumf>, %161, %cst_66 [2] : vector<8x8x8xf32> to vector<8x8xf32>
    %163 = vector.shape_cast %162 : vector<8x8xf32> to vector<8x8x1xf32>
    %164 = vector.broadcast %163 : vector<8x8x1xf32> to vector<8x8x8xf32>
    %165 = arith.subf %161, %164 : vector<8x8x8xf32>
    %166 = math.exp %165 : vector<8x8x8xf32>
    %cst_67 = arith.constant dense<0.000000e+00> : vector<8x8xf32>
    %167 = vector.multi_reduction <add>, %166, %cst_67 [2] : vector<8x8x8xf32> to vector<8x8xf32>
    %168 = vector.shape_cast %167 : vector<8x8xf32> to vector<8x8x1xf32>
    %169 = tpu.reciprocal %168 {approx = true} : vector<8x8x1xf32> -> vector<8x8x1xf32>
    %170 = vector.broadcast %169 : vector<8x8x1xf32> to vector<8x8x8xf32>
    %171 = arith.mulf %166, %170 : vector<8x8x8xf32>
    "tpu.trace_start"() <{level = 10 : i32, message = "bqk,bkd->bqd"}> : () -> ()
    %cst_68 = arith.constant dense<0.000000e+00> : vector<8x8x32xf32>
    %172 = tpu.matmul %171, %160, %cst_68 {dimension_numbers = #tpu.dot_dimension_numbers<[2], [1], [1], [2], [0, 0, 0, 1, 1, 2], [0], [0]>} : vector<8x8x8xf32>, vector<8x8x32xf32>, vector<8x8x32xf32> -> vector<8x8x32xf32>
    "tpu.trace_stop"() : () -> ()
    %173 = vector.extract_strided_slice %172 {offsets = [0, 0, 0], sizes = [2, 8, 32], strides = [1, 1, 1]} : vector<8x8x32xf32> to vector<2x8x32xf32>
    %174 = vector.extract_strided_slice %172 {offsets = [2, 0, 0], sizes = [2, 8, 32], strides = [1, 1, 1]} : vector<8x8x32xf32> to vector<2x8x32xf32>
    %175 = vector.extract_strided_slice %172 {offsets = [4, 0, 0], sizes = [2, 8, 32], strides = [1, 1, 1]} : vector<8x8x32xf32> to vector<2x8x32xf32>
    %176 = vector.extract_strided_slice %172 {offsets = [6, 0, 0], sizes = [2, 8, 32], strides = [1, 1, 1]} : vector<8x8x32xf32> to vector<2x8x32xf32>
    %177 = tpu.concatenate %173, %174, %175, %176 in 2 : vector<2x8x32xf32>, vector<2x8x32xf32>, vector<2x8x32xf32>, vector<2x8x32xf32> -> vector<2x8x128xf32>
    %178 = vector.shape_cast %177 : vector<2x8x128xf32> to vector<16x128xf32>
    %179 = arith.truncf %178 : vector<16x128xf32> to vector<16x128xbf16>
    %c1_69 = arith.constant 1 : index
    %c0_70 = arith.constant 0 : index
    %c0_71 = arith.constant 0 : index
    %180 = vector.load %arg5[%c1_69, %c0_70, %c0_71] : memref<2x128x128xbf16, #tpu.memory_space<vmem>>, vector<1x128x128xbf16>
    %181 = vector.shape_cast %180 : vector<1x128x128xbf16> to vector<128x128xbf16>
    %cst_72 = arith.constant dense<0.000000e+00> : vector<16x128xf32>
    %182 = tpu.matmul %179, %181, %cst_72 {dimension_numbers = #tpu.dot_dimension_numbers<[1], [0], [0], [1], [0, 0, 1, 1], [], []>} : vector<16x128xbf16>, vector<128x128xbf16>, vector<16x128xf32> -> vector<16x128xf32>
    %c1_73 = arith.constant 1 : index
    %c0_74 = arith.constant 0 : index
    %c0_75 = arith.constant 0 : index
    %183 = vector.load %arg6[%c1_73, %c0_74, %c0_75] : memref<2x1x128xf32, #tpu.memory_space<vmem>>, vector<1x1x128xf32>
    %184 = vector.shape_cast %183 : vector<1x1x128xf32> to vector<1x128xf32>
    %185 = vector.broadcast %184 : vector<1x128xf32> to vector<16x128xf32>
    %186 = arith.addf %182, %185 : vector<16x128xf32>
    %187 = arith.addf %131, %186 : vector<16x128xf32>
    %c1_76 = arith.constant 1 : index
    %c0_77 = arith.constant 0 : index
    %c0_78 = arith.constant 0 : index
    %188 = vector.load %arg7[%c1_76, %c0_77, %c0_78] : memref<2x1x128xf32, #tpu.memory_space<vmem>>, vector<1x1x128xf32>
    %189 = vector.shape_cast %188 : vector<1x1x128xf32> to vector<1x128xf32>
    %c1_79 = arith.constant 1 : index
    %c0_80 = arith.constant 0 : index
    %c0_81 = arith.constant 0 : index
    %190 = vector.load %arg8[%c1_79, %c0_80, %c0_81] : memref<2x1x128xf32, #tpu.memory_space<vmem>>, vector<1x1x128xf32>
    %191 = vector.shape_cast %190 : vector<1x1x128xf32> to vector<1x128xf32>
    %cst_82 = arith.constant dense<0.000000e+00> : vector<16xf32>
    %192 = vector.multi_reduction <add>, %187, %cst_82 [1] : vector<16x128xf32> to vector<16xf32>
    %193 = vector.shape_cast %192 : vector<16xf32> to vector<16x1xf32>
    %cst_83 = arith.constant 1.280000e+02 : f32
    %194 = vector.broadcast %cst_83 : f32 to vector<16x1xf32>
    %195 = arith.divf %193, %194 : vector<16x1xf32>
    %196 = arith.mulf %187, %187 : vector<16x128xf32>
    %cst_84 = arith.constant dense<0.000000e+00> : vector<16xf32>
    %197 = vector.multi_reduction <add>, %196, %cst_84 [1] : vector<16x128xf32> to vector<16xf32>
    %198 = vector.shape_cast %197 : vector<16xf32> to vector<16x1xf32>
    %cst_85 = arith.constant 1.280000e+02 : f32
    %199 = vector.broadcast %cst_85 : f32 to vector<16x1xf32>
    %200 = arith.divf %198, %199 : vector<16x1xf32>
    %201 = arith.mulf %195, %195 : vector<16x1xf32>
    %202 = arith.subf %200, %201 : vector<16x1xf32>
    %203 = vector.broadcast %195 : vector<16x1xf32> to vector<16x128xf32>
    %204 = arith.subf %187, %203 : vector<16x128xf32>
    %cst_86 = arith.constant 9.99999974E-6 : f32
    %205 = vector.broadcast %cst_86 : f32 to vector<16x1xf32>
    %206 = arith.addf %202, %205 : vector<16x1xf32>
    %207 = math.rsqrt %206 : vector<16x1xf32>
    %208 = vector.broadcast %207 : vector<16x1xf32> to vector<16x128xf32>
    %209 = arith.mulf %204, %208 : vector<16x128xf32>
    %210 = vector.broadcast %189 : vector<1x128xf32> to vector<16x128xf32>
    %211 = arith.mulf %209, %210 : vector<16x128xf32>
    %212 = vector.broadcast %191 : vector<1x128xf32> to vector<16x128xf32>
    %213 = arith.addf %211, %212 : vector<16x128xf32>
    %214 = arith.truncf %213 : vector<16x128xf32> to vector<16x128xbf16>
    %c1_87 = arith.constant 1 : index
    %c0_88 = arith.constant 0 : index
    %c0_89 = arith.constant 0 : index
    %215 = vector.load %arg11[%c1_87, %c0_88, %c0_89] : memref<2x128x512xbf16, #tpu.memory_space<vmem>>, vector<1x128x512xbf16>
    %216 = vector.shape_cast %215 : vector<1x128x512xbf16> to vector<128x512xbf16>
    %cst_90 = arith.constant dense<0.000000e+00> : vector<16x512xf32>
    %217 = tpu.matmul %214, %216, %cst_90 {dimension_numbers = #tpu.dot_dimension_numbers<[1], [0], [0], [1], [0, 0, 1, 1], [], []>} : vector<16x128xbf16>, vector<128x512xbf16>, vector<16x512xf32> -> vector<16x512xf32>
    %c1_91 = arith.constant 1 : index
    %c0_92 = arith.constant 0 : index
    %c0_93 = arith.constant 0 : index
    %218 = vector.load %arg12[%c1_91, %c0_92, %c0_93] : memref<2x1x512xf32, #tpu.memory_space<vmem>>, vector<1x1x512xf32>
    %219 = vector.shape_cast %218 : vector<1x1x512xf32> to vector<1x512xf32>
    %220 = vector.broadcast %219 : vector<1x512xf32> to vector<16x512xf32>
    %221 = arith.addf %217, %220 : vector<16x512xf32>
    %cst_94 = arith.constant 0.000000e+00 : f32
    %222 = vector.broadcast %cst_94 : f32 to vector<16x512xf32>
    %223 = arith.maximumf %221, %222 : vector<16x512xf32>
    %224 = arith.truncf %223 : vector<16x512xf32> to vector<16x512xbf16>
    %c1_95 = arith.constant 1 : index
    %c0_96 = arith.constant 0 : index
    %c0_97 = arith.constant 0 : index
    %225 = vector.load %arg13[%c1_95, %c0_96, %c0_97] : memref<2x512x128xbf16, #tpu.memory_space<vmem>>, vector<1x512x128xbf16>
    %226 = vector.shape_cast %225 : vector<1x512x128xbf16> to vector<512x128xbf16>
    %cst_98 = arith.constant dense<0.000000e+00> : vector<16x128xf32>
    %227 = tpu.matmul %224, %226, %cst_98 {dimension_numbers = #tpu.dot_dimension_numbers<[1], [0], [0], [1], [0, 0, 1, 1], [], []>} : vector<16x512xbf16>, vector<512x128xbf16>, vector<16x128xf32> -> vector<16x128xf32>
    %c1_99 = arith.constant 1 : index
    %c0_100 = arith.constant 0 : index
    %c0_101 = arith.constant 0 : index
    %228 = vector.load %arg14[%c1_99, %c0_100, %c0_101] : memref<2x1x128xf32, #tpu.memory_space<vmem>>, vector<1x1x128xf32>
    %229 = vector.shape_cast %228 : vector<1x1x128xf32> to vector<1x128xf32>
    %230 = vector.broadcast %229 : vector<1x128xf32> to vector<16x128xf32>
    %231 = arith.addf %227, %230 : vector<16x128xf32>
    %232 = arith.addf %213, %231 : vector<16x128xf32>
    %c1_102 = arith.constant 1 : index
    %c0_103 = arith.constant 0 : index
    %c0_104 = arith.constant 0 : index
    %233 = vector.load %arg9[%c1_102, %c0_103, %c0_104] : memref<2x1x128xf32, #tpu.memory_space<vmem>>, vector<1x1x128xf32>
    %234 = vector.shape_cast %233 : vector<1x1x128xf32> to vector<1x128xf32>
    %c1_105 = arith.constant 1 : index
    %c0_106 = arith.constant 0 : index
    %c0_107 = arith.constant 0 : index
    %235 = vector.load %arg10[%c1_105, %c0_106, %c0_107] : memref<2x1x128xf32, #tpu.memory_space<vmem>>, vector<1x1x128xf32>
    %236 = vector.shape_cast %235 : vector<1x1x128xf32> to vector<1x128xf32>
    %cst_108 = arith.constant dense<0.000000e+00> : vector<16xf32>
    %237 = vector.multi_reduction <add>, %232, %cst_108 [1] : vector<16x128xf32> to vector<16xf32>
    %238 = vector.shape_cast %237 : vector<16xf32> to vector<16x1xf32>
    %cst_109 = arith.constant 1.280000e+02 : f32
    %239 = vector.broadcast %cst_109 : f32 to vector<16x1xf32>
    %240 = arith.divf %238, %239 : vector<16x1xf32>
    %241 = arith.mulf %232, %232 : vector<16x128xf32>
    %cst_110 = arith.constant dense<0.000000e+00> : vector<16xf32>
    %242 = vector.multi_reduction <add>, %241, %cst_110 [1] : vector<16x128xf32> to vector<16xf32>
    %243 = vector.shape_cast %242 : vector<16xf32> to vector<16x1xf32>
    %cst_111 = arith.constant 1.280000e+02 : f32
    %244 = vector.broadcast %cst_111 : f32 to vector<16x1xf32>
    %245 = arith.divf %243, %244 : vector<16x1xf32>
    %246 = arith.mulf %240, %240 : vector<16x1xf32>
    %247 = arith.subf %245, %246 : vector<16x1xf32>
    %248 = vector.broadcast %240 : vector<16x1xf32> to vector<16x128xf32>
    %249 = arith.subf %232, %248 : vector<16x128xf32>
    %cst_112 = arith.constant 9.99999974E-6 : f32
    %250 = vector.broadcast %cst_112 : f32 to vector<16x1xf32>
    %251 = arith.addf %247, %250 : vector<16x1xf32>
    %252 = math.rsqrt %251 : vector<16x1xf32>
    %253 = vector.broadcast %252 : vector<16x1xf32> to vector<16x128xf32>
    %254 = arith.mulf %249, %253 : vector<16x128xf32>
    %255 = vector.broadcast %234 : vector<1x128xf32> to vector<16x128xf32>
    %256 = arith.mulf %254, %255 : vector<16x128xf32>
    %257 = vector.broadcast %236 : vector<1x128xf32> to vector<16x128xf32>
    %258 = arith.addf %256, %257 : vector<16x128xf32>
    %259 = vector.shape_cast %258 : vector<16x128xf32> to vector<2x8x128xf32>
    %cst_113 = arith.constant dense<0.000000e+00> : vector<2x128xf32>
    %260 = vector.multi_reduction <add>, %259, %cst_113 [1] : vector<2x8x128xf32> to vector<2x128xf32>
    %cst_114 = arith.constant 8.000000e+00 : f32
    %261 = vector.broadcast %cst_114 : f32 to vector<2x128xf32>
    %262 = arith.divf %260, %261 : vector<2x128xf32>
    %263 = arith.truncf %262 : vector<2x128xf32> to vector<2x128xbf16>
    %c0_115 = arith.constant 0 : index
    %c0_116 = arith.constant 0 : index
    %264 = vector.load %arg15[%c0_115, %c0_116] : memref<128x128xbf16, #tpu.memory_space<vmem>>, vector<128x128xbf16>
    %cst_117 = arith.constant dense<0.000000e+00> : vector<2x128xf32>
    %265 = tpu.matmul %263, %264, %cst_117 {dimension_numbers = #tpu.dot_dimension_numbers<[1], [0], [0], [1], [0, 0, 1, 1], [], []>} : vector<2x128xbf16>, vector<128x128xbf16>, vector<2x128xf32> -> vector<2x128xf32>
    %c0_118 = arith.constant 0 : index
    %c0_119 = arith.constant 0 : index
    %266 = vector.load %arg16[%c0_118, %c0_119] : memref<1x128xf32, #tpu.memory_space<vmem>>, vector<1x128xf32>
    %267 = vector.broadcast %266 : vector<1x128xf32> to vector<2x128xf32>
    %268 = arith.addf %265, %267 : vector<2x128xf32>
    %c0_120 = arith.constant 0 : index
    %c0_121 = arith.constant 0 : index
    %269 = vector.load %arg17[%c0_120, %c0_121] : memref<2x128xf32, #tpu.memory_space<vmem>>, vector<2x128xf32>
    tpu.vector_store %arg17[%c0_120, %c0_121], %268 {strides = array<i32>} : memref<2x128xf32, #tpu.memory_space<vmem>>, vector<2x128xf32>,
    return
  }
  func.func @transform_0(%arg0: i32) -> (i32, i32, i32) {
    %c0_i32 = arith.constant 0 : i32
    %c0_i32_0 = arith.constant 0 : i32
    %c0_i32_1 = arith.constant 0 : i32
    return %arg0, %c0_i32, %c0_i32_0 : i32, i32, i32
  }
  func.func @transform_1(%arg0: i32) -> (i32, i32, i32) {
    %c0_i32 = arith.constant 0 : i32
    %c0_i32_0 = arith.constant 0 : i32
    %c0_i32_1 = arith.constant 0 : i32
    %c0_i32_2 = arith.constant 0 : i32
    return %c0_i32, %c0_i32_0, %c0_i32_1 : i32, i32, i32
  }
  func.func @transform_2(%arg0: i32) -> (i32, i32, i32) {
    %c0_i32 = arith.constant 0 : i32
    %c0_i32_0 = arith.constant 0 : i32
    %c0_i32_1 = arith.constant 0 : i32
    %c0_i32_2 = arith.constant 0 : i32
    return %c0_i32, %c0_i32_0, %c0_i32_1 : i32, i32, i32
  }
  func.func @transform_3(%arg0: i32) -> (i32, i32, i32) {
    %c0_i32 = arith.constant 0 : i32
    %c0_i32_0 = arith.constant 0 : i32
    %c0_i32_1 = arith.constant 0 : i32
    %c0_i32_2 = arith.constant 0 : i32
    return %c0_i32, %c0_i32_0, %c0_i32_1 : i32, i32, i32
  }
  func.func @transform_4(%arg0: i32) -> (i32, i32, i32) {
    %c0_i32 = arith.constant 0 : i32
    %c0_i32_0 = arith.constant 0 : i32
    %c0_i32_1 = arith.constant 0 : i32
    %c0_i32_2 = arith.constant 0 : i32
    return %c0_i32, %c0_i32_0, %c0_i32_1 : i32, i32, i32
  }
  func.func @transform_5(%arg0: i32) -> (i32, i32, i32) {
    %c0_i32 = arith.constant 0 : i32
    %c0_i32_0 = arith.constant 0 : i32
    %c0_i32_1 = arith.constant 0 : i32
    %c0_i32_2 = arith.constant 0 : i32
    return %c0_i32, %c0_i32_0, %c0_i32_1 : i32, i32, i32
  }
  func.func @transform_6(%arg0: i32) -> (i32, i32, i32) {
    %c0_i32 = arith.constant 0 : i32
    %c0_i32_0 = arith.constant 0 : i32
    %c0_i32_1 = arith.constant 0 : i32
    %c0_i32_2 = arith.constant 0 : i32
    return %c0_i32, %c0_i32_0, %c0_i32_1 : i32, i32, i32
  }
  func.func @transform_7(%arg0: i32) -> (i32, i32, i32) {
    %c0_i32 = arith.constant 0 : i32
    %c0_i32_0 = arith.constant 0 : i32
    %c0_i32_1 = arith.constant 0 : i32
    %c0_i32_2 = arith.constant 0 : i32
    return %c0_i32, %c0_i32_0, %c0_i32_1 : i32, i32, i32
  }
  func.func @transform_8(%arg0: i32) -> (i32, i32, i32) {
    %c0_i32 = arith.constant 0 : i32
    %c0_i32_0 = arith.constant 0 : i32
    %c0_i32_1 = arith.constant 0 : i32
    %c0_i32_2 = arith.constant 0 : i32
    return %c0_i32, %c0_i32_0, %c0_i32_1 : i32, i32, i32
  }
  func.func @transform_9(%arg0: i32) -> (i32, i32, i32) {
    %c0_i32 = arith.constant 0 : i32
    %c0_i32_0 = arith.constant 0 : i32
    %c0_i32_1 = arith.constant 0 : i32
    %c0_i32_2 = arith.constant 0 : i32
    return %c0_i32, %c0_i32_0, %c0_i32_1 : i32, i32, i32
  }
  func.func @transform_10(%arg0: i32) -> (i32, i32, i32) {
    %c0_i32 = arith.constant 0 : i32
    %c0_i32_0 = arith.constant 0 : i32
    %c0_i32_1 = arith.constant 0 : i32
    %c0_i32_2 = arith.constant 0 : i32
    return %c0_i32, %c0_i32_0, %c0_i32_1 : i32, i32, i32
  }
  func.func @transform_11(%arg0: i32) -> (i32, i32, i32) {
    %c0_i32 = arith.constant 0 : i32
    %c0_i32_0 = arith.constant 0 : i32
    %c0_i32_1 = arith.constant 0 : i32
    %c0_i32_2 = arith.constant 0 : i32
    return %c0_i32, %c0_i32_0, %c0_i32_1 : i32, i32, i32
  }
  func.func @transform_12(%arg0: i32) -> (i32, i32, i32) {
    %c0_i32 = arith.constant 0 : i32
    %c0_i32_0 = arith.constant 0 : i32
    %c0_i32_1 = arith.constant 0 : i32
    %c0_i32_2 = arith.constant 0 : i32
    return %c0_i32, %c0_i32_0, %c0_i32_1 : i32, i32, i32
  }
  func.func @transform_13(%arg0: i32) -> (i32, i32, i32) {
    %c0_i32 = arith.constant 0 : i32
    %c0_i32_0 = arith.constant 0 : i32
    %c0_i32_1 = arith.constant 0 : i32
    %c0_i32_2 = arith.constant 0 : i32
    return %c0_i32, %c0_i32_0, %c0_i32_1 : i32, i32, i32
  }
  func.func @transform_14(%arg0: i32) -> (i32, i32) {
    %c0_i32 = arith.constant 0 : i32
    %c0_i32_0 = arith.constant 0 : i32
    %c0_i32_1 = arith.constant 0 : i32
    return %c0_i32, %c0_i32_0 : i32, i32
  }
  func.func @transform_15(%arg0: i32) -> (i32, i32) {
    %c0_i32 = arith.constant 0 : i32
    %c0_i32_0 = arith.constant 0 : i32
    %c0_i32_1 = arith.constant 0 : i32
    return %c0_i32, %c0_i32_0 : i32, i32
  }
  func.func @transform_16(%arg0: i32) -> (i32, i32) {
    %c0_i32 = arith.constant 0 : i32
    %c0_i32_0 = arith.constant 0 : i32
    return %arg0, %c0_i32 : i32, i32
  }
}

</mosaic_0001>

<bundles_post_ra>
// kernel: tpu_custom_call.1
= control target key start
LH: loop header
LB: loop body
LE: loop exit
PB: predicated region body
PF: predicated region fallthrough
CT: control target
= control target key end

     0   :  { %s5535_s0 = inlined_call_operand.hbm [shape: f32[2,8,128], index: 0, kind: input, shape index: {}]   ;;  %s5536_s1 = inlined_call_operand.hbm [shape: f32[1,8,128], index: 1, kind: input, shape index: {}]   ;;  %s5537_s2 = inlined_call_operand.hbm [shape: bf16[2,128,384], index: 2, kind: input, shape index: {}]   ;;  %s5538_s3 = inlined_call_operand.hbm [shape: f32[2,1,384], index: 3, kind: input, shape index: {}]   ;;  %s5539_s4 = inlined_call_operand.hbm [shape: bf16[2,128,128], index: 4, kind: input, shape index: {}]   ;;  %s5540_s5 = inlined_call_operand.vmem [shape: f32[2,1,128], index: 5, kind: input, shape index: {}]   ;;  %s5541_s6 = inlined_call_operand.hbm [shape: f32[2,1,128], index: 6, kind: input, shape index: {}]   ;;  %s5542_s7 = inlined_call_operand.hbm [shape: f32[2,1,128], index: 7, kind: input, shape index: {}]   ;;  %s5543_s8 = inlined_call_operand.hbm [shape: f32[2,1,128], index: 8, kind: input, shape index: {}]   ;;  %s5544_s9 = inlined_call_operand.hbm [shape: f32[2,1,128], index: 9, kind: input, shape index: {}]   ;;  %s5545_s10 = inlined_call_operand.hbm [shape: bf16[2,128,512], index: 10, kind: input, shape index: {}]   ;;  %s5546_s11 = inlined_call_operand.vmem [shape: f32[2,1,512], index: 11, kind: input, shape index: {}]   ;;  %s5547_s12 = inlined_call_operand.hbm [shape: bf16[2,512,128], index: 12, kind: input, shape index: {}]   ;;  %s5548_s13 = inlined_call_operand.vmem [shape: f32[2,1,128], index: 13, kind: input, shape index: {}]   ;;  %s5549_s14 = inlined_call_operand.hbm [shape: bf16[128,128], index: 14, kind: input, shape index: {}]   ;;  %s5550_s15 = inlined_call_operand.vmem [shape: f32[1,128], index: 15, kind: input, shape index: {}]   ;;  %s5551_s16 = inlined_call_operand.hbm [shape: f32[2,128], index: 16, kind: output, shape index: {}]  }
   0x1   :  { %5552 = sst [smem:[#allocation31_spill]] %s5535_s0 }
   0x2   :  { %21 = vsyncpa [#allocation3], 0 }
   0x3   :  { %22 = vsyncpa [#allocation6], 0 }
   0x4   :  { %23 = vsyncpa [#allocation9], 0 }
   0x5   :  { %24 = vsyncpa [#allocation12], 0 }
   0x6   :  { %25 = vsyncpa [#allocation15], 0 }
   0x7   :  { %26 = vsyncpa [#allocation18], 0 }
   0x8   :  { %27 = vsyncpa [#allocation21], 0  ;;  %s47_s23 = sshll.u32 %s5536_s1, 4  ;;  %s48_s23 = int_to_ptr.hbm [resolvable:$true] %s47_s23 }
   0x9   :  { %28 = vsyncpa [#allocation4], 0  ;;  %s5045_s24 = smov [#allocation5]   ;;  %s70_s28 = sshll.u32 %s5538_s3, 4  ;;  %s71_s28 = int_to_ptr.hbm [resolvable:$true] %s70_s28 }
   0xa   :  { %s49_s25 = sshll.u32 %s5045_s24, 4  ;;  %s5046_s29 = smov [#allocation8]   ;;  %s50_s25 = int_to_ptr.vmem [resolvable:$true] %s49_s25 }
   0xb   :  { %52 = dma.hbm_to_vmem [thread:$0]  %s48_s23, 128, %s50_s25, [#allocation6]  }
   0xc   :  { %s72_s30 = sshll.u32 %s5046_s29, 4  ;;  %s5047_s0 = smov 48   ;;  %s73_s30 = int_to_ptr.vmem [resolvable:$true] %s72_s30 }
   0xd   :  { %s5048_s17 = smov 3   ;;  %s98_s1 = sshll.u32 %s5541_s6, 4  ;;  %s99_s1 = int_to_ptr.hbm [resolvable:$true] %s98_s1 }
   0xe   :  { %78 = dma.hbm_to_vmem [thread:$0]  %s71_s28, 96, %s73_s30, [#allocation9], %s5047_s0, %s5047_s0, %s5048_s17  }
   0xf   :  { %s5049_s20 = smov [#allocation11]   ;;  %s124_s3 = sshll.u32 %s5543_s8, 4  ;;  %s125_s3 = int_to_ptr.hbm [resolvable:$true] %s124_s3 }
  0x10   :  { %s100_s21 = sshll.u32 %s5049_s20, 4  ;;  %s5050_s23 = smov 16   ;;  %s101_s21 = int_to_ptr.vmem [resolvable:$true] %s100_s21 }
  0x11   :  { %s5051_s25 = smov 1   ;;  %s5052_s26 = smov [#allocation14]  }
  0x12   :  { %106 = dma.hbm_to_vmem [thread:$0]  %s99_s1, 32, %s101_s21, [#allocation12], %s5050_s23, %s5050_s23, %s5051_s25  }
  0x13   :  { %s126_s27 = sshll.u32 %s5052_s26, 4  ;;  %s150_s6 = sshll.u32 %s5545_s10, 4  ;;  %s127_s27 = int_to_ptr.vmem [resolvable:$true] %s126_s27  ;;  %s151_s6 = int_to_ptr.hbm [resolvable:$true] %s150_s6 }
  0x14   :  { %132 = dma.hbm_to_vmem [thread:$0]  %s125_s3, 32, %s127_s27, [#allocation15], %s5050_s23, %s5050_s23, %s5051_s25  }
  0x15   :  { %s5053_s8 = smov [#allocation17]   ;;  %s5553_s18 = sld [smem:[#allocation31_spill]] }
  0x16   :  { %s152_s30 = sshll.u32 %s5053_s8, 4  ;;  %s5054_s1 = smov 256   ;;  %s153_s30 = int_to_ptr.vmem [resolvable:$true] %s152_s30 }
  0x17   :  { %158 = dma.hbm_to_vmem [thread:$0]  %s151_s6, 8192, %s153_s30, [#allocation18], %s5054_s1, %s5054_s1, %s5050_s23  }
  0x18   :  { %s5055_s20 = smov [#allocation2]   ;;  %s57_s24 = sshll.u32 %s5537_s2, 4  ;;  %s58_s24 = int_to_ptr.hbm [resolvable:$true] %s57_s24 }
  0x19   :  { %s35_s21 = sshll.u32 %s5055_s20, 4  ;;  %s5056_s26 = smov 128   ;;  %s36_s21 = int_to_ptr.vmem [resolvable:$true] %s35_s21 }
  0x1a   :  { %s5057_s3 = smov 8   ;;  %s5058_s27 = smov [#allocation7]  }
  0x1b   :  { %s33_s19 = sshll.u32 %s5553_s18, 4  ;;  %s59_s28 = sshll.u32 %s5058_s27, 4  ;;  %s34_s19 = int_to_ptr.hbm [resolvable:$true] %s33_s19  ;;  %s60_s28 = int_to_ptr.vmem [resolvable:$true] %s59_s28 }
  0x1c   :  { %41 = dma.hbm_to_vmem [thread:$0]  %s34_s19, 256, %s36_s21, [#allocation3], %s5056_s26, %s5056_s26, %s5057_s3  }
  0x1d   :  { %s5059_s29 = smov 192   ;;  %s5060_s8 = smov 12  }
  0x1e   :  { %65 = dma.hbm_to_vmem [thread:$0]  %s58_s24, 6144, %s60_s28, [#allocation6], %s5059_s29, %s5059_s29, %s5060_s8  }
  0x1f   :  { %s83_s6 = sshll.u32 %s5539_s4, 4  ;;  %s5061_s30 = smov [#allocation10]   ;;  %s84_s6 = int_to_ptr.hbm [resolvable:$true] %s83_s6 }
  0x20   :  { %s85_s18 = sshll.u32 %s5061_s30, 4  ;;  %s111_s20 = sshll.u32 %s5542_s7, 4  ;;  %s86_s18 = int_to_ptr.vmem [resolvable:$true] %s85_s18  ;;  %s112_s20 = int_to_ptr.hbm [resolvable:$true] %s111_s20 }
  0x21   :  { %s5062_s19 = smov 64   ;;  %s5063_s21 = smov 4  }
  0x22   :  { %91 = dma.hbm_to_vmem [thread:$0]  %s84_s6, 2048, %s86_s18, [#allocation9], %s5062_s19, %s5062_s19, %s5063_s21  }
  0x23   :  { %s5064_s10 = smov [#allocation13]   ;;  %s137_s4 = sshll.u32 %s5544_s9, 4  ;;  %s138_s4 = int_to_ptr.hbm [resolvable:$true] %s137_s4 }
  0x24   :  { %s113_s22 = sshll.u32 %s5064_s10, 4  ;;  %s165_s27 = sshll.u32 %s5547_s12, 4  ;;  %s114_s22 = int_to_ptr.vmem [resolvable:$true] %s113_s22  ;;  %s166_s27 = int_to_ptr.hbm [resolvable:$true] %s165_s27 }
  0x25   :  { %119 = dma.hbm_to_vmem [thread:$0]  %s112_s20, 32, %s114_s22, [#allocation12], %s5050_s23, %s5050_s23, %s5051_s25  }
  0x26   :  { %s5065_s28 = smov [#allocation16]   ;;  %s5066_s8 = smov [#allocation19]  }
  0x27   :  { %s139_s29 = sshll.u32 %s5065_s28, 4  ;;  %s167_s9 = sshll.u32 %s5066_s8, 4  ;;  %s140_s29 = int_to_ptr.vmem [resolvable:$true] %s139_s29  ;;  %s168_s9 = int_to_ptr.vmem [resolvable:$true] %s167_s9 }
  0x28   :  { %145 = dma.hbm_to_vmem [thread:$0]  %s138_s4, 32, %s140_s29, [#allocation15], %s5050_s23, %s5050_s23, %s5051_s25  }
  0x29   :  { %s180_s6 = sshll.u32 %s5549_s14, 4  ;;  %s5067_s12 = smov [#allocation20]   ;;  %s181_s6 = int_to_ptr.hbm [resolvable:$true] %s180_s6 }
  0x2a   :  { %173 = dma.hbm_to_vmem [thread:$0]  %s166_s27, 8192, %s168_s9, [#allocation18], %s5062_s19, %s5062_s19, %s5063_s21  }
  0x2b   :  { %s182_s30 = sshll.u32 %s5067_s12, 4  ;;  %s183_s30 = int_to_ptr.vmem [resolvable:$true] %s182_s30 }
  0x2c   :  { %188 = dma.hbm_to_vmem [thread:$0]  %s181_s6, 1024, %s183_s30, [#allocation21], %s5062_s19, %s5062_s19, %s5063_s21  }
  0x2d   :  { %5029 = dma.done.wait [#allocation3], 256  }
  0x2e   :  { %5030 = vsyncadd [#allocation3], 4294967040 }
  0x2f   :  { %5031 = dma.done.wait [#allocation6], 6272  }
  0x30   :  { %5032 = vsyncadd [#allocation6], 4294961024 }
  0x31   :  { %5033 = dma.done.wait [#allocation9], 2144  }
  0x32   :  { %5034 = vsyncadd [#allocation9], 4294965152 }
  0x33   :  { %5035 = dma.done.wait [#allocation12], 64  }
  0x34   :  { %5036 = vsyncadd [#allocation12], 4294967232 }
  0x35   :  { %5037 = dma.done.wait [#allocation15], 64  }
  0x36   :  { %5038 = vsyncadd [#allocation15], 4294967232 }
  0x37   :  { %5039 = dma.done.wait [#allocation18], 16384  }
  0x38   :  { %5040 = vsyncadd [#allocation18], 4294950912 }
  0x39   :  { %5041 = dma.done.wait [#allocation21], 1024  }
  0x3a   :  { %5042 = vsyncadd [#allocation21], 4294966272  ;;  %v3567_v0 = vld [vmem:[#allocation7 + $0xa8] sm:$0xf]  ;;  %v4354_v1 = vld [vmem:[#allocation7 + $0xb0] sm:$0xf0] }
  0x3b   :  { %v4353_v2 = vld [vmem:[#allocation7 + $0xac] sm:$0xf]  ;;  %v3568_v3 = vor.u32 %v4354_v1, %v3567_v0  ;;  %v3569_v4 = vld [vmem:[#allocation7 + $0xb4] sm:$0xf0]  ;;  %v3555_v5 = vld [vmem:[#allocation7 + $0x90] sm:$0xf] }
  0x3c   :  { %v4351_v6 = vld [vmem:[#allocation7 + $0x98] sm:$0xf0]  ;;  %v3572_v7 = vor.u32 %v4353_v2, %v3569_v4  ;;  %v4350_v8 = vld [vmem:[#allocation7 + $0x94] sm:$0xf]  ;;  %v3557_v9 = vld [vmem:[#allocation7 + $0x9c] sm:$0xf0] }
  0x3d   :  { %413 = vmatpush.bf16.msra.mxu0 %v3568_v3  ;;  %v3556_v10 = vor.u32 %v4351_v6, %v3555_v5  ;;  %v3560_v11 = vor.u32 %v4350_v8, %v3557_v9  ;;  %v3543_v12 = vld [vmem:[#allocation7 + $0x78] sm:$0xf]  ;;  %v4348_v13 = vld [vmem:[#allocation7 + $0x80] sm:$0xf0]  ;;  %v4347_v14 = vld [vmem:[#allocation7 + $0x7c] sm:$0xf] }
  0x3e   :  { %427 = vmatpush.bf16.msra.mxu1 %v3572_v7  ;;  %v3545_v15 = vld [vmem:[#allocation7 + $0x84] sm:$0xf0]  ;;  %v3544_v16 = vor.u32 %v4348_v13, %v3543_v12  ;;  %v3531_v18 = vld [vmem:[#allocation7 + $0x60] sm:$0xf]  ;;  %v4345_v19 = vld [vmem:[#allocation7 + $0x68] sm:$0xf0] }
  0x3f   :  { %v3548_v17 = vor.u32 %v4347_v14, %v3545_v15  ;;  %v4344_v20 = vld [vmem:[#allocation7 + $0x64] sm:$0xf]  ;;  %v3533_v21 = vld [vmem:[#allocation7 + $0x6c] sm:$0xf0]  ;;  %v3532_v22 = vor.u32 %v4345_v19, %v3531_v18  ;;  %v3519_v23 = vld [vmem:[#allocation7 + $0x48] sm:$0xf] }
  0x40   :  { %v4342_v24 = vld [vmem:[#allocation7 + $0x50] sm:$0xf0]  ;;  %v4341_v25 = vld [vmem:[#allocation7 + $0x4c] sm:$0xf]  ;;  %v3536_v26 = vor.u32 %v4344_v20, %v3533_v21  ;;  %v3521_v27 = vld [vmem:[#allocation7 + $0x54] sm:$0xf0] }
  0x41   :  { %414 = vmatpush.bf16.msra.mxu0 %v3556_v10  ;;  %v3507_v28 = vld [vmem:[#allocation7 + $0x30] sm:$0xf]  ;;  %v3520_v29 = vor.u32 %v4342_v24, %v3519_v23  ;;  %v3524_v30 = vor.u32 %v4341_v25, %v3521_v27  ;;  %v4339_v31 = vld [vmem:[#allocation7 + $0x38] sm:$0xf0]  ;;  %v4338_v32 = vld [vmem:[#allocation7 + $0x34] sm:$0xf] }
  0x42   :  { %428 = vmatpush.bf16.msra.mxu1 %v3560_v11  ;;  %v3509_v33 = vld [vmem:[#allocation7 + $0x3c] sm:$0xf0]  ;;  %v3508_v34 = vor.u32 %v4339_v31, %v3507_v28  ;;  %v3495_v36 = vld [vmem:[#allocation7 + $0x18] sm:$0xf]  ;;  %v4336_v37 = vld [vmem:[#allocation7 + $0x20] sm:$0xf0] }
  0x43   :  { %v3512_v35 = vor.u32 %v4338_v32, %v3509_v33  ;;  %v4335_v38 = vld [vmem:[#allocation7 + $0x1c] sm:$0xf]  ;;  %v3497_v39 = vld [vmem:[#allocation7 + $0x24] sm:$0xf0]  ;;  %v3496_v40 = vor.u32 %v4336_v37, %v3495_v36  ;;  %v240_v42 = vld [vmem:[#allocation2 + $0x8] sm:$0xff]  ;;  %vm503_vm0 = vcmask 261120  }
  0x44   :  { %v239_v41 = vld [vmem:[#allocation2] sm:$0xff]  ;;  %v241_v43 = vld [vmem:[#allocation5] sm:$0xff]  ;;  %v3500_v44 = vor.u32 %v4335_v38, %v3497_v39  ;;  %v3483_v45 = vld [vmem:[#allocation7] sm:$0xf]  ;;  %s5068_s14 = smov 96   ;;  %s5069_s23 = smov 32  }
  0x45   :  { %415 = vmatpush.bf16.msra.mxu0 %v3544_v16  ;;  %v4333_v46 = vld [vmem:[#allocation7 + $0x8] sm:$0xf0]  ;;  %v4332_v47 = vld [vmem:[#allocation7 + $0x4] sm:$0xf]  ;;  %v3485_v48 = vld [vmem:[#allocation7 + $0xc] sm:$0xf0]  ;;  %v5213_v49 = vadd.f32 %v241_v43, %v239_v41  ;;  %v5215_v50 = vadd.f32 %v241_v43, %v240_v42 }
  0x46   :  { %429 = vmatpush.bf16.msra.mxu1 %v3548_v17  ;;  %v3484_v51 = vor.u32 %v4333_v46, %v3483_v45  ;;  %v3488_v52 = vor.u32 %v4332_v47, %v3485_v48  ;;  %v5223_v54 = vld [vmem:[#allocation8] sm:$0x7]  ;;  %v3575_v5 = vld [vmem:[#allocation7 + $0xb0] sm:$0xf]  ;;  %v4355_v6 = vld [vmem:[#allocation7 + $0xb8] sm:$0xf0] }
  0x47   :  { %v5219_v53 = vpack.c.bf16 %v5215_v50, %v5213_v49  ;;  %v280_v55 = vperm.slane %v5223_v54, 1  ;;  %v279_v56 = vperm.slane %v5223_v54, 0  ;;  %v3563_v7 = vld [vmem:[#allocation7 + $0x98] sm:$0xf]  ;;  %v3576_v8 = vor.u32 %v4355_v6, %v3575_v5  ;;  %v4352_v9 = vld [vmem:[#allocation7 + $0xa0] sm:$0xf0] }
  0x48   :  { %v3564_v10 = vor.u32 %v4352_v9, %v3563_v7  ;;  %v3551_v11 = vld [vmem:[#allocation7 + $0x80] sm:$0xf]  ;;  %v4349_v12 = vld [vmem:[#allocation7 + $0x88] sm:$0xf0]  ;;  %v3539_v16 = vld [vmem:[#allocation7 + $0x68] sm:$0xf] }
  0x49   :  { %416 = vmatpush.bf16.msra.mxu0 %v3532_v22  ;;  %441 = vmatpush.bf16.msra.mxu2 %v3576_v8  ;;  %v3552_v15 = vor.u32 %v4349_v12, %v3551_v11  ;;  %v4346_v17 = vld [vmem:[#allocation7 + $0x70] sm:$0xf0]  ;;  %vm696_vm1 = vcmask 64512   ;;  %v3515_v32 = vld [vmem:[#allocation7 + $0x38] sm:$0xf]  ;;  %vm995_vm2 = vcmask 523264  }
  0x4a   :  { %430 = vmatpush.bf16.msra.mxu1 %v3536_v26  ;;  %v3540_v18 = vor.u32 %v4346_v17, %v3539_v16  ;;  %v4340_v33 = vld [vmem:[#allocation7 + $0x40] sm:$0xf0]  ;;  %v4337_v36 = vld [vmem:[#allocation7 + $0x28] sm:$0xf0]  ;;  %v3491_v38 = vld [vmem:[#allocation7 + $0x8] sm:$0xf] }
  0x4b   :  { %v4334_v39 = vld [vmem:[#allocation7 + $0x10] sm:$0xf0]  ;;  %vm998_vm3 = vcmask 785408   ;;  %s5072_s4 = smov [#allocation22]   ;;  %s3465_s28 = sshll.u32 %s5551_s16, 4  ;;  %s3466_s28 = int_to_ptr.hbm [resolvable:$true] %s3465_s28 }
  0x4c   :  { %s3463_s3 = sshll.u32 %s5072_s4, 4  ;;  %s3464_s3 = int_to_ptr.vmem [resolvable:$true] %s3463_s3 }
  0x4d   :  { %417 = vmatpush.bf16.msra.mxu0 %v3520_v29  ;;  %442 = vmatpush.bf16.msra.mxu2 %v3564_v10  ;;  %v3527_v29 = vld [vmem:[#allocation7 + $0x50] sm:$0xf] }
  0x4e   :  { %431 = vmatpush.bf16.msra.mxu1 %v3524_v30  ;;  %v4343_v30 = vld [vmem:[#allocation7 + $0x58] sm:$0xf0] }
  0x4f   :  { %v3528_v31 = vor.u32 %v4343_v30, %v3527_v29 }
  0x51   :  { %418 = vmatpush.bf16.msra.mxu0 %v3508_v34  ;;  %443 = vmatpush.bf16.msra.mxu2 %v3552_v15  ;;  %v3516_v34 = vor.u32 %v4340_v33, %v3515_v32 }
  0x52   :  { %432 = vmatpush.bf16.msra.mxu1 %v3512_v35  ;;  %v3503_v35 = vld [vmem:[#allocation7 + $0x20] sm:$0xf] }
  0x53   :  { %v3504_v37 = vor.u32 %v4337_v36, %v3503_v35 }
  0x55   :  { %419 = vmatpush.bf16.msra.mxu0 %v3496_v40  ;;  %444 = vmatpush.bf16.msra.mxu2 %v3540_v18  ;;  %v3492_v40 = vor.u32 %v4334_v39, %v3491_v38 }
  0x56   :  { %433 = vmatpush.bf16.msra.mxu1 %v3500_v44 }
  0x59   :  { %420 = vmatpush.bf16.msra.mxu0 %v3484_v51  ;;  %445 = vmatpush.bf16.msra.mxu2 %v3528_v31 }
  0x5a   :  { %434 = vmatpush.bf16.msra.mxu1 %v3488_v52 }
  0x5c   :  { %421 = vmatmul.bf16.vlgmr.msra.gmra.mxu0 %v5219_v53 }
  0x5d   :  { %435 = vmatmul.bf16.vlgmr.msra.gmra.mxu1 %v5219_v53  ;;  %446 = vmatpush.bf16.msra.mxu2 %v3516_v34 }
  0x61   :  { %447 = vmatpush.bf16.msra.mxu2 %v3504_v37 }
  0x65   :  { %448 = vmatpush.bf16.msra.mxu2 %v3492_v40 }
  0x68   :  { %449 = vmatmul.bf16.vlgmr.msra.gmra.mxu2 %v5219_v53 }
  0xd9   :  { %v422_v57 = vpop.f32.mrf.mxu0 }
  0xda   :  { %v436_v58 = vpop.f32.mrf.mxu1  ;;  %v423_v60 = vadd.f32 %v422_v57, %v279_v56 }
  0xdb   :  { %v437_v59 = vadd.f32 %v436_v58, %v280_v55 }
  0xdd   :  { %475 = vrot.lane.b32.xlu2 %v437_v59, %s5062_s19  ;;  %471 = vrot.lane.b32.xlu0 %v437_v59, %s5068_s14 }
  0xde   :  { %3577 = vmatpush.xpose.msk.msrb.mxu0 %vm503_vm0, %v437_v59 }
  0xe1   :  { %3578 = vmatmul.msk.f32.vlgmr.msrb.gmra.mxu0 %vm503_vm0, %v423_v60  ;;  %v424_v63 = vpop.f32.mrf.mxu0 }
  0xe2   :  { %v438_v61 = vpop.f32.mrf.mxu1  ;;  %v425_v0 = vadd.f32 %v424_v63, %v279_v56 }
  0xe3   :  { %v439_v62 = vadd.f32 %v438_v61, %v280_v55 }
  0xe5   :  { %473 = vrot.lane.b32.xlu1 %v439_v62, %s5068_s14  ;;  %3579 = vmatpush.xpose.msk.msra.mxu0 %vm503_vm0, %v439_v62 }
  0xe6   :  { %461 = vrot.lane.b32.xlu2 %v423_v60, %s5062_s19  ;;  %457 = vrot.lane.b32.xlu0 %v423_v60, %s5068_s14 }
  0xe9   :  { %3580 = vmatmul.msk.f32.vlgmr.msra.gmra.mxu0 %vm503_vm0, %v425_v0 }
  0xed   :  { %459 = vrot.lane.b32.xlu1 %v425_v0, %s5068_s14 }
  0xee   :  { %479 = vrot.lane.b32.xlu2 %v437_v59, %s5069_s23  ;;  %477 = vrot.lane.b32.xlu0 %v439_v62, %s5062_s19 }
  0xf5   :  { %463 = vrot.lane.b32.xlu1 %v425_v0, %s5062_s19 }
  0xf6   :  { %467 = vrot.lane.b32.xlu2 %v425_v0, %s5069_s23  ;;  %481 = vrot.lane.b32.xlu0 %v439_v62, %s5069_s23 }
  0xfd   :  { %465 = vrot.lane.b32.xlu1 %v423_v60, %s5069_s23 }
 0x137   :  { %v476_v1 = vpop.permute.xlu2 %475 }
 0x140   :  { %v462_v2 = vpop.permute.xlu2 %461 }
 0x148   :  { %v480_v3 = vpop.permute.xlu2 %479 }
 0x149   :  { %3589 = vmatpush.xpose.msk.msrb.mxu0 %vm503_vm0, %v480_v3  ;;  %v450_v3 = vpop.f32.mrf.mxu2 }
 0x14f   :  { %v472_v4 = vpop.permute.xlu0 %471 }
 0x150   :  { %3581 = vmatpush.xpose.msk.msra.mxu3 %vm503_vm0, %v472_v4  ;;  %v468_v27 = vpop.permute.xlu2 %467 }
 0x151   :  { %v452_v7 = vpop.f32.mrf.mxu2 }
 0x157   :  { %v474_v13 = vpop.permute.xlu1 %473 }
 0x158   :  { %v458_v14 = vpop.permute.xlu0 %457  ;;  %3583 = vmatpush.xpose.msk.msrb.mxu3 %vm503_vm0, %v474_v13 }
 0x159   :  { %3582 = vmatmul.msk.f32.vlgmr.msra.gmra.mxu3 %vm503_vm0, %v458_v14 }
 0x15c   :  { %3585 = vmatpush.xpose.msk.msra.mxu3 %vm503_vm0, %v476_v1 }
 0x15e   :  { %v525_v19 = vpop.f32.mrf.mxu0 }
 0x15f   :  { %v460_v20 = vpop.permute.xlu1 %459  ;;  %v697_v21 = vsel %vm696_vm1, %v525_v19, -inf }
 0x160   :  { %v478_v22 = vpop.permute.xlu0 %477  ;;  %698 = vmax.xlane.f32.xlu0 %v697_v21 }
 0x161   :  { %3584 = vmatmul.msk.f32.vlgmr.msrb.gmra.mxu3 %vm503_vm0, %v460_v20 }
 0x162   :  { %3587 = vmatpush.xpose.msk.msrb.mxu3 %vm503_vm0, %v478_v22 }
 0x166   :  { %v549_v23 = vpop.f32.mrf.mxu0 }
 0x167   :  { %v464_v24 = vpop.permute.xlu1 %463  ;;  %v700_v25 = vsel %vm696_vm1, %v549_v23, -inf }
 0x168   :  { %v482_v26 = vpop.permute.xlu0 %481  ;;  %701 = vmax.xlane.f32.xlu1 %v700_v25 }
 0x169   :  { %3586 = vmatmul.msk.f32.vlgmr.msra.gmra.mxu3 %vm503_vm0, %v462_v2  ;;  %3591 = vmatpush.xpose.msk.msrb.mxu1 %vm503_vm0, %v482_v26  ;;  %v281_v2 = vperm.slane %v5223_v54, 2 }
 0x16b   :  { %v451_v4 = vadd.f32 %v450_v3, %v281_v2  ;;  %v453_v8 = vadd.f32 %v452_v7, %v281_v2 }
 0x16c   :  { %3592 = vmatmul.msk.f32.vlgmr.msrb.gmra.mxu1 %vm503_vm0, %v468_v27 }
 0x16d   :  { %803 = vmatpush.msra.mxu1 %v451_v4  ;;  %826 = vmatpush.msra.mxu3 %v453_v8  ;;  %v4570_v17 = vpack.i.bf16 %v453_v8, %v451_v4 }
 0x16f   :  { %v466_v28 = vpop.permute.xlu1 %465 }
 0x170   :  { %3590 = vmatmul.msk.f32.vlgmr.msrb.gmra.mxu0 %vm503_vm0, %v466_v28 }
 0x171   :  { %3588 = vmatmul.msk.f32.vlgmr.msrb.gmra.mxu3 %vm503_vm0, %v464_v24 }
 0x1d3   :  { %v699_v47 = vpop.xlane.xlu0 %698 }
 0x1d4   :  { %v721_v51 = vsub.f32 %v525_v19, %v699_v47 }
 0x1d6   :  { %v729_v57 = vmul.f32 1.442695, %v721_v51 }
 0x1db   :  { %v702_v43 = vpop.xlane.xlu1 %701 }
 0x1dc   :  { %v573_v41 = vpop.f32.mrf.mxu3  ;;  %v722_v45 = vsub.f32 %v549_v23, %v702_v43 }
 0x1dd   :  { %v703_v42 = vsel %vm696_vm1, %v573_v41, -inf }
 0x1de   :  { %704 = vmax.xlane.f32.xlu2 %v703_v42  ;;  %v731_v48 = vmul.f32 1.442695, %v722_v45 }
 0x1e0   :  { %4633 = vpow2.f32 %v731_v48 }
 0x1e1   :  { %4635 = vpow2.f32 %v729_v57 }
 0x1e4   :  { %v597_v44 = vpop.f32.mrf.mxu3 }
 0x1e5   :  { %v706_v46 = vsel %vm696_vm1, %v597_v44, -inf }
 0x1e6   :  { %707 = vmax.xlane.f32.xlu2 %v706_v46  ;;  %v4634_v59 = vpop.eup %4633 }
 0x1e7   :  { %v748_v63 = vsel %vm696_vm1, %v4634_v59, 0.0  ;;  %v4636_v0 = vpop.eup %4635 }
 0x1e8   :  { %v745_v1 = vsel %vm696_vm1, %v4636_v0, 0.0 }
 0x1e9   :  { %v693_v58 = vpop.f32.mrf.mxu1 }
 0x1ea   :  { %v718_v61 = vsel %vm696_vm1, %v693_v58, -inf }
 0x1ec   :  { %v621_v52 = vpop.f32.mrf.mxu3 }
 0x1ed   :  { %v709_v55 = vsel %vm696_vm1, %v621_v52, -inf  ;;  %v669_v56 = vpop.f32.mrf.mxu0 }
 0x1ee   :  { %710 = vmax.xlane.f32.xlu0 %v709_v55  ;;  %v715_v53 = vsel %vm696_vm1, %v669_v56, -inf }
 0x1ef   :  { %716 = vmax.xlane.f32.xlu2 %v715_v53 }
 0x1f4   :  { %v645_v60 = vpop.f32.mrf.mxu3 }
 0x1f5   :  { %v712_v62 = vsel %vm696_vm1, %v645_v60, -inf }
 0x1f6   :  { %719 = vmax.xlane.f32.xlu0 %v718_v61  ;;  %713 = vmax.xlane.f32.xlu1 %v712_v62 }
 0x1f7   :  { %749 = vadd.xlane.f32.xlu2 %v748_v63 }
 0x1fe   :  { %746 = vadd.xlane.f32.xlu1 %v745_v1 }
 0x251   :  { %v705_v5 = vpop.xlane.xlu2 %704 }
 0x252   :  { %v723_v6 = vsub.f32 %v573_v41, %v705_v5 }
 0x254   :  { %v733_v9 = vmul.f32 1.442695, %v723_v6 }
 0x256   :  { %4637 = vpow2.f32 %v733_v9  ;;  %v4363_v9 = vld [vmem:[#allocation10 + $0x38] sm:$0xff] }
 0x259   :  { %v708_v10 = vpop.xlane.xlu2 %707 }
 0x25a   :  { %v724_v15 = vsub.f32 %v597_v44, %v708_v10  ;;  %v4362_v10 = vld [vmem:[#allocation10 + $0x30] sm:$0xff] }
 0x25c   :  { %v5267_v11 = vpop.eup %4637  ;;  %v735_v18 = vmul.f32 1.442695, %v724_v15 }
 0x25d   :  { %v751_v12 = vsel %vm696_vm1, %v5267_v11, 0.0 }
 0x25e   :  { %752 = vadd.xlane.f32.xlu0 %v751_v12 }
 0x261   :  { %v711_v13 = vpop.xlane.xlu0 %710 }
 0x262   :  { %v717_v14 = vpop.xlane.xlu2 %716  ;;  %v725_v24 = vsub.f32 %v621_v52, %v711_v13 }
 0x263   :  { %v727_v54 = vsub.f32 %v669_v56, %v717_v14 }
 0x264   :  { %v737_v29 = vmul.f32 1.442695, %v725_v24  ;;  %v4358_v24 = vld [vmem:[#allocation10 + $0x10] sm:$0xff] }
 0x265   :  { %v741_v16 = vmul.f32 1.442695, %v727_v54 }
 0x267   :  { %4639 = vpow2.f32 %v741_v16 }
 0x269   :  { %v720_v19 = vpop.xlane.xlu0 %719  ;;  %v714_v20 = vpop.xlane.xlu1 %713 }
 0x26a   :  { %v728_v21 = vsub.f32 %v693_v58, %v720_v19  ;;  %v726_v22 = vsub.f32 %v645_v60, %v714_v20  ;;  %v750_v23 = vpop.xlane.xlu2 %749 }
 0x26b   :  { %4641 = vrcp.f32 %v750_v23  ;;  %v4359_v23 = vld [vmem:[#allocation10 + $0x18] sm:$0xff] }
 0x26c   :  { %v743_v25 = vmul.f32 1.442695, %v728_v21  ;;  %v739_v26 = vmul.f32 1.442695, %v726_v22  ;;  %4643 = vpow2.f32 %v735_v18  ;;  %v4360_v22 = vld [vmem:[#allocation10 + $0x20] sm:$0xff] }
 0x26d   :  { %v5271_v27 = vpop.eup %4639 }
 0x26e   :  { %4645 = vpow2.f32 %v743_v25  ;;  %v763_v28 = vsel %vm696_vm1, %v5271_v27, 0.0  ;;  %v4357_v25 = vld [vmem:[#allocation10 + $0x8] sm:$0xff] }
 0x26f   :  { %4647 = vpow2.f32 %v739_v26  ;;  %764 = vadd.xlane.f32.xlu1 %v763_v28  ;;  %v4356_v26 = vld [vmem:[#allocation10] sm:$0xff] }
 0x271   :  { %v4642_v30 = vpop.eup %4641  ;;  %v747_v31 = vpop.xlane.xlu1 %746 }
 0x272   :  { %v778_v32 = vmul.f32 %v4642_v30, %v4634_v59  ;;  %4649 = vrcp.f32 %v747_v31  ;;  %v4644_v33 = vpop.eup %4643 }
 0x273   :  { %4651 = vpow2.f32 %v737_v29  ;;  %v754_v38 = vsel %vm696_vm1, %v4644_v33, 0.0 }
 0x274   :  { %v4646_v34 = vpop.eup %4645  ;;  %3594 = vmatmul.msk.f32.vlgmr.msra.gmra.mxu3 %vm696_vm1, %v778_v32 }
 0x275   :  { %v4648_v35 = vpop.eup %4647  ;;  %v766_v36 = vsel %vm696_vm1, %v4646_v34, 0.0 }
 0x276   :  { %v760_v37 = vsel %vm696_vm1, %v4648_v35, 0.0  ;;  %767 = vadd.xlane.f32.xlu2 %v766_v36 }
 0x277   :  { %761 = vadd.xlane.f32.xlu0 %v760_v37  ;;  %755 = vadd.xlane.f32.xlu1 %v754_v38 }
 0x278   :  { %v4650_v39 = vpop.eup %4649 }
 0x279   :  { %v777_v40 = vmul.f32 %v4650_v39, %v4636_v0  ;;  %v4652_v41 = vpop.eup %4651 }
 0x27a   :  { %v757_v42 = vsel %vm696_vm1, %v4652_v41, 0.0 }
 0x27b   :  { %3593 = vmatmul.msk.f32.vlgmr.msra.gmra.mxu1 %vm696_vm1, %v777_v40 }
 0x27e   :  { %758 = vadd.xlane.f32.xlu2 %v757_v42 }
 0x28b   :  { %4561 = vrot.lane.b32.xlu0 %v4570_v17, %s5068_s14 }
 0x290   :  { %4566 = vrot.lane.b32.xlu1 %v4570_v17, %s5062_s19 }
 0x296   :  { %4571 = vrot.lane.b32.xlu2 %v4570_v17, %s5069_s23 }
 0x2d1   :  { %v753_v45 = vpop.xlane.xlu0 %752 }
 0x2d2   :  { %4653 = vrcp.f32 %v753_v45 }
 0x2d8   :  { %v4654_v51 = vpop.eup %4653 }
 0x2d9   :  { %v779_v58 = vmul.f32 %v4654_v51, %v5267_v11  ;;  %v4361_v11 = vld [vmem:[#allocation10 + $0x28] sm:$0xff] }
 0x2e2   :  { %v765_v43 = vpop.xlane.xlu1 %764 }
 0x2e9   :  { %v768_v44 = vpop.xlane.xlu2 %767 }
 0x2ea   :  { %v756_v46 = vpop.xlane.xlu1 %755  ;;  %v762_v48 = vpop.xlane.xlu0 %761 }
 0x2eb   :  { %4655 = vrcp.f32 %v756_v46 }
 0x2ec   :  { %4657 = vrcp.f32 %v762_v48 }
 0x2f1   :  { %v759_v47 = vpop.xlane.xlu2 %758  ;;  %v4656_v52 = vpop.eup %4655 }
 0x2f2   :  { %4659 = vrcp.f32 %v759_v47  ;;  %v780_v59 = vmul.f32 %v4656_v52, %v4644_v33  ;;  %v4658_v60 = vpop.eup %4657 }
 0x2f3   :  { %4661 = vrcp.f32 %v765_v43  ;;  %v782_v5 = vmul.f32 %v4658_v60, %v4648_v35  ;;  %v4620_v43 = vld [vmem:[%s5540_s5] ss:$0 sm:$0xff]  ;;  %v3749_v60 = vld [vmem:[#allocation17 + $0xf0] sm:$0xf0] }
 0x2f4   :  { %4663 = vrcp.f32 %v768_v44 }
 0x2f7   :  { %v828_v15 = vpop.f32.mrf.mxu3 }
 0x2f8   :  { %v4660_v63 = vpop.eup %4659  ;;  %v805_v12 = vpop.f32.mrf.mxu1 }
 0x2f9   :  { %v4572_v55 = vpop.permute.xlu2 %4571  ;;  %v4662_v1 = vpop.eup %4661  ;;  %v781_v6 = vmul.f32 %v4660_v63, %v4652_v41 }
 0x2fa   :  { %v4574_v61 = vunpack.i.h.bf16 %v4572_v55  ;;  %v4573_v62 = vunpack.i.l.bf16 %v4572_v55  ;;  %v4664_v4 = vpop.eup %4663  ;;  %v783_v7 = vmul.f32 %v4662_v1, %v5271_v27  ;;  %v4393_v1 = vld [vmem:[#allocation17 + $0xec] sm:$0xf] }
 0x2fb   :  { %v784_v8 = vmul.f32 %v4664_v4, %v4646_v34  ;;  %v3731_v4 = vld [vmem:[#allocation17 + $0xc0] sm:$0xf] }
 0x2fd   :  { %v4562_v56 = vpop.permute.xlu0 %4561 }
 0x2fe   :  { %v4564_v53 = vunpack.i.h.bf16 %v4562_v56  ;;  %v4563_v57 = vunpack.i.l.bf16 %v4562_v56  ;;  %v5070_v56 = vmov 128.0  }
 0x2ff   :  { %4665 = vrcp.f32 %v5070_v56 }
 0x300   :  { %849 = vmatpush.msra.mxu0 %v4563_v57  ;;  %872 = vmatpush.msrb.mxu1 %v4564_v53  ;;  %v3747_v53 = vld [vmem:[#allocation17 + $0xe0] sm:$0xf]  ;;  %v4394_v57 = vld [vmem:[#allocation17 + $0xec] sm:$0xf0] }
 0x301   :  { %3595 = vmatmul.msk.f32.vlgmr.msra.gmra.mxu0 %vm696_vm1, %v779_v58  ;;  %3596 = vmatmul.msk.f32.vlgmr.msrb.gmra.mxu1 %vm696_vm1, %v780_v59  ;;  %v4392_v58 = vld [vmem:[#allocation17 + $0xe4] sm:$0xf]  ;;  %v3748_v59 = vor.u32 %v4394_v57, %v3747_v53  ;;  %v4377_v57 = vld [vmem:[#allocation17 + $0x6c] sm:$0xf] }
 0x302   :  { %941 = vmatpush.msrb.mxu0 %v4573_v62  ;;  %964 = vmatpush.msra.mxu1 %v4574_v61  ;;  %v4567_v0 = vpop.permute.xlu1 %4566  ;;  %v3755_v61 = vld [vmem:[#allocation17 + $0xe8] sm:$0xf]  ;;  %v4395_v62 = vld [vmem:[#allocation17 + $0xf4] sm:$0xf0]  ;;  %v3752_v63 = vor.u32 %v4392_v58, %v3749_v60  ;;  %v3693_v58 = vld [vmem:[#allocation17 + $0x78] sm:$0xf0] }
 0x303   :  { %v4569_v2 = vunpack.i.h.bf16 %v4567_v0  ;;  %v4568_v3 = vunpack.i.l.bf16 %v4567_v0  ;;  %v3756_v0 = vor.u32 %v4395_v62, %v3755_v61  ;;  %v3667_v61 = vld [vmem:[#allocation17 + $0x40] sm:$0xf]  ;;  %v4374_v62 = vld [vmem:[#allocation17 + $0x4c] sm:$0xf0] }
 0x304   :  { %1366 = vmatpush.bf16.msra.mxu0 %v3752_v63 }
 0x305   :  { %895 = vmatpush.msrb.mxu2 %v4568_v3  ;;  %918 = vmatpush.msrb.mxu3 %v4569_v2  ;;  %v3757_v2 = vld [vmem:[#allocation17 + $0xf8] sm:$0xf0] }
 0x306   :  { %3597 = vmatmul.msk.f32.vlgmr.msrb.gmra.mxu2 %vm696_vm1, %v781_v6  ;;  %3598 = vmatmul.msk.f32.vlgmr.msrb.gmra.mxu3 %vm696_vm1, %v782_v5  ;;  %v3760_v3 = vor.u32 %v4393_v1, %v3757_v2  ;;  %v4390_v5 = vld [vmem:[#allocation17 + $0xcc] sm:$0xf0]  ;;  %v4388_v6 = vld [vmem:[#allocation17 + $0xc4] sm:$0xf]  ;;  %v3669_v1 = vld [vmem:[#allocation17 + $0x50] sm:$0xf0] }
 0x307   :  { %1070 = vmatpush.bf16.msra.mxu2 %v4363_v9  ;;  %1352 = vmatpush.bf16.msra.mxu3 %v3748_v59  ;;  %v3739_v9 = vld [vmem:[#allocation17 + $0xc8] sm:$0xf]  ;;  %v3696_v59 = vor.u32 %v4377_v57, %v3693_v58  ;;  %v4375_v2 = vld [vmem:[#allocation17 + $0x54] sm:$0xf0]  ;;  %v4426_v57 = vld [vmem:[#allocation19 + $0xf0] sm:$0xff] }
 0x308   :  { %1380 = vmatpush.bf16.msrb.mxu1 %v3756_v0  ;;  %v3668_v0 = vor.u32 %v4374_v62, %v3667_v61  ;;  %v4417_v61 = vld [vmem:[#allocation19 + $0xa8] sm:$0xff] }
 0x309   :  { %3599 = vmatmul.msk.f32.vlgmr.msrb.gmra.mxu0 %vm696_vm1, %v783_v7  ;;  %3600 = vmatmul.msk.f32.vlgmr.msra.gmra.mxu1 %vm696_vm1, %v784_v8  ;;  %v3732_v7 = vor.u32 %v4390_v5, %v3731_v4  ;;  %v3733_v8 = vld [vmem:[#allocation17 + $0xd0] sm:$0xf0]  ;;  %v4401_v62 = vld [vmem:[#allocation19 + $0x28] sm:$0xff] }
 0x30b   :  { %1071 = vmatpush.bf16.msra.mxu2 %v4362_v10  ;;  %v4391_v10 = vld [vmem:[#allocation17 + $0xd4] sm:$0xf0]  ;;  %1353 = vmatpush.bf16.msra.mxu3 %v3732_v7  ;;  %v3677_v7 = vld [vmem:[#allocation17 + $0x58] sm:$0xf0] }
 0x30f   :  { %1072 = vmatpush.bf16.msra.mxu2 %v4361_v11 }
 0x313   :  { %1073 = vmatpush.bf16.msra.mxu2 %v4360_v22  ;;  %v4387_v22 = vld [vmem:[#allocation17 + $0xb4] sm:$0xf0] }
 0x317   :  { %1074 = vmatpush.bf16.msra.mxu2 %v4359_v23 }
 0x31b   :  { %1075 = vmatpush.bf16.msra.mxu2 %v4358_v24 }
 0x31f   :  { %1076 = vmatpush.bf16.msra.mxu2 %v4357_v25 }
 0x323   :  { %1077 = vmatpush.bf16.msra.mxu2 %v4356_v26  ;;  %v4385_v26 = vld [vmem:[#allocation17 + $0xac] sm:$0xf] }
 0x327   :  { %1394 = vmatpush.bf16.msrb.mxu2 %v3760_v3 }
 0x37e   :  { %v851_v13 = vpop.f32.mrf.mxu0  ;;  %v874_v14 = vpop.f32.mrf.mxu1 }
 0x37f   :  { %v4575_v54 = vpack.i.bf16 %v874_v14, %v851_v13  ;;  %v3740_v13 = vor.u32 %v4391_v10, %v3739_v9  ;;  %v4389_v14 = vld [vmem:[#allocation17 + $0xcc] sm:$0xf] }
 0x381   :  { %4576 = vrot.lane.b32.xlu0 %v4575_v54, %s5069_s23  ;;  %v3741_v54 = vld [vmem:[#allocation17 + $0xd8] sm:$0xf0]  ;;  %1381 = vmatpush.bf16.msrb.mxu1 %v3740_v13  ;;  %v4368_v13 = vld [vmem:[#allocation17 + $0x24] sm:$0xf] }
 0x386   :  { %v943_v16 = vpop.f32.mrf.mxu0  ;;  %v966_v17 = vpop.f32.mrf.mxu1 }
 0x387   :  { %v4585_v18 = vpack.i.bf16 %v966_v17, %v943_v16  ;;  %v3715_v16 = vld [vmem:[#allocation17 + $0xa0] sm:$0xf]  ;;  %v4386_v17 = vld [vmem:[#allocation17 + $0xac] sm:$0xf0] }
 0x389   :  { %4586 = vrot.lane.b32.xlu0 %v4585_v18, %s5068_s14  ;;  %v897_v19 = vpop.f32.mrf.mxu2  ;;  %v920_v20 = vpop.f32.mrf.mxu3  ;;  %v4384_v18 = vld [vmem:[#allocation17 + $0xa4] sm:$0xf] }
 0x38a   :  { %v4580_v21 = vpack.i.bf16 %v920_v20, %v897_v19  ;;  %v3716_v19 = vor.u32 %v4386_v17, %v3715_v16  ;;  %v3717_v20 = vld [vmem:[#allocation17 + $0xb0] sm:$0xf0]  ;;  %v4371_v16 = vld [vmem:[#allocation17 + $0x34] sm:$0xf0] }
 0x38b   :  { %v3720_v24 = vor.u32 %v4384_v18, %v3717_v20  ;;  %v4369_v20 = vld [vmem:[#allocation17 + $0x2c] sm:$0xf] }
 0x38c   :  { %4581 = vrot.lane.b32.xlu1 %v4580_v21, %s5062_s19  ;;  %v3723_v21 = vld [vmem:[#allocation17 + $0xa8] sm:$0xf]  ;;  %1354 = vmatpush.bf16.msra.mxu3 %v3716_v19 }
 0x38d   :  { %v3724_v25 = vor.u32 %v4387_v22, %v3723_v21  ;;  %v3661_v21 = vld [vmem:[#allocation17 + $0x38] sm:$0xf0]  ;;  %v3635_v22 = vld [vmem:[#allocation17] sm:$0xf] }
 0x38f   :  { %1382 = vmatpush.bf16.msrb.mxu1 %v3724_v25  ;;  %v4364_v25 = vld [vmem:[#allocation17 + $0x4] sm:$0xf] }
 0x3f3   :  { %v4577_v27 = vpop.permute.xlu0 %4576 }
 0x3f4   :  { %v4579_v28 = vunpack.i.h.bf16 %v4577_v27  ;;  %v4578_v29 = vunpack.i.l.bf16 %v4577_v27  ;;  %v3725_v27 = vld [vmem:[#allocation17 + $0xb8] sm:$0xf0] }
 0x3f6   :  { %v993_v34 = vsel %vm503_vm0, %v805_v12, %v4578_v29  ;;  %v994_v35 = vsel %vm503_vm0, %v828_v15, %v4579_v28  ;;  %v3736_v12 = vor.u32 %v4388_v6, %v3733_v8  ;;  %v3744_v15 = vor.u32 %v4389_v14, %v3741_v54  ;;  %v3699_v29 = vld [vmem:[#allocation17 + $0x80] sm:$0xf]  ;;  %v4373_v6 = vld [vmem:[#allocation17 + $0x4c] sm:$0xf]  ;;  %v3653_v54 = vld [vmem:[#allocation17 + $0x30] sm:$0xf0] }
 0x3f7   :  { %v3728_v28 = vor.u32 %v4385_v26, %v3725_v27  ;;  %v3680_v10 = vor.u32 %v4373_v6, %v3677_v7  ;;  %v3656_v18 = vor.u32 %v4368_v13, %v3653_v54  ;;  %v3637_v26 = vld [vmem:[#allocation17 + $0x10] sm:$0xf0] }
 0x3f8   :  { %1367 = vmatpush.bf16.msra.mxu0 %v3736_v12  ;;  %1395 = vmatpush.bf16.msrb.mxu2 %v3744_v15  ;;  %v4370_v12 = vld [vmem:[#allocation17 + $0x2c] sm:$0xf0]  ;;  %v3659_v15 = vld [vmem:[#allocation17 + $0x28] sm:$0xf] }
 0x3f9   :  { %v3660_v19 = vor.u32 %v4371_v16, %v3659_v15 }
 0x3fb   :  { %v4587_v30 = vpop.permute.xlu0 %4586 }
 0x3fc   :  { %v4589_v36 = vunpack.i.h.bf16 %v4587_v30  ;;  %v4588_v37 = vunpack.i.l.bf16 %v4587_v30  ;;  %1368 = vmatpush.bf16.msra.mxu0 %v3720_v24  ;;  %v4382_v30 = vld [vmem:[#allocation17 + $0x8c] sm:$0xf0]  ;;  %1396 = vmatpush.bf16.msrb.mxu2 %v3728_v28 }
 0x3fd   :  { %v4366_v24 = vld [vmem:[#allocation17 + $0xc] sm:$0xf0] }
 0x3fe   :  { %v4582_v31 = vpop.permute.xlu1 %4581  ;;  %v3636_v28 = vor.u32 %v4366_v24, %v3635_v22  ;;  %v4424_v22 = vld [vmem:[#allocation19 + $0xe0] sm:$0xff]  ;;  %v4414_v24 = vld [vmem:[#allocation19 + $0x90] sm:$0xff] }
 0x3ff   :  { %v4584_v32 = vunpack.i.h.bf16 %v4582_v31  ;;  %v4583_v33 = vunpack.i.l.bf16 %v4582_v31  ;;  %v4380_v31 = vld [vmem:[#allocation17 + $0x84] sm:$0xf] }
 0x401   :  { %v997_v38 = vsel %vm995_vm2, %v994_v35, %v4584_v32  ;;  %v996_v39 = vsel %vm995_vm2, %v993_v34, %v4583_v33  ;;  %v3700_v32 = vor.u32 %v4382_v30, %v3699_v29  ;;  %v3701_v33 = vld [vmem:[#allocation17 + $0x90] sm:$0xf0]  ;;  %v3707_v34 = vld [vmem:[#allocation17 + $0x88] sm:$0xf]  ;;  %v4383_v35 = vld [vmem:[#allocation17 + $0x94] sm:$0xf0] }
 0x402   :  { %v999_v40 = vsel %vm998_vm3, %v996_v39, %v4588_v37  ;;  %v1000_v41 = vsel %vm998_vm3, %v997_v38, %v4589_v36  ;;  %v3704_v37 = vor.u32 %v4380_v31, %v3701_v33  ;;  %v3708_v38 = vor.u32 %v4383_v35, %v3707_v34  ;;  %v4381_v39 = vld [vmem:[#allocation17 + $0x8c] sm:$0xf]  ;;  %v3643_v29 = vld [vmem:[#allocation17 + $0x8] sm:$0xf]  ;;  %v4367_v30 = vld [vmem:[#allocation17 + $0x14] sm:$0xf0] }
 0x403   :  { %v1001_v42 = vpack.c.bf16 %v1000_v41, %v999_v40  ;;  %v3709_v40 = vld [vmem:[#allocation17 + $0x98] sm:$0xf0]  ;;  %1355 = vmatpush.bf16.msra.mxu3 %v3700_v32  ;;  %v3640_v32 = vor.u32 %v4364_v25, %v3637_v26  ;;  %v3644_v33 = vor.u32 %v4367_v30, %v3643_v29  ;;  %v4365_v34 = vld [vmem:[#allocation17 + $0xc] sm:$0xf]  ;;  %v4398_v29 = vld [vmem:[#allocation19 + $0x10] sm:$0xff] }
 0x404   :  { %v3712_v41 = vor.u32 %v4381_v39, %v3709_v40  ;;  %1369 = vmatpush.bf16.msra.mxu0 %v3704_v37  ;;  %1383 = vmatpush.bf16.msrb.mxu1 %v3708_v38  ;;  %v3645_v35 = vld [vmem:[#allocation17 + $0x18] sm:$0xf0]  ;;  %v4422_v30 = vld [vmem:[#allocation19 + $0xd0] sm:$0xff] }
 0x405   :  { %1078 = vmatmul.bf16.vlgmr.msra.gmra.mxu2 %v1001_v42  ;;  %v3683_v42 = vld [vmem:[#allocation17 + $0x60] sm:$0xf]  ;;  %v3648_v37 = vor.u32 %v4365_v34, %v3645_v35  ;;  %v4399_v25 = vld [vmem:[#allocation19 + $0x18] sm:$0xff]  ;;  %v4421_v34 = vld [vmem:[#allocation19 + $0xc8] sm:$0xff] }
 0x406   :  { %1397 = vmatpush.bf16.msrb.mxu2 %v3712_v41  ;;  %v4411_v41 = vld [vmem:[#allocation19 + $0x78] sm:$0xff]  ;;  %v4396_v35 = vld [vmem:[#allocation19] sm:$0xff] }
 0x407   :  { %v4423_v26 = vld [vmem:[#allocation19 + $0xd8] sm:$0xff] }
 0x40a   :  { %1398 = vmatpush.bf16.msrb.mxu2 %v3696_v59 }
 0x40e   :  { %1399 = vmatpush.bf16.msrb.mxu2 %v3680_v10 }
 0x488   :  { %v1079_v44 = vpop.f32.mrf.mxu2 }
 0x489   :  { %v1080_v45 = vadd.f32 %v4620_v43, %v1079_v44  ;;  %v4376_v44 = vld [vmem:[#allocation17 + $0x64] sm:$0xf] }
 0x48b   :  { %v5305_v46 = vadd.f32 %v1080_v45, %v5213_v49  ;;  %v5316_v49 = vpop.eup %4665 }
 0x48c   :  { %vm1097_vm4 = vweird.f32 %v5316_v49 }
 0x48d   :  { %1088 = vadd.xlane.f32.xlu2 %v5305_v46  ;;  %v1101_v47 = vmul.f32 %v5305_v46, %v5305_v46 }
 0x48f   :  { %1103 = vadd.xlane.f32.xlu0 %v1101_v47  ;;  %v3685_v47 = vld [vmem:[#allocation17 + $0x70] sm:$0xf0] }
 0x490   :  { %v1081_v48 = vpop.f32.mrf.mxu2  ;;  %v3688_v56 = vor.u32 %v4376_v44, %v3685_v47  ;;  %v4403_v44 = vld [vmem:[#allocation19 + $0x38] sm:$0xff]  ;;  %v4410_v47 = vld [vmem:[#allocation19 + $0x70] sm:$0xff] }
 0x491   :  { %v1082_v51 = vadd.f32 %v4620_v43, %v1081_v48  ;;  %v4378_v43 = vld [vmem:[#allocation17 + $0x6c] sm:$0xf0]  ;;  %v3691_v48 = vld [vmem:[#allocation17 + $0x68] sm:$0xf] }
 0x492   :  { %v3684_v45 = vor.u32 %v4378_v43, %v3683_v42  ;;  %1370 = vmatpush.bf16.msra.mxu0 %v3688_v56  ;;  %v4419_v42 = vld [vmem:[#allocation19 + $0xb8] sm:$0xff] }
 0x493   :  { %v5311_v52 = vadd.f32 %v1082_v51, %v5215_v50  ;;  %v1093_v50 = vmul.f32 128.0, %v5316_v49  ;;  %v4379_v51 = vld [vmem:[#allocation17 + $0x74] sm:$0xf0] }
 0x494   :  { %v3692_v53 = vor.u32 %v4379_v51, %v3691_v48  ;;  %1356 = vmatpush.bf16.msra.mxu3 %v3684_v45  ;;  %v4427_v45 = vld [vmem:[#allocation19 + $0xf8] sm:$0xff]  ;;  %v4418_v48 = vld [vmem:[#allocation19 + $0xb0] sm:$0xff] }
 0x495   :  { %1090 = vadd.xlane.f32.xlu1 %v5311_v52  ;;  %v1102_v55 = vmul.f32 %v5311_v52, %v5311_v52  ;;  %v1094_v11 = vsub.f32 1.0, %v1093_v50  ;;  %v4372_v50 = vld [vmem:[#allocation17 + $0x44] sm:$0xf] }
 0x496   :  { %1384 = vmatpush.bf16.msrb.mxu1 %v3692_v53  ;;  %v3672_v4 = vor.u32 %v4372_v50, %v3669_v1  ;;  %v4402_v53 = vld [vmem:[#allocation19 + $0x30] sm:$0xff]  ;;  %v4425_v50 = vld [vmem:[#allocation19 + $0xe8] sm:$0xff] }
 0x497   :  { %1105 = vadd.xlane.f32.xlu2 %v1102_v55  ;;  %v1095_v23 = vmul.f32 %v5316_v49, %v1094_v11  ;;  %v3651_v11 = vld [vmem:[#allocation17 + $0x20] sm:$0xf] }
 0x498   :  { %1357 = vmatpush.bf16.msra.mxu3 %v3668_v0  ;;  %1371 = vmatpush.bf16.msra.mxu0 %v3672_v4  ;;  %v3652_v14 = vor.u32 %v4370_v12, %v3651_v11  ;;  %v4621_v12 = vld [vmem:[#allocation11] ss:$0 sm:$0xff] }
 0x499   :  { %v1096_v36 = vadd.f32 %v5316_v49, %v1095_v23  ;;  %v3664_v23 = vor.u32 %v4369_v20, %v3661_v21  ;;  %v4415_v21 = vld [vmem:[#allocation19 + $0x98] sm:$0xff] }
 0x49b   :  { %v5323_v55 = vsel %vm1097_vm4, %v5316_v49, %v1096_v36  ;;  %v3675_v49 = vld [vmem:[#allocation17 + $0x48] sm:$0xf]  ;;  %1400 = vmatpush.bf16.msrb.mxu2 %v3664_v23  ;;  %v4406_v23 = vld [vmem:[#allocation19 + $0x50] sm:$0xff] }
 0x49c   :  { %v3676_v5 = vor.u32 %v4375_v2, %v3675_v49  ;;  %1358 = vmatpush.bf16.msra.mxu3 %v3652_v14  ;;  %1372 = vmatpush.bf16.msra.mxu0 %v3656_v18  ;;  %v4408_v49 = vld [vmem:[#allocation19 + $0x60] sm:$0xff] }
 0x49d   :  { %v4416_v2 = vld [vmem:[#allocation19 + $0xa0] sm:$0xff] }
 0x49e   :  { %1385 = vmatpush.bf16.msrb.mxu1 %v3676_v5 }
 0x49f   :  { %1401 = vmatpush.bf16.msrb.mxu2 %v3648_v37  ;;  %v1182_v37 = vld [vmem:[%s5546_s11] sm:$0xf] }
 0x4a0   :  { %1359 = vmatpush.bf16.msra.mxu3 %v3636_v28  ;;  %1373 = vmatpush.bf16.msra.mxu0 %v3640_v32  ;;  %v4413_v28 = vld [vmem:[#allocation19 + $0x88] sm:$0xff]  ;;  %v4412_v32 = vld [vmem:[#allocation19 + $0x80] sm:$0xff] }
 0x4a2   :  { %1386 = vmatpush.bf16.msrb.mxu1 %v3660_v19 }
 0x4a3   :  { %1722 = vmatpush.bf16.msra.mxu2 %v4427_v45 }
 0x4a4   :  { %1694 = vmatpush.bf16.msrb.mxu0 %v4411_v41  ;;  %1680 = vmatpush.bf16.msrb.mxu3 %v4403_v44  ;;  %v1186_v41 = vperm.slane %v1182_v37, 2 }
 0x4a6   :  { %1387 = vmatpush.bf16.msrb.mxu1 %v3644_v33  ;;  %v4397_v33 = vld [vmem:[#allocation19 + $0x8] sm:$0xff] }
 0x4a7   :  { %1723 = vmatpush.bf16.msra.mxu2 %v4426_v57 }
 0x4a8   :  { %1695 = vmatpush.bf16.msrb.mxu0 %v4410_v47  ;;  %1681 = vmatpush.bf16.msrb.mxu3 %v4402_v53  ;;  %v1187_v53 = vperm.slane %v1182_v37, 3 }
 0x4aa   :  { %1708 = vmatpush.bf16.msra.mxu1 %v4419_v42 }
 0x4ab   :  { %1724 = vmatpush.bf16.msra.mxu2 %v4425_v50 }
 0x4ac   :  { %1682 = vmatpush.bf16.msrb.mxu3 %v4401_v62 }
 0x4ae   :  { %1709 = vmatpush.bf16.msra.mxu1 %v4418_v48  ;;  %v1184_v48 = vperm.slane %v1182_v37, 0 }
 0x4af   :  { %1725 = vmatpush.bf16.msra.mxu2 %v4424_v22 }
 0x4b2   :  { %1710 = vmatpush.bf16.msra.mxu1 %v4417_v61 }
 0x4b3   :  { %1726 = vmatpush.bf16.msra.mxu2 %v4423_v26 }
 0x4b6   :  { %1711 = vmatpush.bf16.msra.mxu1 %v4416_v2 }
 0x4b7   :  { %1727 = vmatpush.bf16.msra.mxu2 %v4422_v30  ;;  %v4450_v30 = vld [vmem:[#allocation7 + $0x170] sm:$0xf0] }
 0x4ba   :  { %1712 = vmatpush.bf16.msra.mxu1 %v4415_v21 }
 0x4bb   :  { %1728 = vmatpush.bf16.msra.mxu2 %v4421_v34  ;;  %v3983_v34 = vld [vmem:[#allocation7 + $0x170] sm:$0xf] }
 0x4be   :  { %1713 = vmatpush.bf16.msra.mxu1 %v4414_v24 }
 0x4c2   :  { %1714 = vmatpush.bf16.msra.mxu1 %v4413_v28 }
 0x4c6   :  { %1715 = vmatpush.bf16.msra.mxu1 %v4412_v32 }
 0x500   :  { %v1089_v60 = vpop.xlane.xlu2 %1088 }
 0x501   :  { %v5326_v63 = vmul.f32 %v5323_v55, %v1089_v60  ;;  %v4409_v60 = vld [vmem:[#allocation19 + $0x68] sm:$0xff] }
 0x502   :  { %v1104_v3 = vpop.xlane.xlu0 %1103  ;;  %1696 = vmatpush.bf16.msrb.mxu0 %v4409_v60 }
 0x503   :  { %v1109_v8 = vmul.f32 %v5326_v63, %v5326_v63  ;;  %v1107_v9 = vmul.f32 %v1104_v3, %v5323_v55 }
 0x505   :  { %v1111_v17 = vsub.f32 %v1107_v9, %v1109_v8  ;;  %v1113_v9 = vsub.f32 %v5305_v46, %v5326_v63  ;;  %v4407_v63 = vld [vmem:[#allocation19 + $0x58] sm:$0xff] }
 0x506   :  { %1697 = vmatpush.bf16.msrb.mxu0 %v4408_v49 }
 0x507   :  { %v5331_v27 = vadd.f32 1e-05, %v1111_v17  ;;  %v4622_v17 = vld [vmem:[#allocation13] ss:$0 sm:$0xff] }
 0x508   :  { %v1091_v31 = vpop.xlane.xlu1 %1090 }
 0x509   :  { %4667 = vrsqrt.f32 %v5331_v27  ;;  %v5335_v36 = vmul.f32 %v5323_v55, %v1091_v31  ;;  %vm1123_vm6 = vweird.f32 %v5331_v27  ;;  %v4404_v31 = vld [vmem:[#allocation19 + $0x40] sm:$0xff] }
 0x50a   :  { %v1106_v38 = vpop.xlane.xlu2 %1105  ;;  %1698 = vmatpush.bf16.msrb.mxu0 %v4407_v63 }
 0x50b   :  { %v1110_v39 = vmul.f32 %v5335_v36, %v5335_v36  ;;  %v1108_v40 = vmul.f32 %v1106_v38, %v5323_v55  ;;  %v1114_v14 = vsub.f32 %v5311_v52, %v5335_v36  ;;  %v4400_v52 = vld [vmem:[#allocation19 + $0x20] sm:$0xff] }
 0x50c   :  { %1683 = vmatpush.bf16.msrb.mxu3 %v4400_v52  ;;  %v4420_v36 = vld [vmem:[#allocation19 + $0xc0] sm:$0xff] }
 0x50d   :  { %v1112_v43 = vsub.f32 %v1108_v40, %v1110_v39  ;;  %1729 = vmatpush.bf16.msra.mxu2 %v4420_v36  ;;  %v1185_v40 = vperm.slane %v1182_v37, 1 }
 0x50e   :  { %1699 = vmatpush.bf16.msrb.mxu0 %v4406_v23 }
 0x50f   :  { %v4668_v51 = vpop.eup %4667  ;;  %v1116_v56 = vadd.f32 1e-05, %v1112_v43 }
 0x510   :  { %v1118_v58 = vmul.f32 %v4668_v51, %v5331_v27  ;;  %vm1124_vm5 = vweird.f32 %v4668_v51  ;;  %1684 = vmatpush.bf16.msrb.mxu3 %v4399_v25  ;;  %v4405_v27 = vld [vmem:[#allocation19 + $0x48] sm:$0xff] }
 0x511   :  { %4669 = vrsqrt.f32 %v1116_v56  ;;  %vm1125_vm7 = vmor %vm1123_vm6, %vm1124_vm5  ;;  %vm1133_vm9 = vweird.f32 %v1116_v56 }
 0x512   :  { %v1119_v59 = vmul.f32 %v4668_v51, %v1118_v58  ;;  %1700 = vmatpush.bf16.msrb.mxu0 %v4405_v27 }
 0x514   :  { %v1120_v0 = vmul.f32 0.5, %v1119_v59  ;;  %1685 = vmatpush.bf16.msrb.mxu3 %v4398_v29  ;;  %v3975_v29 = vld [vmem:[#allocation7 + $0x168] sm:$0xf] }
 0x515   :  { %v3976_v32 = vor.u32 %v4450_v30, %v3975_v29  ;;  %v4431_v29 = vld [vmem:[#allocation7 + $0xdc] sm:$0xf] }
 0x516   :  { %v1121_v1 = vsub.f32 1.5, %v1120_v0  ;;  %1701 = vmatpush.bf16.msrb.mxu0 %v4404_v31  ;;  %v4449_v31 = vld [vmem:[#allocation7 + $0x16c] sm:$0xf] }
 0x517   :  { %v4670_v3 = vpop.eup %4669 }
 0x518   :  { %v1122_v4 = vmul.f32 %v4668_v51, %v1121_v1  ;;  %v1128_v5 = vmul.f32 %v4670_v3, %v1116_v56  ;;  %vm1134_vm8 = vweird.f32 %v4670_v3  ;;  %1686 = vmatpush.bf16.msrb.mxu3 %v4397_v33  ;;  %v3977_v33 = vld [vmem:[#allocation7 + $0x174] sm:$0xf0] }
 0x519   :  { %vm1135_vm10 = vmor %vm1133_vm9, %vm1134_vm8  ;;  %v3980_v36 = vor.u32 %v4449_v31, %v3977_v33  ;;  %v3905_v31 = vld [vmem:[#allocation7 + $0xe4] sm:$0xf0]  ;;  %v4433_v33 = vld [vmem:[#allocation7 + $0xe8] sm:$0xf0] }
 0x51a   :  { %v1129_v6 = vmul.f32 %v4670_v3, %v1128_v5  ;;  %v1126_v7 = vsel %vm1125_vm7, %v4668_v51, %v1122_v4 }
 0x51b   :  { %v1137_v11 = vmul.f32 %v1126_v7, %v1113_v9 }
 0x51c   :  { %v1130_v8 = vmul.f32 0.5, %v1129_v6  ;;  %1687 = vmatpush.bf16.msrb.mxu3 %v4396_v35  ;;  %v4451_v35 = vld [vmem:[#allocation7 + $0x178] sm:$0xf0] }
 0x51d   :  { %v1142_v16 = vmul.f32 %v4621_v12, %v1137_v11  ;;  %v4623_v11 = vld [vmem:[%s5548_s13] ss:$0 sm:$0xff]  ;;  %v3984_v37 = vor.u32 %v4451_v35, %v3983_v34  ;;  %v3908_v35 = vor.u32 %v4431_v29, %v3905_v31 }
 0x51e   :  { %v1131_v10 = vsub.f32 1.5, %v1130_v8 }
 0x51f   :  { %v5346_v19 = vadd.f32 %v4622_v17, %v1142_v16 }
 0x520   :  { %v1132_v13 = vmul.f32 %v4670_v3, %v1131_v10 }
 0x522   :  { %v1136_v54 = vsel %vm1135_vm10, %v4670_v3, %v1132_v13 }
 0x523   :  { %v1138_v15 = vmul.f32 %v1136_v54, %v1114_v14 }
 0x525   :  { %v1143_v18 = vmul.f32 %v4621_v12, %v1138_v15 }
 0x527   :  { %v5348_v20 = vadd.f32 %v4622_v17, %v1143_v18 }
 0x529   :  { %v1149_v46 = vpack.c.bf16 %v5348_v20, %v5346_v19 }
 0x52b   :  { %1360 = vmatmul.bf16.vlgmr.msra.gmra.mxu3 %v1149_v46  ;;  %1374 = vmatmul.bf16.vlgmr.msra.gmra.mxu0 %v1149_v46 }
 0x52c   :  { %1388 = vmatmul.bf16.vlgmr.msrb.gmra.mxu1 %v1149_v46  ;;  %1402 = vmatmul.bf16.vlgmr.msrb.gmra.mxu2 %v1149_v46 }
 0x52d   :  { %1965 = vmatpush.bf16.msra.mxu3 %v3976_v32  ;;  %1979 = vmatpush.bf16.msra.mxu0 %v3980_v36  ;;  %v3911_v32 = vld [vmem:[#allocation7 + $0xe0] sm:$0xf] }
 0x52e   :  { %1993 = vmatpush.bf16.msrb.mxu1 %v3984_v37  ;;  %v3912_v36 = vor.u32 %v4433_v33, %v3911_v32  ;;  %v3891_v37 = vld [vmem:[#allocation7 + $0xc0] sm:$0xf] }
 0x5a8   :  { %v1375_v38 = vpop.f32.mrf.mxu0 }
 0x5a9   :  { %v1389_v39 = vpop.f32.mrf.mxu1  ;;  %v1376_v43 = vadd.f32 %v1375_v38, %v1185_v40  ;;  %v4447_v38 = vld [vmem:[#allocation7 + $0x158] sm:$0xf0] }
 0x5aa   :  { %v1390_v45 = vadd.f32 %v1389_v39, %v1186_v41  ;;  %v4446_v39 = vld [vmem:[#allocation7 + $0x154] sm:$0xf] }
 0x5ab   :  { %v1409_v58 = vmax.f32 %v1376_v43, 0.0  ;;  %v4448_v43 = vld [vmem:[#allocation7 + $0x160] sm:$0xf0] }
 0x5ac   :  { %v1410_v60 = vmax.f32 %v1390_v45, 0.0 }
 0x5ae   :  { %v1361_v42 = vpop.f32.mrf.mxu3 }
 0x5af   :  { %v1403_v44 = vpop.f32.mrf.mxu2  ;;  %v1362_v62 = vadd.f32 %v1361_v42, %v1184_v48  ;;  %v3971_v42 = vld [vmem:[#allocation7 + $0x158] sm:$0xf] }
 0x5b0   :  { %v1377_v47 = vpop.f32.mrf.mxu0  ;;  %v1404_v0 = vadd.f32 %v1403_v44, %v1187_v53  ;;  %v3972_v45 = vor.u32 %v4448_v43, %v3971_v42 }
 0x5b1   :  { %v1378_v51 = vadd.f32 %v1377_v47, %v1185_v40  ;;  %v1391_v56 = vpop.f32.mrf.mxu1  ;;  %v1408_v5 = vmax.f32 %v1362_v62, 0.0  ;;  %v3951_v47 = vld [vmem:[#allocation7 + $0x138] sm:$0xf]  ;;  %v4441_v62 = vld [vmem:[#allocation7 + $0x128] sm:$0xf0] }
 0x5b2   :  { %v1392_v57 = vadd.f32 %v1391_v56, %v1186_v41  ;;  %v1411_v7 = vmax.f32 %v1404_v0, 0.0  ;;  %v3965_v41 = vld [vmem:[#allocation7 + $0x15c] sm:$0xf0]  ;;  %1994 = vmatpush.bf16.msrb.mxu1 %v3972_v45 }
 0x5b3   :  { %v1413_v59 = vmax.f32 %v1378_v51, 0.0  ;;  %v3968_v44 = vor.u32 %v4446_v39, %v3965_v41  ;;  %v4443_v51 = vld [vmem:[#allocation7 + $0x13c] sm:$0xf]  ;;  %v3893_v39 = vld [vmem:[#allocation7 + $0xcc] sm:$0xf0] }
 0x5b4   :  { %v1414_v61 = vmax.f32 %v1392_v57, 0.0  ;;  %v3959_v57 = vld [vmem:[#allocation7 + $0x140] sm:$0xf]  ;;  %v4430_v41 = vld [vmem:[#allocation7 + $0xd0] sm:$0xf0] }
 0x5b5   :  { %v1417_v50 = vpack.c.bf16 %v1413_v59, %v1409_v58  ;;  %1980 = vmatpush.bf16.msra.mxu0 %v3968_v44  ;;  %v4445_v58 = vld [vmem:[#allocation7 + $0x148] sm:$0xf0] }
 0x5b6   :  { %v1418_v1 = vpack.c.bf16 %v1414_v61, %v1410_v60  ;;  %v1363_v49 = vpop.f32.mrf.mxu3  ;;  %v3960_v60 = vor.u32 %v4445_v58, %v3959_v57  ;;  %v3939_v61 = vld [vmem:[#allocation7 + $0x120] sm:$0xf] }
 0x5b7   :  { %v1364_v2 = vadd.f32 %v1363_v49, %v1184_v48  ;;  %v1405_v3 = vpop.f32.mrf.mxu2  ;;  %1702 = vmatmul.bf16.vlgmr.msrb.gmra.mxu0 %v1417_v50  ;;  %v4444_v48 = vld [vmem:[#allocation7 + $0x140] sm:$0xf0]  ;;  %v3940_v0 = vor.u32 %v4441_v62, %v3939_v61  ;;  %v3947_v49 = vld [vmem:[#allocation7 + $0x128] sm:$0xf] }
 0x5b8   :  { %v1406_v4 = vadd.f32 %v1405_v3, %v1187_v53  ;;  %1716 = vmatmul.bf16.vlgmr.msra.gmra.mxu1 %v1418_v1  ;;  %v3952_v56 = vor.u32 %v4444_v48, %v3951_v47  ;;  %v3953_v53 = vld [vmem:[#allocation7 + $0x144] sm:$0xf0]  ;;  %v4440_v50 = vld [vmem:[#allocation7 + $0x124] sm:$0xf]  ;;  %v3941_v1 = vld [vmem:[#allocation7 + $0x12c] sm:$0xf0] }
 0x5b9   :  { %v1412_v6 = vmax.f32 %v1364_v2, 0.0  ;;  %v3956_v59 = vor.u32 %v4443_v51, %v3953_v53  ;;  %1995 = vmatpush.bf16.msrb.mxu1 %v3960_v60  ;;  %v4442_v2 = vld [vmem:[#allocation7 + $0x130] sm:$0xf0]  ;;  %v3944_v3 = vor.u32 %v4440_v50, %v3941_v1 }
 0x5ba   :  { %v1415_v8 = vmax.f32 %v1406_v4, 0.0  ;;  %v3948_v4 = vor.u32 %v4442_v2, %v3947_v49 }
 0x5bb   :  { %v1416_v9 = vpack.c.bf16 %v1412_v6, %v1408_v5  ;;  %1981 = vmatpush.bf16.msra.mxu0 %v3956_v59  ;;  %v3927_v5 = vld [vmem:[#allocation7 + $0x108] sm:$0xf]  ;;  %v4438_v6 = vld [vmem:[#allocation7 + $0x110] sm:$0xf0] }
 0x5bc   :  { %v1419_v10 = vpack.c.bf16 %v1415_v8, %v1411_v7  ;;  %v4437_v7 = vld [vmem:[#allocation7 + $0x10c] sm:$0xf]  ;;  %v3928_v8 = vor.u32 %v4438_v6, %v3927_v5 }
 0x5bd   :  { %1688 = vmatmul.bf16.vlgmr.msrb.gmra.mxu3 %v1416_v9  ;;  %1996 = vmatpush.bf16.msrb.mxu1 %v3948_v4  ;;  %v3929_v9 = vld [vmem:[#allocation7 + $0x114] sm:$0xf0] }
 0x5be   :  { %1730 = vmatmul.bf16.vlgmr.msra.gmra.mxu2 %v1419_v10  ;;  %v3935_v10 = vld [vmem:[#allocation7 + $0x110] sm:$0xf] }
 0x5bf   :  { %1982 = vmatpush.bf16.msra.mxu0 %v3944_v3 }
 0x634   :  { %v1703_v12 = vpop.f32.mrf.mxu0 }
 0x635   :  { %v1717_v54 = vpop.f32.mrf.mxu1 }
 0x63c   :  { %v1705_v52 = vpop.f32.mrf.mxu0 }
 0x63d   :  { %v1719_v24 = vpop.f32.mrf.mxu1 }
 0x640   :  { %v1689_v13 = vpop.f32.mrf.mxu3 }
 0x641   :  { %v1690_v14 = vadd.f32 %v4623_v11, %v1689_v13  ;;  %v1731_v16 = vpop.f32.mrf.mxu2 }
 0x643   :  { %v1704_v15 = vadd.f32 %v1703_v12, %v1690_v14  ;;  %v3932_v12 = vor.u32 %v4437_v7, %v3929_v9 }
 0x645   :  { %v1718_v17 = vadd.f32 %v1717_v54, %v1704_v15  ;;  %1983 = vmatpush.bf16.msra.mxu0 %v3932_v12  ;;  %v3915_v54 = vld [vmem:[#allocation7 + $0xf0] sm:$0xf]  ;;  %v4435_v15 = vld [vmem:[#allocation7 + $0xf8] sm:$0xf0] }
 0x647   :  { %v1732_v18 = vadd.f32 %v1731_v16, %v1718_v17  ;;  %v4434_v16 = vld [vmem:[#allocation7 + $0xf4] sm:$0xf] }
 0x648   :  { %v1691_v46 = vpop.f32.mrf.mxu3 }
 0x649   :  { %v5359_v63 = vadd.f32 %v1732_v18, %v5346_v19  ;;  %v1692_v21 = vadd.f32 %v4623_v11, %v1691_v46  ;;  %v1733_v26 = vpop.f32.mrf.mxu2  ;;  %v4439_v11 = vld [vmem:[#allocation7 + $0x118] sm:$0xf0]  ;;  %v3916_v18 = vor.u32 %v4435_v15, %v3915_v54  ;;  %v3917_v46 = vld [vmem:[#allocation7 + $0xfc] sm:$0xf0] }
 0x64a   :  { %v3936_v13 = vor.u32 %v4439_v11, %v3935_v10 }
 0x64b   :  { %v1706_v22 = vadd.f32 %v1705_v52, %v1692_v21  ;;  %1740 = vadd.xlane.f32.xlu1 %v5359_v63  ;;  %v1746_v23 = vmul.f32 %v5359_v63, %v5359_v63  ;;  %v3923_v21 = vld [vmem:[#allocation7 + $0xf8] sm:$0xf]  ;;  %v4436_v52 = vld [vmem:[#allocation7 + $0x100] sm:$0xf0] }
 0x64c   :  { %1997 = vmatpush.bf16.msrb.mxu1 %v3936_v13 }
 0x64d   :  { %v1720_v25 = vadd.f32 %v1719_v24, %v1706_v22  ;;  %1748 = vadd.xlane.f32.xlu2 %v1746_v23  ;;  %v3920_v23 = vor.u32 %v4434_v16, %v3917_v46  ;;  %v3924_v24 = vor.u32 %v4436_v52, %v3923_v21 }
 0x64f   :  { %v1734_v27 = vadd.f32 %v1733_v26, %v1720_v25  ;;  %1984 = vmatpush.bf16.msra.mxu0 %v3920_v23 }
 0x650   :  { %1998 = vmatpush.bf16.msrb.mxu1 %v3924_v24 }
 0x651   :  { %v5365_v28 = vadd.f32 %v1734_v27, %v5348_v20  ;;  %v3963_v20 = vld [vmem:[#allocation7 + $0x150] sm:$0xf]  ;;  %v3903_v27 = vld [vmem:[#allocation7 + $0xd8] sm:$0xf] }
 0x652   :  { %v3964_v40 = vor.u32 %v4447_v38, %v3963_v20  ;;  %v4429_v20 = vld [vmem:[#allocation7 + $0xc8] sm:$0xf0]  ;;  %v4428_v38 = vld [vmem:[#allocation7 + $0xc4] sm:$0xf] }
 0x653   :  { %1742 = vadd.xlane.f32.xlu0 %v5365_v28  ;;  %v1747_v19 = vmul.f32 %v5365_v28, %v5365_v28  ;;  %v3892_v43 = vor.u32 %v4429_v20, %v3891_v37  ;;  %1985 = vmatpush.bf16.msra.mxu0 %v3908_v35  ;;  %v3896_v45 = vor.u32 %v4428_v38, %v3893_v39 }
 0x654   :  { %1966 = vmatpush.bf16.msra.mxu3 %v3964_v40  ;;  %v3899_v40 = vld [vmem:[#allocation7 + $0xc8] sm:$0xf]  ;;  %1999 = vmatpush.bf16.msrb.mxu1 %v3912_v36 }
 0x655   :  { %1750 = vadd.xlane.f32.xlu1 %v1747_v19  ;;  %v4432_v19 = vld [vmem:[#allocation7 + $0xe0] sm:$0xf0]  ;;  %v3900_v47 = vor.u32 %v4430_v41, %v3899_v40 }
 0x656   :  { %v3904_v30 = vor.u32 %v4432_v19, %v3903_v27 }
 0x657   :  { %1986 = vmatpush.bf16.msra.mxu0 %v3896_v45 }
 0x658   :  { %1967 = vmatpush.bf16.msra.mxu3 %v3952_v56  ;;  %2000 = vmatpush.bf16.msrb.mxu1 %v3900_v47 }
 0x65c   :  { %1968 = vmatpush.bf16.msra.mxu3 %v3940_v0 }
 0x660   :  { %1969 = vmatpush.bf16.msra.mxu3 %v3928_v8  ;;  %v4624_v8 = vld [vmem:[#allocation14] ss:$0 sm:$0xff] }
 0x664   :  { %1970 = vmatpush.bf16.msra.mxu3 %v3916_v18 }
 0x668   :  { %1971 = vmatpush.bf16.msra.mxu3 %v3904_v30 }
 0x66c   :  { %1972 = vmatpush.bf16.msra.mxu3 %v3892_v43 }
 0x6be   :  { %v1741_v14 = vpop.xlane.xlu1 %1740 }
 0x6bf   :  { %v5371_v17 = vmul.f32 %v1741_v14, %v5323_v55  ;;  %v4625_v14 = vld [vmem:[#allocation16] ss:$0 sm:$0xff] }
 0x6c0   :  { %v1749_v22 = vpop.xlane.xlu2 %1748 }
 0x6c1   :  { %v1754_v25 = vmul.f32 %v5371_v17, %v5371_v17  ;;  %v1752_v26 = vmul.f32 %v1749_v22, %v5323_v55  ;;  %v1758_v5 = vsub.f32 %v5359_v63, %v5371_v17  ;;  %v1829_v17 = vld [vmem:[#allocation8 + $0x3] sm:$0x7] }
 0x6c2   :  { %v1832_v18 = vperm.slane %v1829_v17, 1  ;;  %v1831_v21 = vperm.slane %v1829_v17, 0  ;;  %v1833_v30 = vperm.slane %v1829_v17, 2 }
 0x6c3   :  { %v1756_v34 = vsub.f32 %v1752_v26, %v1754_v25 }
 0x6c5   :  { %v1760_v42 = vadd.f32 1e-05, %v1756_v34 }
 0x6c6   :  { %v1743_v44 = vpop.xlane.xlu0 %1742 }
 0x6c7   :  { %4671 = vrsqrt.f32 %v1760_v42  ;;  %v1745_v48 = vmul.f32 %v1743_v44, %v5323_v55  ;;  %vm1768_vm12 = vweird.f32 %v1760_v42 }
 0x6c8   :  { %v1751_v51 = vpop.xlane.xlu1 %1750 }
 0x6c9   :  { %v1755_v56 = vmul.f32 %v1745_v48, %v1745_v48  ;;  %v1753_v53 = vmul.f32 %v1751_v51, %v5323_v55  ;;  %v1759_v10 = vsub.f32 %v5365_v28, %v1745_v48 }
 0x6cb   :  { %v1757_v57 = vsub.f32 %v1753_v53, %v1755_v56 }
 0x6cd   :  { %v4672_v58 = vpop.eup %4671  ;;  %v1761_v59 = vadd.f32 1e-05, %v1757_v57 }
 0x6ce   :  { %v1763_v60 = vmul.f32 %v4672_v58, %v1760_v42  ;;  %vm1769_vm11 = vweird.f32 %v4672_v58 }
 0x6cf   :  { %4673 = vrsqrt.f32 %v1761_v59  ;;  %vm1770_vm13 = vmor %vm1768_vm12, %vm1769_vm11  ;;  %vm1778_vm15 = vweird.f32 %v1761_v59 }
 0x6d0   :  { %v1764_v61 = vmul.f32 %v4672_v58, %v1763_v60 }
 0x6d2   :  { %v1765_v62 = vmul.f32 0.5, %v1764_v61 }
 0x6d4   :  { %v1766_v50 = vsub.f32 1.5, %v1765_v62 }
 0x6d5   :  { %v4674_v0 = vpop.eup %4673 }
 0x6d6   :  { %v1767_v1 = vmul.f32 %v4672_v58, %v1766_v50  ;;  %v1773_v49 = vmul.f32 %v4674_v0, %v1761_v59  ;;  %vm1779_vm14 = vweird.f32 %v4674_v0 }
 0x6d7   :  { %vm1780_vm4 = vmor %vm1778_vm15, %vm1779_vm14  ;;  %vm3392_vm14 = vcmask 1041409  }
 0x6d8   :  { %v1774_v2 = vmul.f32 %v4674_v0, %v1773_v49  ;;  %v1771_v3 = vsel %vm1770_vm13, %v4672_v58, %v1767_v1 }
 0x6d9   :  { %v1782_v7 = vmul.f32 %v1771_v3, %v1758_v5 }
 0x6da   :  { %v1775_v4 = vmul.f32 0.5, %v1774_v2 }
 0x6db   :  { %v1787_v13 = vmul.f32 %v4624_v8, %v1782_v7 }
 0x6dc   :  { %v1776_v6 = vsub.f32 1.5, %v1775_v4 }
 0x6dd   :  { %v5381_v15 = vadd.f32 %v4625_v14, %v1787_v13 }
 0x6de   :  { %v1777_v9 = vmul.f32 %v4674_v0, %v1776_v6 }
 0x6e0   :  { %v1781_v11 = vsel %vm1780_vm4, %v4674_v0, %v1777_v9 }
 0x6e1   :  { %v1783_v12 = vmul.f32 %v1781_v11, %v1759_v10 }
 0x6e3   :  { %v1788_v54 = vmul.f32 %v4624_v8, %v1783_v12 }
 0x6e5   :  { %v5383_v16 = vadd.f32 %v4625_v14, %v1788_v54 }
 0x6e7   :  { %v1794_v63 = vpack.c.bf16 %v5383_v16, %v5381_v15 }
 0x6e9   :  { %1973 = vmatmul.bf16.vlgmr.msra.gmra.mxu3 %v1794_v63  ;;  %1987 = vmatmul.bf16.vlgmr.msra.gmra.mxu0 %v1794_v63 }
 0x6ea   :  { %2001 = vmatmul.bf16.vlgmr.msrb.gmra.mxu1 %v1794_v63 }
 0x766   :  { %v1988_v46 = vpop.f32.mrf.mxu0 }
 0x767   :  { %v1989_v28 = vadd.f32 %v1988_v46, %v1832_v18  ;;  %v2002_v27 = vpop.f32.mrf.mxu1 }
 0x768   :  { %v5408_v33 = vadd.f32 %v2002_v27, %v1833_v30 }
 0x769   :  { %2023 = vrot.lane.b32.xlu2 %v1989_v28, %s5068_s14  ;;  %2027 = vrot.lane.b32.xlu0 %v1989_v28, %s5062_s19 }
 0x76a   :  { %3985 = vmatpush.xpose.msk.msrb.mxu2 %vm503_vm0, %v1989_v28 }
 0x76c   :  { %v1974_v52 = vpop.f32.mrf.mxu3 }
 0x76d   :  { %v1975_v22 = vadd.f32 %v1974_v52, %v1831_v21 }
 0x76e   :  { %v1990_v23 = vpop.f32.mrf.mxu0 }
 0x76f   :  { %v1991_v24 = vadd.f32 %v1990_v23, %v1832_v18  ;;  %2013 = vrot.lane.b32.xlu1 %v1975_v22, %s5062_s19  ;;  %3986 = vmatmul.msk.f32.vlgmr.msrb.gmra.mxu2 %vm503_vm0, %v1975_v22  ;;  %v2004_v29 = vpop.f32.mrf.mxu1 }
 0x770   :  { %v5404_v31 = vadd.f32 %v2004_v29, %v1833_v30 }
 0x771   :  { %3987 = vmatpush.xpose.msk.msrb.mxu3 %vm503_vm0, %v1991_v24  ;;  %2029 = vrot.lane.b32.xlu2 %v1991_v24, %s5062_s19 }
 0x772   :  { %2025 = vrot.lane.b32.xlu0 %v1991_v24, %s5068_s14 }
 0x774   :  { %v1976_v25 = vpop.f32.mrf.mxu3 }
 0x775   :  { %v1977_v26 = vadd.f32 %v1976_v25, %v1831_v21 }
 0x777   :  { %3988 = vmatmul.msk.f32.vlgmr.msrb.gmra.mxu3 %vm503_vm0, %v1977_v26  ;;  %2009 = vrot.lane.b32.xlu1 %v1975_v22, %s5068_s14 }
 0x779   :  { %2011 = vrot.lane.b32.xlu2 %v1977_v26, %s5068_s14 }
 0x77a   :  { %2015 = vrot.lane.b32.xlu0 %v1977_v26, %s5062_s19 }
 0x77f   :  { %2033 = vrot.lane.b32.xlu1 %v1991_v24, %s5069_s23 }
 0x781   :  { %2017 = vrot.lane.b32.xlu2 %v1975_v22, %s5069_s23 }
 0x782   :  { %2031 = vrot.lane.b32.xlu0 %v1989_v28, %s5069_s23 }
 0x78a   :  { %2019 = vrot.lane.b32.xlu0 %v1977_v26, %s5069_s23 }
 0x7c3   :  { %v2024_v19 = vpop.permute.xlu2 %2023 }
 0x7c4   :  { %3989 = vmatpush.xpose.msk.msrb.mxu0 %vm503_vm0, %v2024_v19 }
 0x7cb   :  { %v2030_v32 = vpop.permute.xlu2 %2029 }
 0x7cc   :  { %3995 = vmatpush.xpose.msk.msra.mxu3 %vm503_vm0, %v2030_v32 }
 0x7d0   :  { %2376 = vmatpush.msrb.mxu3 %v5404_v31 }
 0x7d3   :  { %v2012_v37 = vpop.permute.xlu2 %2011 }
 0x7db   :  { %v2028_v34 = vpop.permute.xlu0 %2027  ;;  %v2018_v43 = vpop.permute.xlu2 %2017 }
 0x7dc   :  { %3993 = vmatpush.xpose.msk.msra.mxu2 %vm503_vm0, %v2028_v34 }
 0x7e0   :  { %2353 = vmatpush.msrb.mxu2 %v5408_v33 }
 0x7e1   :  { %v2014_v35 = vpop.permute.xlu1 %2013 }
 0x7e2   :  { %3994 = vmatmul.msk.f32.vlgmr.msra.gmra.mxu2 %vm503_vm0, %v2014_v35 }
 0x7e4   :  { %v2026_v36 = vpop.permute.xlu0 %2025 }
 0x7e5   :  { %3991 = vmatpush.xpose.msk.msra.mxu1 %vm503_vm0, %v2026_v36 }
 0x7e8   :  { %3992 = vmatmul.msk.f32.vlgmr.msra.gmra.mxu1 %vm503_vm0, %v2012_v37 }
 0x7e9   :  { %v2010_v20 = vpop.permute.xlu1 %2009 }
 0x7ea   :  { %3990 = vmatmul.msk.f32.vlgmr.msrb.gmra.mxu0 %vm503_vm0, %v2010_v20 }
 0x7ec   :  { %v2016_v38 = vpop.permute.xlu0 %2015 }
 0x7ed   :  { %3996 = vmatmul.msk.f32.vlgmr.msra.gmra.mxu3 %vm503_vm0, %v2016_v38 }
 0x7f1   :  { %v2034_v39 = vpop.permute.xlu1 %2033 }
 0x7f2   :  { %v2076_v40 = vpop.f32.mrf.mxu2  ;;  %3999 = vmatpush.xpose.msk.msrb.mxu1 %vm503_vm0, %v2034_v39 }
 0x7f3   :  { %v2247_v41 = vsel %vm696_vm1, %v2076_v40, -inf }
 0x7f4   :  { %v2032_v42 = vpop.permute.xlu0 %2031  ;;  %2248 = vmax.xlane.f32.xlu1 %v2247_v41 }
 0x7f5   :  { %3997 = vmatpush.xpose.msk.msra.mxu0 %vm503_vm0, %v2032_v42 }
 0x7f8   :  { %3998 = vmatmul.msk.f32.vlgmr.msra.gmra.mxu0 %vm503_vm0, %v2018_v43 }
 0x7fa   :  { %v2100_v44 = vpop.f32.mrf.mxu3 }
 0x7fb   :  { %v2250_v45 = vsel %vm696_vm1, %v2100_v44, -inf }
 0x7fc   :  { %v2020_v47 = vpop.permute.xlu0 %2019  ;;  %2251 = vmax.xlane.f32.xlu2 %v2250_v45 }
 0x7fd   :  { %4000 = vmatmul.msk.f32.vlgmr.msrb.gmra.mxu1 %vm503_vm0, %v2020_v47  ;;  %v4590_v47 = vpack.i.bf16 %v5404_v31, %v5408_v33 }
 0x865   :  { %v2148_v48 = vpop.f32.mrf.mxu1  ;;  %v2172_v51 = vpop.f32.mrf.mxu2 }
 0x866   :  { %v2256_v56 = vsel %vm696_vm1, %v2148_v48, -inf  ;;  %v2259_v53 = vsel %vm696_vm1, %v2172_v51, -inf }
 0x867   :  { %2257 = vmax.xlane.f32.xlu1 %v2256_v56  ;;  %v2124_v57 = vpop.f32.mrf.mxu0  ;;  %v2249_v58 = vpop.xlane.xlu1 %2248  ;;  %2260 = vmax.xlane.f32.xlu2 %v2259_v53 }
 0x868   :  { %v2271_v59 = vsub.f32 %v2076_v40, %v2249_v58  ;;  %v2253_v60 = vsel %vm696_vm1, %v2124_v57, -inf }
 0x869   :  { %2254 = vmax.xlane.f32.xlu0 %v2253_v60 }
 0x86a   :  { %v2279_v61 = vmul.f32 1.442695, %v2271_v59 }
 0x86c   :  { %4675 = vpow2.f32 %v2279_v61 }
 0x86f   :  { %v2252_v62 = vpop.xlane.xlu2 %2251 }
 0x870   :  { %v2196_v50 = vpop.f32.mrf.mxu3  ;;  %v2272_v0 = vsub.f32 %v2100_v44, %v2252_v62 }
 0x871   :  { %v2262_v1 = vsel %vm696_vm1, %v2196_v50, -inf }
 0x872   :  { %v2281_v49 = vmul.f32 1.442695, %v2272_v0  ;;  %2263 = vmax.xlane.f32.xlu0 %v2262_v1  ;;  %v4676_v3 = vpop.eup %4675 }
 0x873   :  { %v2295_v5 = vsel %vm696_vm1, %v4676_v3, 0.0 }
 0x874   :  { %4677 = vpow2.f32 %v2281_v49 }
 0x875   :  { %v2220_v2 = vpop.f32.mrf.mxu0 }
 0x876   :  { %v2265_v4 = vsel %vm696_vm1, %v2220_v2, -inf }
 0x877   :  { %2266 = vmax.xlane.f32.xlu1 %v2265_v4 }
 0x87a   :  { %v2244_v6 = vpop.f32.mrf.mxu1  ;;  %2296 = vadd.xlane.f32.xlu0 %v2295_v5  ;;  %v4678_v7 = vpop.eup %4677 }
 0x87b   :  { %v2268_v8 = vsel %vm696_vm1, %v2244_v6, -inf  ;;  %v2298_v9 = vsel %vm696_vm1, %v4678_v7, 0.0 }
 0x87c   :  { %2269 = vmax.xlane.f32.xlu2 %v2268_v8 }
 0x87f   :  { %2299 = vadd.xlane.f32.xlu1 %v2298_v9 }
 0x8da   :  { %v2258_v10 = vpop.xlane.xlu1 %2257  ;;  %v2261_v11 = vpop.xlane.xlu2 %2260 }
 0x8db   :  { %v2274_v12 = vsub.f32 %v2148_v48, %v2258_v10  ;;  %v2275_v13 = vsub.f32 %v2172_v51, %v2261_v11 }
 0x8dc   :  { %v2255_v14 = vpop.xlane.xlu0 %2254 }
 0x8dd   :  { %v2285_v54 = vmul.f32 1.442695, %v2274_v12  ;;  %v2287_v63 = vmul.f32 1.442695, %v2275_v13  ;;  %v2273_v17 = vsub.f32 %v2124_v57, %v2255_v14 }
 0x8df   :  { %4679 = vpow2.f32 %v2285_v54  ;;  %v2283_v18 = vmul.f32 1.442695, %v2273_v17 }
 0x8e0   :  { %4681 = vpow2.f32 %v2287_v63 }
 0x8e1   :  { %4683 = vpow2.f32 %v2283_v18 }
 0x8e5   :  { %v4680_v46 = vpop.eup %4679  ;;  %v2264_v28 = vpop.xlane.xlu0 %2263 }
 0x8e6   :  { %v5431_v21 = vpop.eup %4681  ;;  %v2276_v52 = vsub.f32 %v2196_v50, %v2264_v28  ;;  %v2304_v22 = vsel %vm696_vm1, %v4680_v46, 0.0 }
 0x8e7   :  { %v4684_v23 = vpop.eup %4683  ;;  %2305 = vadd.xlane.f32.xlu0 %v2304_v22  ;;  %v2307_v24 = vsel %vm696_vm1, %v5431_v21, 0.0 }
 0x8e8   :  { %v2289_v25 = vmul.f32 1.442695, %v2276_v52  ;;  %2308 = vadd.xlane.f32.xlu1 %v2307_v24  ;;  %v2301_v26 = vsel %vm696_vm1, %v4684_v23, 0.0  ;;  %v4458_v24 = vld [vmem:[#allocation10 + $0x70] sm:$0xff] }
 0x8e9   :  { %2302 = vadd.xlane.f32.xlu2 %v2301_v26  ;;  %v4456_v26 = vld [vmem:[#allocation10 + $0x60] sm:$0xff] }
 0x8ea   :  { %4685 = vpow2.f32 %v2289_v25  ;;  %v2267_v27 = vpop.xlane.xlu1 %2266  ;;  %v4457_v25 = vld [vmem:[#allocation10 + $0x68] sm:$0xff] }
 0x8eb   :  { %v2277_v19 = vsub.f32 %v2220_v2, %v2267_v27  ;;  %v4455_v27 = vld [vmem:[#allocation10 + $0x58] sm:$0xff] }
 0x8ed   :  { %v2291_v29 = vmul.f32 1.442695, %v2277_v19  ;;  %v2297_v30 = vpop.xlane.xlu0 %2296  ;;  %v4454_v19 = vld [vmem:[#allocation10 + $0x50] sm:$0xff] }
 0x8ee   :  { %4687 = vrcp.f32 %v2297_v30  ;;  %v4452_v30 = vld [vmem:[#allocation10 + $0x40] sm:$0xff] }
 0x8ef   :  { %4689 = vpow2.f32 %v2291_v29  ;;  %v2270_v32 = vpop.xlane.xlu2 %2269  ;;  %v4453_v29 = vld [vmem:[#allocation10 + $0x48] sm:$0xff] }
 0x8f0   :  { %v4686_v34 = vpop.eup %4685  ;;  %v2278_v35 = vsub.f32 %v2244_v6, %v2270_v32 }
 0x8f1   :  { %v2310_v36 = vsel %vm696_vm1, %v4686_v34, 0.0 }
 0x8f2   :  { %v2293_v37 = vmul.f32 1.442695, %v2278_v35  ;;  %v2300_v20 = vpop.xlane.xlu1 %2299  ;;  %2311 = vadd.xlane.f32.xlu2 %v2310_v36 }
 0x8f3   :  { %4691 = vrcp.f32 %v2300_v20 }
 0x8f4   :  { %v4688_v38 = vpop.eup %4687  ;;  %4693 = vpow2.f32 %v2293_v37 }
 0x8f5   :  { %v4690_v39 = vpop.eup %4689  ;;  %v2327_v40 = vmul.f32 %v4688_v38, %v4676_v3 }
 0x8f6   :  { %v2313_v41 = vsel %vm696_vm1, %v4690_v39, 0.0 }
 0x8f7   :  { %4001 = vmatmul.msk.f32.vlgmr.msrb.gmra.mxu2 %vm696_vm1, %v2327_v40  ;;  %2314 = vadd.xlane.f32.xlu0 %v2313_v41 }
 0x8f9   :  { %v4692_v42 = vpop.eup %4691 }
 0x8fa   :  { %v4694_v43 = vpop.eup %4693  ;;  %v2328_v44 = vmul.f32 %v4692_v42, %v4678_v7 }
 0x8fb   :  { %v2316_v45 = vsel %vm696_vm1, %v4694_v43, 0.0 }
 0x8fc   :  { %4002 = vmatmul.msk.f32.vlgmr.msrb.gmra.mxu3 %vm696_vm1, %v2328_v44  ;;  %2317 = vadd.xlane.f32.xlu1 %v2316_v45 }
 0x90a   :  { %4591 = vrot.lane.b32.xlu2 %v4590_v47, %s5068_s14 }
 0x90b   :  { %4596 = vrot.lane.b32.xlu0 %v4590_v47, %s5062_s19 }
 0x915   :  { %4601 = vrot.lane.b32.xlu1 %v4590_v47, %s5069_s23 }
 0x95a   :  { %v2306_v51 = vpop.xlane.xlu0 %2305 }
 0x95b   :  { %4695 = vrcp.f32 %v2306_v51  ;;  %v2309_v31 = vpop.xlane.xlu1 %2308  ;;  %v4626_v51 = vld [vmem:[%s5540_s5 + $0x1] ss:$0 sm:$0xff] }
 0x95c   :  { %v2303_v48 = vpop.xlane.xlu2 %2302 }
 0x95d   :  { %4697 = vrcp.f32 %v2303_v48 }
 0x95e   :  { %4699 = vrcp.f32 %v2309_v31  ;;  %v4157_v31 = vld [vmem:[#allocation17 + $0x1e0] sm:$0xf] }
 0x961   :  { %v4696_v53 = vpop.eup %4695 }
 0x962   :  { %v2330_v61 = vmul.f32 %v4696_v53, %v4680_v46 }
 0x963   :  { %v4698_v57 = vpop.eup %4697 }
 0x964   :  { %v2329_v62 = vmul.f32 %v4698_v57, %v4684_v23  ;;  %v4700_v50 = vpop.eup %4699  ;;  %v4459_v23 = vld [vmem:[#allocation10 + $0x78] sm:$0xff] }
 0x965   :  { %v2312_v56 = vpop.xlane.xlu2 %2311  ;;  %v2331_v4 = vmul.f32 %v4700_v50, %v5431_v21 }
 0x966   :  { %4701 = vrcp.f32 %v2312_v56 }
 0x96a   :  { %v2315_v33 = vpop.xlane.xlu0 %2314 }
 0x96b   :  { %4703 = vrcp.f32 %v2315_v33  ;;  %v4488_v33 = vld [vmem:[#allocation17 + $0x1e4] sm:$0xf] }
 0x96c   :  { %v4702_v0 = vpop.eup %4701 }
 0x96d   :  { %v4592_v58 = vpop.permute.xlu2 %4591  ;;  %v2332_v5 = vmul.f32 %v4702_v0, %v4686_v34  ;;  %v4159_v0 = vld [vmem:[#allocation17 + $0x1f0] sm:$0xf0] }
 0x96e   :  { %v4594_v59 = vunpack.i.h.bf16 %v4592_v58  ;;  %v4593_v60 = vunpack.i.l.bf16 %v4592_v58 }
 0x96f   :  { %v2318_v1 = vpop.xlane.xlu1 %2317 }
 0x970   :  { %2399 = vmatpush.msrb.mxu0 %v4593_v60  ;;  %2422 = vmatpush.msra.mxu1 %v4594_v59  ;;  %4705 = vrcp.f32 %v2318_v1  ;;  %v4165_v1 = vld [vmem:[#allocation17 + $0x1e8] sm:$0xf] }
 0x971   :  { %4003 = vmatmul.msk.f32.vlgmr.msrb.gmra.mxu0 %vm696_vm1, %v2329_v62  ;;  %4004 = vmatmul.msk.f32.vlgmr.msra.gmra.mxu1 %vm696_vm1, %v2330_v61  ;;  %v4704_v6 = vpop.eup %4703 }
 0x972   :  { %v2333_v11 = vmul.f32 %v4704_v6, %v4690_v39  ;;  %v4141_v6 = vld [vmem:[#allocation17 + $0x1c0] sm:$0xf] }
 0x976   :  { %v4706_v7 = vpop.eup %4705 }
 0x977   :  { %v2334_v12 = vmul.f32 %v4706_v7, %v4694_v43  ;;  %v4486_v7 = vld [vmem:[#allocation17 + $0x1cc] sm:$0xf0] }
 0x97a   :  { %v2355_v63 = vpop.f32.mrf.mxu2 }
 0x97d   :  { %v4597_v49 = vpop.permute.xlu0 %4596 }
 0x97e   :  { %v4599_v2 = vunpack.i.h.bf16 %v4597_v49  ;;  %v4598_v3 = vunpack.i.l.bf16 %v4597_v49  ;;  %v4491_v49 = vld [vmem:[#allocation17 + $0x1f4] sm:$0xf0] }
 0x97f   :  { %v2378_v17 = vpop.f32.mrf.mxu3 }
 0x980   :  { %2445 = vmatpush.msra.mxu2 %v4598_v3  ;;  %2468 = vmatpush.msra.mxu3 %v4599_v2  ;;  %v4162_v2 = vor.u32 %v4488_v33, %v4159_v0  ;;  %v4166_v3 = vor.u32 %v4491_v49, %v4165_v1  ;;  %v4079_v0 = vld [vmem:[#allocation17 + $0x150] sm:$0xf0]  ;;  %v4085_v1 = vld [vmem:[#allocation17 + $0x148] sm:$0xf]  ;;  %v4471_v49 = vld [vmem:[#allocation17 + $0x154] sm:$0xf0] }
 0x981   :  { %4005 = vmatmul.msk.f32.vlgmr.msra.gmra.mxu2 %vm696_vm1, %v2331_v4  ;;  %4006 = vmatmul.msk.f32.vlgmr.msra.gmra.mxu3 %vm696_vm1, %v2332_v5  ;;  %v4489_v4 = vld [vmem:[#allocation17 + $0x1ec] sm:$0xf]  ;;  %v4167_v5 = vld [vmem:[#allocation17 + $0x1f8] sm:$0xf0] }
 0x982   :  { %2620 = vmatpush.bf16.msrb.mxu2 %v4459_v23  ;;  %v4483_v23 = vld [vmem:[#allocation17 + $0x1b4] sm:$0xf0] }
 0x986   :  { %2621 = vmatpush.bf16.msrb.mxu2 %v4458_v24 }
 0x987   :  { %v4602_v8 = vpop.permute.xlu1 %4601 }
 0x988   :  { %v4604_v9 = vunpack.i.h.bf16 %v4602_v8  ;;  %v4603_v10 = vunpack.i.l.bf16 %v4602_v8  ;;  %v4484_v8 = vld [vmem:[#allocation17 + $0x1c4] sm:$0xf] }
 0x98a   :  { %2491 = vmatpush.msra.mxu0 %v4603_v10  ;;  %2514 = vmatpush.msrb.mxu1 %v4604_v9  ;;  %v4142_v9 = vor.u32 %v4486_v7, %v4141_v6  ;;  %v4143_v10 = vld [vmem:[#allocation17 + $0x1d0] sm:$0xf0] }
 0x98b   :  { %4007 = vmatmul.msk.f32.vlgmr.msra.gmra.mxu0 %vm696_vm1, %v2333_v11  ;;  %4008 = vmatmul.msk.f32.vlgmr.msrb.gmra.mxu1 %vm696_vm1, %v2334_v12  ;;  %v4149_v11 = vld [vmem:[#allocation17 + $0x1c8] sm:$0xf]  ;;  %v4487_v12 = vld [vmem:[#allocation17 + $0x1d4] sm:$0xf0] }
 0x98c   :  { %2622 = vmatpush.bf16.msrb.mxu2 %v4457_v25  ;;  %2913 = vmatpush.bf16.msrb.mxu0 %v4162_v2 }
 0x98d   :  { %2927 = vmatpush.bf16.msra.mxu1 %v4166_v3 }
 0x990   :  { %2623 = vmatpush.bf16.msrb.mxu2 %v4456_v26  ;;  %v4481_v26 = vld [vmem:[#allocation17 + $0x1ac] sm:$0xf] }
 0x994   :  { %2624 = vmatpush.bf16.msrb.mxu2 %v4455_v27  ;;  %v4135_v27 = vld [vmem:[#allocation17 + $0x1b8] sm:$0xf0] }
 0x998   :  { %2625 = vmatpush.bf16.msrb.mxu2 %v4454_v19  ;;  %v4138_v19 = vor.u32 %v4481_v26, %v4135_v27 }
 0x99c   :  { %2626 = vmatpush.bf16.msrb.mxu2 %v4453_v29  ;;  %v4109_v29 = vld [vmem:[#allocation17 + $0x180] sm:$0xf] }
 0x9a0   :  { %2627 = vmatpush.bf16.msrb.mxu2 %v4452_v30  ;;  %v4478_v30 = vld [vmem:[#allocation17 + $0x18c] sm:$0xf0] }
 0x9ee   :  { %v2401_v13 = vpop.f32.mrf.mxu0  ;;  %v2424_v14 = vpop.f32.mrf.mxu1 }
 0x9ef   :  { %v4605_v54 = vpack.i.bf16 %v2424_v14, %v2401_v13  ;;  %v4146_v13 = vor.u32 %v4484_v8, %v4143_v10  ;;  %v4150_v14 = vor.u32 %v4487_v12, %v4149_v11  ;;  %v4061_v10 = vld [vmem:[#allocation17 + $0x120] sm:$0xf]  ;;  %v4466_v11 = vld [vmem:[#allocation17 + $0x12c] sm:$0xf0]  ;;  %v4464_v12 = vld [vmem:[#allocation17 + $0x124] sm:$0xf] }
 0x9f1   :  { %4606 = vrot.lane.b32.xlu0 %v4605_v54, %s5069_s23  ;;  %v4485_v54 = vld [vmem:[#allocation17 + $0x1cc] sm:$0xf]  ;;  %2914 = vmatpush.bf16.msrb.mxu0 %v4146_v13  ;;  %v4062_v13 = vor.u32 %v4466_v11, %v4061_v10  ;;  %v4627_v11 = vld [vmem:[#allocation11 + $0x1] ss:$0 sm:$0xff] }
 0x9f2   :  { %2928 = vmatpush.bf16.msra.mxu1 %v4150_v14  ;;  %v4063_v14 = vld [vmem:[#allocation17 + $0x130] sm:$0xf0] }
 0xa04   :  { %v2447_v18 = vpop.f32.mrf.mxu2  ;;  %v2470_v46 = vpop.f32.mrf.mxu3 }
 0xa05   :  { %v4610_v28 = vpack.i.bf16 %v2470_v46, %v2447_v18  ;;  %v4125_v18 = vld [vmem:[#allocation17 + $0x1a0] sm:$0xf]  ;;  %v4482_v46 = vld [vmem:[#allocation17 + $0x1ac] sm:$0xf0] }
 0xa07   :  { %4611 = vrot.lane.b32.xlu2 %v4610_v28, %s5062_s19  ;;  %v4480_v28 = vld [vmem:[#allocation17 + $0x1a4] sm:$0xf] }
 0xa08   :  { %v2493_v21 = vpop.f32.mrf.mxu0  ;;  %v2516_v52 = vpop.f32.mrf.mxu1 }
 0xa09   :  { %v4615_v22 = vpack.i.bf16 %v2516_v52, %v2493_v21  ;;  %v4126_v21 = vor.u32 %v4482_v46, %v4125_v18  ;;  %v4127_v52 = vld [vmem:[#allocation17 + $0x1b0] sm:$0xf0]  ;;  %v4066_v18 = vor.u32 %v4464_v12, %v4063_v14 }
 0xa0a   :  { %v4130_v24 = vor.u32 %v4480_v28, %v4127_v52  ;;  %v4465_v28 = vld [vmem:[#allocation17 + $0x12c] sm:$0xf]  ;;  %v4045_v52 = vld [vmem:[#allocation17 + $0x100] sm:$0xf] }
 0xa0b   :  { %4616 = vrot.lane.b32.xlu1 %v4615_v22, %s5068_s14  ;;  %v4133_v22 = vld [vmem:[#allocation17 + $0x1a8] sm:$0xf] }
 0xa0c   :  { %v4134_v25 = vor.u32 %v4483_v23, %v4133_v22  ;;  %2915 = vmatpush.bf16.msrb.mxu0 %v4130_v24  ;;  %v4462_v23 = vld [vmem:[#allocation17 + $0x10c] sm:$0xf0]  ;;  %v4460_v24 = vld [vmem:[#allocation17 + $0x104] sm:$0xf] }
 0xa0d   :  { %v4046_v27 = vor.u32 %v4462_v23, %v4045_v52  ;;  %v4520_v52 = vld [vmem:[#allocation19 + $0x1e0] sm:$0xff]  ;;  %v4510_v23 = vld [vmem:[#allocation19 + $0x190] sm:$0xff] }
 0xa0e   :  { %2929 = vmatpush.bf16.msra.mxu1 %v4134_v25  ;;  %v4047_v25 = vld [vmem:[#allocation17 + $0x110] sm:$0xf0] }
 0xa61   :  { %v4612_v36 = vpop.permute.xlu2 %4611 }
 0xa62   :  { %v4614_v38 = vunpack.i.h.bf16 %v4612_v36  ;;  %v4613_v39 = vunpack.i.l.bf16 %v4612_v36  ;;  %v4117_v36 = vld [vmem:[#allocation17 + $0x188] sm:$0xf] }
 0xa63   :  { %v4607_v32 = vpop.permute.xlu0 %4606 }
 0xa64   :  { %v4609_v34 = vunpack.i.h.bf16 %v4607_v32  ;;  %v4608_v35 = vunpack.i.l.bf16 %v4607_v32  ;;  %v4476_v32 = vld [vmem:[#allocation17 + $0x184] sm:$0xf] }
 0xa66   :  { %v2544_v37 = vsel %vm503_vm0, %v2378_v17, %v4609_v34  ;;  %v2543_v20 = vsel %vm503_vm0, %v2355_v63, %v4608_v35  ;;  %v4151_v63 = vld [vmem:[#allocation17 + $0x1d8] sm:$0xf0]  ;;  %v4110_v34 = vor.u32 %v4478_v30, %v4109_v29  ;;  %v4111_v35 = vld [vmem:[#allocation17 + $0x190] sm:$0xf0]  ;;  %v4053_v29 = vld [vmem:[#allocation17 + $0x108] sm:$0xf] }
 0xa67   :  { %v2545_v43 = vsel %vm995_vm2, %v2543_v20, %v4613_v39  ;;  %v2546_v44 = vsel %vm995_vm2, %v2544_v37, %v4614_v38  ;;  %v4154_v17 = vor.u32 %v4485_v54, %v4151_v63  ;;  %v4479_v37 = vld [vmem:[#allocation17 + $0x194] sm:$0xf0]  ;;  %v4114_v20 = vor.u32 %v4476_v32, %v4111_v35  ;;  %v4477_v39 = vld [vmem:[#allocation17 + $0x18c] sm:$0xf]  ;;  %v4069_v54 = vld [vmem:[#allocation17 + $0x128] sm:$0xf] }
 0xa68   :  { %v4118_v38 = vor.u32 %v4479_v37, %v4117_v36  ;;  %v4467_v63 = vld [vmem:[#allocation17 + $0x134] sm:$0xf0]  ;;  %v4461_v35 = vld [vmem:[#allocation17 + $0x10c] sm:$0xf]  ;;  %v4055_v36 = vld [vmem:[#allocation17 + $0x118] sm:$0xf0] }
 0xa69   :  { %2916 = vmatpush.bf16.msrb.mxu0 %v4114_v20  ;;  %v4070_v46 = vor.u32 %v4467_v63, %v4069_v54  ;;  %v4463_v30 = vld [vmem:[#allocation17 + $0x114] sm:$0xf0]  ;;  %v4058_v20 = vor.u32 %v4461_v35, %v4055_v36  ;;  %v4517_v35 = vld [vmem:[#allocation19 + $0x1c8] sm:$0xff]  ;;  %v4492_v36 = vld [vmem:[#allocation19 + $0x100] sm:$0xff] }
 0xa6a   :  { %2930 = vmatpush.bf16.msra.mxu1 %v4118_v38 }
 0xa7d   :  { %v4617_v40 = vpop.permute.xlu1 %4616 }
 0xa7e   :  { %v4619_v41 = vunpack.i.h.bf16 %v4617_v40  ;;  %v4618_v42 = vunpack.i.l.bf16 %v4617_v40  ;;  %v4119_v40 = vld [vmem:[#allocation17 + $0x198] sm:$0xf0] }
 0xa80   :  { %v2548_v45 = vsel %vm998_vm3, %v2546_v44, %v4619_v41  ;;  %v2547_v47 = vsel %vm998_vm3, %v2545_v43, %v4618_v42  ;;  %v4122_v41 = vor.u32 %v4477_v39, %v4119_v40  ;;  %v4093_v42 = vld [vmem:[#allocation17 + $0x160] sm:$0xf]  ;;  %v4474_v43 = vld [vmem:[#allocation17 + $0x16c] sm:$0xf0]  ;;  %v4472_v44 = vld [vmem:[#allocation17 + $0x164] sm:$0xf] }
 0xa81   :  { %v2549_v48 = vpack.c.bf16 %v2548_v45, %v2547_v47  ;;  %v4094_v45 = vor.u32 %v4474_v43, %v4093_v42  ;;  %v4095_v47 = vld [vmem:[#allocation17 + $0x170] sm:$0xf0]  ;;  %v4515_v42 = vld [vmem:[#allocation19 + $0x1b8] sm:$0xff] }
 0xa83   :  { %2628 = vmatmul.bf16.vlgmr.msrb.gmra.mxu2 %v2549_v48  ;;  %v4101_v48 = vld [vmem:[#allocation17 + $0x168] sm:$0xf] }
 0xb06   :  { %v2629_v56 = vpop.f32.mrf.mxu2 }
 0xb07   :  { %v2630_v53 = vadd.f32 %v4626_v51, %v2629_v56  ;;  %v4098_v56 = vor.u32 %v4472_v44, %v4095_v47  ;;  %v4499_v44 = vld [vmem:[#allocation19 + $0x138] sm:$0xff]  ;;  %v4506_v47 = vld [vmem:[#allocation19 + $0x170] sm:$0xff] }
 0xb09   :  { %v5467_v57 = vadd.f32 %v2630_v53, %v5381_v15  ;;  %v4490_v15 = vld [vmem:[#allocation17 + $0x1ec] sm:$0xf0]  ;;  %2917 = vmatpush.bf16.msrb.mxu0 %v4098_v56 }
 0xb0a   :  { %v4158_v50 = vor.u32 %v4490_v15, %v4157_v31  ;;  %v4470_v31 = vld [vmem:[#allocation17 + $0x14c] sm:$0xf0]  ;;  %v4468_v15 = vld [vmem:[#allocation17 + $0x144] sm:$0xf] }
 0xb0b   :  { %2640 = vadd.xlane.f32.xlu0 %v5467_v57  ;;  %v2646_v58 = vmul.f32 %v5467_v57, %v5467_v57  ;;  %v4082_v3 = vor.u32 %v4468_v15, %v4079_v0  ;;  %v4497_v15 = vld [vmem:[#allocation19 + $0x128] sm:$0xff] }
 0xb0c   :  { %2899 = vmatpush.bf16.msrb.mxu3 %v4158_v50 }
 0xb0d   :  { %2648 = vadd.xlane.f32.xlu1 %v2646_v58  ;;  %v4473_v58 = vld [vmem:[#allocation17 + $0x16c] sm:$0xf]  ;;  %2918 = vmatpush.bf16.msrb.mxu0 %v4082_v3 }
 0xb0e   :  { %v2631_v59 = vpop.f32.mrf.mxu2 }
 0xb0f   :  { %v2632_v60 = vadd.f32 %v4626_v51, %v2631_v59  ;;  %v4475_v51 = vld [vmem:[#allocation17 + $0x174] sm:$0xf0]  ;;  %v4103_v59 = vld [vmem:[#allocation17 + $0x178] sm:$0xf0] }
 0xb10   :  { %2900 = vmatpush.bf16.msrb.mxu3 %v4142_v9  ;;  %v4102_v53 = vor.u32 %v4475_v51, %v4101_v48  ;;  %v4514_v48 = vld [vmem:[#allocation19 + $0x1b0] sm:$0xff] }
 0xb11   :  { %v5473_v61 = vadd.f32 %v2632_v60, %v5383_v16  ;;  %v4170_v16 = vor.u32 %v4489_v4, %v4167_v5  ;;  %v4106_v60 = vor.u32 %v4473_v58, %v4103_v59  ;;  %v4086_v4 = vor.u32 %v4471_v49, %v4085_v1  ;;  %v4469_v5 = vld [vmem:[#allocation17 + $0x14c] sm:$0xf]  ;;  %2919 = vmatpush.bf16.msrb.mxu0 %v4066_v18  ;;  %v4522_v58 = vld [vmem:[#allocation19 + $0x1f0] sm:$0xff]  ;;  %v4504_v1 = vld [vmem:[#allocation19 + $0x160] sm:$0xff] }
 0xb12   :  { %2931 = vmatpush.bf16.msra.mxu1 %v4102_v53  ;;  %v4498_v53 = vld [vmem:[#allocation19 + $0x130] sm:$0xff]  ;;  %v4512_v49 = vld [vmem:[#allocation19 + $0x1a0] sm:$0xff] }
 0xb13   :  { %2642 = vadd.xlane.f32.xlu2 %v5473_v61  ;;  %v2647_v62 = vmul.f32 %v5473_v61, %v5473_v61  ;;  %2941 = vmatpush.bf16.msra.mxu2 %v4170_v16  ;;  %v4087_v16 = vld [vmem:[#allocation17 + $0x158] sm:$0xf0] }
 0xb14   :  { %2901 = vmatpush.bf16.msrb.mxu3 %v4126_v21  ;;  %v4090_v7 = vor.u32 %v4469_v5, %v4087_v16  ;;  %v4071_v21 = vld [vmem:[#allocation17 + $0x138] sm:$0xf0] }
 0xb15   :  { %2650 = vadd.xlane.f32.xlu0 %v2647_v62  ;;  %v4077_v62 = vld [vmem:[#allocation17 + $0x140] sm:$0xf]  ;;  %v4074_v22 = vor.u32 %v4465_v28, %v4071_v21  ;;  %v4511_v21 = vld [vmem:[#allocation19 + $0x198] sm:$0xff] }
 0xb16   :  { %v4078_v50 = vor.u32 %v4470_v31, %v4077_v62  ;;  %2932 = vmatpush.bf16.msra.mxu1 %v4086_v4  ;;  %v4505_v62 = vld [vmem:[#allocation19 + $0x168] sm:$0xff] }
 0xb17   :  { %2942 = vmatpush.bf16.msra.mxu2 %v4154_v17  ;;  %v4513_v31 = vld [vmem:[#allocation19 + $0x1a8] sm:$0xff] }
 0xb18   :  { %2902 = vmatpush.bf16.msrb.mxu3 %v4110_v34  ;;  %v4054_v34 = vor.u32 %v4463_v30, %v4053_v29  ;;  %v4518_v29 = vld [vmem:[#allocation19 + $0x1d0] sm:$0xff]  ;;  %v4500_v30 = vld [vmem:[#allocation19 + $0x140] sm:$0xff] }
 0xb1a   :  { %2933 = vmatpush.bf16.msra.mxu1 %v4070_v46 }
 0xb1b   :  { %2943 = vmatpush.bf16.msra.mxu2 %v4138_v19  ;;  %v4050_v19 = vor.u32 %v4460_v24, %v4047_v25  ;;  %v4495_v24 = vld [vmem:[#allocation19 + $0x118] sm:$0xff] }
 0xb1c   :  { %2903 = vmatpush.bf16.msrb.mxu3 %v4094_v45  ;;  %v4523_v45 = vld [vmem:[#allocation19 + $0x1f8] sm:$0xff] }
 0xb1d   :  { %2920 = vmatpush.bf16.msrb.mxu0 %v4050_v19  ;;  %v4519_v25 = vld [vmem:[#allocation19 + $0x1d8] sm:$0xff]  ;;  %v4494_v19 = vld [vmem:[#allocation19 + $0x110] sm:$0xff] }
 0xb1e   :  { %2934 = vmatpush.bf16.msra.mxu1 %v4054_v34  ;;  %v4493_v34 = vld [vmem:[#allocation19 + $0x108] sm:$0xff] }
 0xb1f   :  { %2944 = vmatpush.bf16.msra.mxu2 %v4122_v41  ;;  %v4507_v41 = vld [vmem:[#allocation19 + $0x178] sm:$0xff] }
 0xb20   :  { %2904 = vmatpush.bf16.msrb.mxu3 %v4078_v50 }
 0xb21   :  { %3243 = vmatpush.bf16.msra.mxu0 %v4507_v41 }
 0xb22   :  { %3257 = vmatpush.bf16.msrb.mxu1 %v4515_v42 }
 0xb23   :  { %2945 = vmatpush.bf16.msra.mxu2 %v4106_v60 }
 0xb24   :  { %2905 = vmatpush.bf16.msrb.mxu3 %v4062_v13 }
 0xb25   :  { %3244 = vmatpush.bf16.msra.mxu0 %v4506_v47 }
 0xb26   :  { %3258 = vmatpush.bf16.msrb.mxu1 %v4514_v48 }
 0xb27   :  { %2946 = vmatpush.bf16.msra.mxu2 %v4090_v7 }
 0xb28   :  { %2906 = vmatpush.bf16.msrb.mxu3 %v4046_v27  ;;  %v4509_v27 = vld [vmem:[#allocation19 + $0x188] sm:$0xff] }
 0xb29   :  { %3245 = vmatpush.bf16.msra.mxu0 %v4505_v62 }
 0xb2a   :  { %3259 = vmatpush.bf16.msrb.mxu1 %v4513_v31 }
 0xb2b   :  { %2947 = vmatpush.bf16.msra.mxu2 %v4074_v22  ;;  %v4502_v22 = vld [vmem:[#allocation19 + $0x150] sm:$0xff] }
 0xb2c   :  { %3229 = vmatpush.bf16.msra.mxu3 %v4499_v44 }
 0xb2d   :  { %3246 = vmatpush.bf16.msra.mxu0 %v4504_v1 }
 0xb2e   :  { %3260 = vmatpush.bf16.msrb.mxu1 %v4512_v49 }
 0xb2f   :  { %2948 = vmatpush.bf16.msra.mxu2 %v4058_v20  ;;  %v4042_v20 = vld [vmem:[%s5546_s11 + $0x4] sm:$0xf] }
 0xb30   :  { %3230 = vmatpush.bf16.msra.mxu3 %v4498_v53  ;;  %v2733_v41 = vperm.slane %v4042_v20, 2  ;;  %v2731_v48 = vperm.slane %v4042_v20, 0  ;;  %v2734_v53 = vperm.slane %v4042_v20, 3 }
 0xb32   :  { %3261 = vmatpush.bf16.msrb.mxu1 %v4511_v21 }
 0xb33   :  { %3271 = vmatpush.bf16.msrb.mxu2 %v4523_v45 }
 0xb34   :  { %3231 = vmatpush.bf16.msra.mxu3 %v4497_v15 }
 0xb36   :  { %3262 = vmatpush.bf16.msrb.mxu1 %v4510_v23 }
 0xb37   :  { %3272 = vmatpush.bf16.msrb.mxu2 %v4522_v58 }
 0xb3a   :  { %3263 = vmatpush.bf16.msrb.mxu1 %v4509_v27 }
 0xb7e   :  { %v2641_v33 = vpop.xlane.xlu0 %2640 }
 0xb7f   :  { %v5479_v2 = vmul.f32 %v2641_v33, %v5323_v55  ;;  %v4521_v33 = vld [vmem:[#allocation19 + $0x1e8] sm:$0xff] }
 0xb80   :  { %v2649_v6 = vpop.xlane.xlu1 %2648  ;;  %3273 = vmatpush.bf16.msrb.mxu2 %v4521_v33 }
 0xb81   :  { %v2654_v8 = vmul.f32 %v5479_v2, %v5479_v2  ;;  %v2652_v9 = vmul.f32 %v2649_v6, %v5323_v55 }
 0xb83   :  { %v2656_v17 = vsub.f32 %v2652_v9, %v2654_v8  ;;  %v2658_v8 = vsub.f32 %v5467_v57, %v5479_v2  ;;  %v4503_v2 = vld [vmem:[#allocation19 + $0x158] sm:$0xff] }
 0xb84   :  { %3247 = vmatpush.bf16.msra.mxu0 %v4503_v2  ;;  %3274 = vmatpush.bf16.msrb.mxu2 %v4520_v52 }
 0xb85   :  { %v5484_v26 = vadd.f32 1e-05, %v2656_v17  ;;  %v4628_v17 = vld [vmem:[#allocation13 + $0x1] ss:$0 sm:$0xff] }
 0xb86   :  { %v2643_v32 = vpop.xlane.xlu2 %2642 }
 0xb87   :  { %4707 = vrsqrt.f32 %v5484_v26  ;;  %v5488_v37 = vmul.f32 %v2643_v32, %v5323_v55  ;;  %vm2668_vm1 = vweird.f32 %v5484_v26  ;;  %v4508_v32 = vld [vmem:[#allocation19 + $0x180] sm:$0xff] }
 0xb88   :  { %v2651_v38 = vpop.xlane.xlu0 %2650  ;;  %3248 = vmatpush.bf16.msra.mxu0 %v4502_v22  ;;  %3275 = vmatpush.bf16.msrb.mxu2 %v4519_v25 }
 0xb89   :  { %v2655_v39 = vmul.f32 %v5488_v37, %v5488_v37  ;;  %v2653_v40 = vmul.f32 %v2651_v38, %v5323_v55  ;;  %v2659_v13 = vsub.f32 %v5473_v61, %v5488_v37  ;;  %v4496_v61 = vld [vmem:[#allocation19 + $0x120] sm:$0xff]  ;;  %3264 = vmatpush.bf16.msrb.mxu1 %v4508_v32 }
 0xb8a   :  { %3232 = vmatpush.bf16.msra.mxu3 %v4496_v61  ;;  %v4516_v37 = vld [vmem:[#allocation19 + $0x1c0] sm:$0xff] }
 0xb8b   :  { %v2657_v43 = vsub.f32 %v2653_v40, %v2655_v39  ;;  %v2732_v40 = vperm.slane %v4042_v20, 1  ;;  %v4529_v20 = vld [vmem:[#allocation20 + $0x28] sm:$0xff] }
 0xb8c   :  { %3276 = vmatpush.bf16.msrb.mxu2 %v4518_v29 }
 0xb8d   :  { %v4708_v51 = vpop.eup %4707  ;;  %v2661_v56 = vadd.f32 1e-05, %v2657_v43 }
 0xb8e   :  { %v2663_v59 = vmul.f32 %v4708_v51, %v5484_v26  ;;  %vm2669_vm0 = vweird.f32 %v4708_v51  ;;  %3233 = vmatpush.bf16.msra.mxu3 %v4495_v24  ;;  %v4501_v26 = vld [vmem:[#allocation19 + $0x148] sm:$0xff] }
 0xb8f   :  { %4709 = vrsqrt.f32 %v2661_v56  ;;  %vm2670_vm2 = vmor %vm2668_vm1, %vm2669_vm0  ;;  %vm2678_vm5 = vweird.f32 %v2661_v56  ;;  %3249 = vmatpush.bf16.msra.mxu0 %v4501_v26 }
 0xb90   :  { %v2664_v60 = vmul.f32 %v4708_v51, %v2663_v59  ;;  %3277 = vmatpush.bf16.msrb.mxu2 %v4517_v35 }
 0xb92   :  { %v2665_v50 = vmul.f32 0.5, %v2664_v60  ;;  %3234 = vmatpush.bf16.msra.mxu3 %v4494_v19  ;;  %v4531_v19 = vld [vmem:[#allocation20 + $0x38] sm:$0xff] }
 0xb93   :  { %3250 = vmatpush.bf16.msra.mxu0 %v4500_v30 }
 0xb94   :  { %v2666_v0 = vsub.f32 1.5, %v2665_v50  ;;  %3278 = vmatpush.bf16.msrb.mxu2 %v4516_v37 }
 0xb95   :  { %v4710_v3 = vpop.eup %4709 }
 0xb96   :  { %v2667_v4 = vmul.f32 %v4708_v51, %v2666_v0  ;;  %v2673_v5 = vmul.f32 %v4710_v3, %v2661_v56  ;;  %vm2679_vm3 = vweird.f32 %v4710_v3  ;;  %3235 = vmatpush.bf16.msra.mxu3 %v4493_v34 }
 0xb97   :  { %vm2680_vm6 = vmor %vm2678_vm5, %vm2679_vm3 }
 0xb98   :  { %v2674_v16 = vmul.f32 %v4710_v3, %v2673_v5  ;;  %v2671_v6 = vsel %vm2670_vm2, %v4708_v51, %v2667_v4 }
 0xb99   :  { %v2682_v10 = vmul.f32 %v2671_v6, %v2658_v8 }
 0xb9a   :  { %v2675_v7 = vmul.f32 0.5, %v2674_v16  ;;  %3236 = vmatpush.bf16.msra.mxu3 %v4492_v36  ;;  %v4530_v36 = vld [vmem:[#allocation20 + $0x30] sm:$0xff] }
 0xb9b   :  { %v2687_v63 = vmul.f32 %v4627_v11, %v2682_v10  ;;  %v4629_v10 = vld [vmem:[%s5548_s13 + $0x1] ss:$0 sm:$0xff] }
 0xb9c   :  { %v2676_v9 = vsub.f32 1.5, %v2675_v7 }
 0xb9d   :  { %v5499_v46 = vadd.f32 %v4628_v17, %v2687_v63 }
 0xb9e   :  { %v2677_v12 = vmul.f32 %v4710_v3, %v2676_v9 }
 0xba0   :  { %v2681_v14 = vsel %vm2680_vm6, %v4710_v3, %v2677_v12 }
 0xba1   :  { %v2683_v54 = vmul.f32 %v2681_v14, %v2659_v13 }
 0xba3   :  { %v2688_v18 = vmul.f32 %v4627_v11, %v2683_v54 }
 0xba5   :  { %v5501_v28 = vadd.f32 %v4628_v17, %v2688_v18 }
 0xba7   :  { %v2694_v57 = vpack.c.bf16 %v5501_v28, %v5499_v46 }
 0xba9   :  { %2907 = vmatmul.bf16.vlgmr.msrb.gmra.mxu3 %v2694_v57  ;;  %2921 = vmatmul.bf16.vlgmr.msrb.gmra.mxu0 %v2694_v57 }
 0xbaa   :  { %2935 = vmatmul.bf16.vlgmr.msra.gmra.mxu1 %v2694_v57  ;;  %2949 = vmatmul.bf16.vlgmr.msra.gmra.mxu2 %v2694_v57 }
 0xbab   :  { %3444 = vmatpush.bf16.msrb.mxu3 %v4531_v19 }
 0xbaf   :  { %3445 = vmatpush.bf16.msrb.mxu3 %v4530_v36 }
 0xbb3   :  { %3446 = vmatpush.bf16.msrb.mxu3 %v4529_v20  ;;  %v4632_v20 = vld [vmem:[%s5550_s15] ss:$0 sm:$0xff] }
 0xc26   :  { %v2922_v38 = vpop.f32.mrf.mxu0 }
 0xc27   :  { %v2936_v39 = vpop.f32.mrf.mxu1  ;;  %v2923_v43 = vadd.f32 %v2922_v38, %v2732_v40 }
 0xc28   :  { %v2937_v45 = vadd.f32 %v2936_v39, %v2733_v41 }
 0xc29   :  { %v2956_v59 = vmax.f32 %v2923_v43, 0.0  ;;  %v4528_v43 = vld [vmem:[#allocation20 + $0x20] sm:$0xff] }
 0xc2a   :  { %v2957_v62 = vmax.f32 %v2937_v45, 0.0  ;;  %3447 = vmatpush.bf16.msrb.mxu3 %v4528_v43  ;;  %v4527_v45 = vld [vmem:[#allocation20 + $0x18] sm:$0xff] }
 0xc2c   :  { %v2908_v42 = vpop.f32.mrf.mxu3 }
 0xc2d   :  { %v2950_v44 = vpop.f32.mrf.mxu2  ;;  %v2909_v15 = vadd.f32 %v2908_v42, %v2731_v48 }
 0xc2e   :  { %v2924_v47 = vpop.f32.mrf.mxu0  ;;  %v2951_v50 = vadd.f32 %v2950_v44, %v2734_v53  ;;  %3448 = vmatpush.bf16.msrb.mxu3 %v4527_v45 }
 0xc2f   :  { %v2925_v51 = vadd.f32 %v2924_v47, %v2732_v40  ;;  %v2938_v56 = vpop.f32.mrf.mxu1  ;;  %v2955_v5 = vmax.f32 %v2909_v15, 0.0 }
 0xc30   :  { %v2939_v58 = vadd.f32 %v2938_v56, %v2733_v41  ;;  %v2958_v6 = vmax.f32 %v2951_v50, 0.0  ;;  %v4526_v56 = vld [vmem:[#allocation20 + $0x10] sm:$0xff]  ;;  %v4630_v50 = vld [vmem:[#allocation14 + $0x1] ss:$0 sm:$0xff] }
 0xc31   :  { %v2960_v60 = vmax.f32 %v2925_v51, 0.0 }
 0xc32   :  { %v2961_v31 = vmax.f32 %v2939_v58, 0.0  ;;  %3449 = vmatpush.bf16.msrb.mxu3 %v4526_v56 }
 0xc33   :  { %v2964_v33 = vpack.c.bf16 %v2960_v60, %v2956_v59  ;;  %v4525_v59 = vld [vmem:[#allocation20 + $0x8] sm:$0xff]  ;;  %v5071_v60 = vmov 8.0  }
 0xc34   :  { %v2965_v0 = vpack.c.bf16 %v2961_v31, %v2957_v62  ;;  %v2910_v1 = vpop.f32.mrf.mxu3 }
 0xc35   :  { %v2911_v49 = vadd.f32 %v2910_v1, %v2731_v48  ;;  %v2952_v3 = vpop.f32.mrf.mxu2  ;;  %3251 = vmatmul.bf16.vlgmr.msra.gmra.mxu0 %v2964_v33 }
 0xc36   :  { %v2953_v4 = vadd.f32 %v2952_v3, %v2734_v53  ;;  %3265 = vmatmul.bf16.vlgmr.msrb.gmra.mxu1 %v2965_v0  ;;  %3450 = vmatpush.bf16.msrb.mxu3 %v4525_v59  ;;  %v4524_v0 = vld [vmem:[#allocation20] sm:$0xff] }
 0xc37   :  { %v2959_v16 = vmax.f32 %v2911_v49, 0.0 }
 0xc38   :  { %v2962_v7 = vmax.f32 %v2953_v4, 0.0  ;;  %v4631_v4 = vld [vmem:[#allocation16 + $0x1] ss:$0 sm:$0xff] }
 0xc39   :  { %v2963_v8 = vpack.c.bf16 %v2959_v16, %v2955_v5 }
 0xc3a   :  { %v2966_v9 = vpack.c.bf16 %v2962_v7, %v2958_v6  ;;  %3451 = vmatpush.bf16.msrb.mxu3 %v4524_v0 }
 0xc3b   :  { %3237 = vmatmul.bf16.vlgmr.msra.gmra.mxu3 %v2963_v8 }
 0xc3c   :  { %3279 = vmatmul.bf16.vlgmr.msrb.gmra.mxu2 %v2966_v9 }
 0xcb2   :  { %v3252_v11 = vpop.f32.mrf.mxu0 }
 0xcb3   :  { %v3266_v14 = vpop.f32.mrf.mxu1 }
 0xcba   :  { %v3254_v61 = vpop.f32.mrf.mxu0 }
 0xcbb   :  { %v3268_v23 = vpop.f32.mrf.mxu1 }
 0xcbe   :  { %v3238_v12 = vpop.f32.mrf.mxu3 }
 0xcbf   :  { %v3239_v13 = vadd.f32 %v4629_v10, %v3238_v12  ;;  %v3280_v63 = vpop.f32.mrf.mxu2 }
 0xcc1   :  { %v3253_v54 = vadd.f32 %v3252_v11, %v3239_v13 }
 0xcc3   :  { %v3267_v17 = vadd.f32 %v3266_v14, %v3253_v54 }
 0xcc5   :  { %v3281_v18 = vadd.f32 %v3280_v63, %v3267_v17 }
 0xcc6   :  { %v3240_v57 = vpop.f32.mrf.mxu3 }
 0xcc7   :  { %v5512_v2 = vadd.f32 %v3281_v18, %v5499_v46  ;;  %v3241_v21 = vadd.f32 %v4629_v10, %v3240_v57  ;;  %v3282_v25 = vpop.f32.mrf.mxu2 }
 0xcc9   :  { %v3255_v52 = vadd.f32 %v3254_v61, %v3241_v21  ;;  %3291 = vadd.xlane.f32.xlu2 %v5512_v2  ;;  %v3297_v22 = vmul.f32 %v5512_v2, %v5512_v2 }
 0xccb   :  { %v3269_v24 = vadd.f32 %v3268_v23, %v3255_v52  ;;  %3299 = vadd.xlane.f32.xlu0 %v3297_v22 }
 0xccd   :  { %v3283_v26 = vadd.f32 %v3282_v25, %v3269_v24 }
 0xccf   :  { %v5518_v27 = vadd.f32 %v3283_v26, %v5501_v28 }
 0xcd1   :  { %3293 = vadd.xlane.f32.xlu1 %v5518_v27  ;;  %v3298_v46 = vmul.f32 %v5518_v27, %v5518_v27 }
 0xcd3   :  { %3301 = vadd.xlane.f32.xlu2 %v3298_v46 }
 0xd3c   :  { %v3292_v29 = vpop.xlane.xlu2 %3291 }
 0xd3d   :  { %v3295_v30 = vmul.f32 %v3292_v29, %v5323_v55 }
 0xd3e   :  { %v3300_v32 = vpop.xlane.xlu0 %3299 }
 0xd3f   :  { %v3305_v34 = vmul.f32 %v3295_v30, %v3295_v30  ;;  %v3303_v35 = vmul.f32 %v3300_v32, %v5323_v55  ;;  %v3309_v33 = vsub.f32 %v5512_v2, %v3295_v30 }
 0xd41   :  { %v3307_v37 = vsub.f32 %v3303_v35, %v3305_v34 }
 0xd43   :  { %v3311_v28 = vadd.f32 1e-05, %v3307_v37 }
 0xd44   :  { %v3294_v38 = vpop.xlane.xlu1 %3293 }
 0xd45   :  { %4711 = vrsqrt.f32 %v3311_v28  ;;  %v3296_v39 = vmul.f32 %v3294_v38, %v5323_v55  ;;  %vm3319_vm8 = vweird.f32 %v3311_v28 }
 0xd46   :  { %v3302_v40 = vpop.xlane.xlu2 %3301 }
 0xd47   :  { %v3306_v41 = vmul.f32 %v3296_v39, %v3296_v39  ;;  %v3304_v42 = vmul.f32 %v3302_v40, %v5323_v55  ;;  %v3310_v12 = vsub.f32 %v5518_v27, %v3296_v39 }
 0xd49   :  { %v3308_v44 = vsub.f32 %v3304_v42, %v3306_v41 }
 0xd4b   :  { %v4712_v47 = vpop.eup %4711  ;;  %v3312_v48 = vadd.f32 1e-05, %v3308_v44 }
 0xd4c   :  { %v3314_v51 = vmul.f32 %v4712_v47, %v3311_v28  ;;  %vm3320_vm7 = vweird.f32 %v4712_v47 }
 0xd4d   :  { %4713 = vrsqrt.f32 %v3312_v48  ;;  %vm3321_vm9 = vmor %vm3319_vm8, %vm3320_vm7  ;;  %vm3329_vm11 = vweird.f32 %v3312_v48 }
 0xd4e   :  { %v3315_v53 = vmul.f32 %v4712_v47, %v3314_v51  ;;  %4715 = vrcp.f32 %v5071_v60 }
 0xd50   :  { %v3316_v58 = vmul.f32 0.5, %v3315_v53 }
 0xd52   :  { %v3317_v62 = vsub.f32 1.5, %v3316_v58 }
 0xd53   :  { %v4714_v31 = vpop.eup %4713 }
 0xd54   :  { %v3318_v55 = vmul.f32 %v4712_v47, %v3317_v62  ;;  %v3324_v15 = vmul.f32 %v4714_v31, %v3312_v48  ;;  %v4716_v3 = vpop.eup %4715  ;;  %vm3330_vm10 = vweird.f32 %v4714_v31 }
 0xd55   :  { %v3358_v8 = vmul.f32 8.0, %v4716_v3  ;;  %vm3331_vm12 = vmor %vm3329_vm11, %vm3330_vm10  ;;  %vm3362_vm13 = vweird.f32 %v4716_v3 }
 0xd56   :  { %v3322_v1 = vsel %vm3321_vm9, %v4712_v47, %v3318_v55  ;;  %v3325_v49 = vmul.f32 %v4714_v31, %v3324_v15 }
 0xd57   :  { %v3333_v5 = vmul.f32 %v3322_v1, %v3309_v33  ;;  %v3359_v14 = vsub.f32 1.0, %v3358_v8 }
 0xd58   :  { %v3326_v16 = vmul.f32 0.5, %v3325_v49 }
 0xd59   :  { %v3338_v6 = vmul.f32 %v4630_v50, %v3333_v5  ;;  %v3360_v57 = vmul.f32 %v4716_v3, %v3359_v14 }
 0xd5a   :  { %v3327_v7 = vsub.f32 1.5, %v3326_v16 }
 0xd5b   :  { %v3343_v9 = vadd.f32 %v4631_v4, %v3338_v6  ;;  %v3361_v22 = vadd.f32 %v4716_v3, %v3360_v57 }
 0xd5c   :  { %v3328_v10 = vmul.f32 %v4714_v31, %v3327_v7 }
 0xd5d   :  { %v3345_v11 = vrot.slane %v3343_v9, 4  ;;  %v3363_v26 = vsel %vm3362_vm13, %v4716_v3, %v3361_v22 }
 0xd5e   :  { %v3332_v13 = vsel %vm3331_vm12, %v4714_v31, %v3328_v10 }
 0xd5f   :  { %v3346_v54 = vadd.f32 %v3345_v11, %v3343_v9  ;;  %v3334_v63 = vmul.f32 %v3332_v13, %v3310_v12 }
 0xd61   :  { %v3339_v17 = vmul.f32 %v4630_v50, %v3334_v63  ;;  %v3347_v18 = vrot.slane %v3346_v54, 2 }
 0xd63   :  { %v3344_v2 = vadd.f32 %v4631_v4, %v3339_v17  ;;  %v3348_v21 = vadd.f32 %v3347_v18, %v3346_v54 }
 0xd65   :  { %v3351_v61 = vrot.slane %v3344_v2, 4  ;;  %v3349_v52 = vrot.slane %v3348_v21, 1 }
 0xd67   :  { %v3352_v23 = vadd.f32 %v3351_v61, %v3344_v2  ;;  %v3350_v24 = vadd.f32 %v3349_v52, %v3348_v21 }
 0xd69   :  { %v3353_v25 = vrot.slane %v3352_v23, 2  ;;  %v3364_v19 = vmul.f32 %v3363_v26, %v3350_v24 }
 0xd6b   :  { %v3354_v46 = vadd.f32 %v3353_v25, %v3352_v23  ;;  %v3366_v32 = vpack.c.bf16 %v3364_v19, %v3364_v19 }
 0xd6d   :  { %v3355_v27 = vrot.slane %v3354_v46, 1  ;;  %v3390_v35 = vunpack.c.l.b16 %v3366_v32 }
 0xd6f   :  { %v3356_v29 = vadd.f32 %v3355_v27, %v3354_v46 }
 0xd71   :  { %v3365_v30 = vmul.f32 %v3363_v26, %v3356_v29 }
 0xd73   :  { %v3367_v34 = vpack.c.bf16 %v3365_v30, %v3365_v30 }
 0xd75   :  { %v3391_v36 = vunpack.c.l.b16 %v3367_v34 }
 0xd77   :  { %v3393_v37 = vsel %vm3392_vm14, %v3391_v36, %v3390_v35 }
 0xd78   :  { %v3394_v28 = vpack.c.b16 %v3393_v37, %v3393_v37 }
 0xd7a   :  { %3452 = vmatmul.bf16.vlgmr.msrb.gmra.mxu3 %v3394_v28 }
 0xdfd   :  { %v3453_v38 = vpop.f32.mrf.mxu3 }
 0xdfe   :  { %v3454_v39 = vadd.f32 %v4632_v20, %v3453_v38 }
 0xe00   :  { %3457 = vst [vmem:[#allocation22] sm:$0x3] %v3454_v39 }
 0xe01   :  { %3468 = dma.vmem_to_hbm [thread:$0]  %s3464_s3, 32, %s3466_s28, [#allocation4]  }
 0xe05   :  { %v3455_v40 = vpop.f32.mrf.mxu3 }
 0xe06   :  { %5043 = dma.done.wait [#allocation4], 32  }
 0xe07   :  { %5044 = vsyncadd [#allocation4], 4294967264 }
 0xe08   :  { %3473 = vsyncpa [#allocation3], 1 }
 0xe09   :  { %3474 = vsyncpa [#allocation6], 1 }
 0xe0a   :  { %3475 = vsyncpa [#allocation9], 1 }
 0xe0b   :  { %3476 = vsyncpa [#allocation12], 1 }
 0xe0c   :  { %3477 = vsyncpa [#allocation15], 1 }
 0xe0d   :  { %3478 = vsyncpa [#allocation18], 1 }
 0xe0e   :  { %3479 = vsyncpa [#allocation21], 1 }
 0xe0f   :  { %3480 = vsyncpa [#allocation4], 1 }

</bundles_post_ra>
